<compile_context>
chip_gen: v5e
topology: v5e:2x2
jax: 0.10.0
libtpu: 0.0.40
codegen_flags: <defaults>
</compile_context>

<pallas_src>
import functools

import jax
import jax.numpy as jnp
import numpy as np
from jax import lax
from jax.experimental import pallas as pl
from jax.experimental.pallas import tpu as pltpu

EPS = 1e-5
LANE = 128


def _round_up(x, m):
    return (x + m - 1) // m * m


# --------------------------- conv1: 3x3 conv (+bias) -------------------------
def _conv1_kernel(xp_ref, w_ref, b_ref, y_ref, st_ref, acc_ref, *, H, W, Cin, Cp):
    """First conv.  Small real Cin -> 9-tap dot loop, VMEM f32 accumulator.

    Also emits per-image per-channel sum / sum-of-squares of the conv output
    (training-mode BatchNorm statistics), reduced outside the kernel.
    """
    xp = xp_ref[0]                                           # (H+2, W+2, Cin) f32
    acc_ref[...] = jnp.zeros_like(acc_ref)
    for kh in range(3):
        for kw in range(3):
            win = xp[kh:kh + H, kw:kw + W, :].reshape(H * W, Cin)
            acc_ref[...] += jnp.dot(win.astype(jnp.bfloat16),
                                    w_ref[kh * 3 + kw],
                                    preferred_element_type=jnp.float32)
    acc = acc_ref[...] + b_ref[...]                          # (H*W, Cp) f32
    y_ref[...] = acc.reshape(1, H, W, Cp).astype(y_ref.dtype)

    s = jnp.sum(acc, axis=0, keepdims=True)                  # (1, Cp)
    sq = jnp.sum(acc * acc, axis=0, keepdims=True)           # (1, Cp)
    st_ref[...] = jnp.concatenate([s, sq], axis=0).reshape(1, 2, Cp)


def conv1(xp, w9, b, Cp):
    N, Hp, Wp, Cin = xp.shape
    H, W = Hp - 2, Wp - 2
    kernel = functools.partial(_conv1_kernel, H=H, W=W, Cin=Cin, Cp=Cp)
    return pl.pallas_call(
        kernel,
        out_shape=(jax.ShapeDtypeStruct((N, H, W, Cp), jnp.bfloat16),
                   jax.ShapeDtypeStruct((N, 2, Cp), jnp.float32)),
        grid_spec=pltpu.PrefetchScalarGridSpec(
            num_scalar_prefetch=0,
            grid=(N,),
            in_specs=[
                pl.BlockSpec((1, H + 2, W + 2, Cin), lambda i: (i, 0, 0, 0)),
                pl.BlockSpec((9, Cin, Cp), lambda i: (0, 0, 0)),
                pl.BlockSpec((1, Cp), lambda i: (0, 0)),
            ],
            out_specs=[
                pl.BlockSpec((1, H, W, Cp), lambda i: (i, 0, 0, 0)),
                pl.BlockSpec((1, 2, Cp), lambda i: (i, 0, 0)),
            ],
            scratch_shapes=[pltpu.VMEM((H * W, Cp), jnp.float32)]),
        compiler_params=pltpu.CompilerParams(
            dimension_semantics=("parallel",)),
    )(xp, w9, b)


# ------------------ conv2: fused BN1 + ReLU + 3x3 conv (+bias) ----------------
def _conv2_kernel(y1p_ref, sc_ref, sh_ref, w_ref, b_ref, y_ref, st_ref, *, H, W, Cp):
    """BN1+ReLU applied to the loaded tile, then a single im2col MXU matmul."""
    y1p = y1p_ref[0].astype(jnp.float32)                     # (H+2, W+2, Cp)
    a = jnp.maximum(y1p * sc_ref[...] + sh_ref[...], 0.0)

    # Zero the 1-pixel spatial halo: PyTorch zero-pads the *post*-BN/ReLU
    # activation, so the padded ring must be exactly 0, not relu(shift).
    col = lax.broadcasted_iota(jnp.int32, a.shape, 1)
    a = jnp.where((col >= 1) & (col <= W), a, 0.0)           # left/right columns
    zrow = jnp.zeros((1, W + 2, Cp), jnp.float32)
    a = jnp.concatenate([zrow, a[1:H + 1, :, :], zrow], axis=0)   # top/bottom rows

    # im2col: 9 lane-aligned (H*W, Cp) windows side by side -> one big matmul.
    cols = jnp.concatenate(
        [a[kh:kh + H, kw:kw + W, :].reshape(H * W, Cp).astype(jnp.bfloat16)
         for kh in range(3) for kw in range(3)],
        axis=1)                                              # (H*W, 9*Cp) bf16
    acc = jnp.dot(cols, w_ref[...],
                  preferred_element_type=jnp.float32) + b_ref[...]   # (H*W, Cp)
    y_ref[...] = acc.reshape(1, H, W, Cp).astype(y_ref.dtype)

    s = jnp.sum(acc, axis=0, keepdims=True)
    sq = jnp.sum(acc * acc, axis=0, keepdims=True)
    st_ref[...] = jnp.concatenate([s, sq], axis=0).reshape(1, 2, Cp)


def conv2(y1p, scale, shift, wcols, b, Cp):
    N, Hp, Wp, _ = y1p.shape
    H, W = Hp - 2, Wp - 2
    kernel = functools.partial(_conv2_kernel, H=H, W=W, Cp=Cp)
    return pl.pallas_call(
        kernel,
        out_shape=(jax.ShapeDtypeStruct((N, H, W, Cp), jnp.bfloat16),
                   jax.ShapeDtypeStruct((N, 2, Cp), jnp.float32)),
        grid_spec=pltpu.PrefetchScalarGridSpec(
            num_scalar_prefetch=0,
            grid=(N,),
            in_specs=[
                pl.BlockSpec((1, H + 2, W + 2, Cp), lambda i: (i, 0, 0, 0)),
                pl.BlockSpec((1, Cp), lambda i: (0, 0)),
                pl.BlockSpec((1, Cp), lambda i: (0, 0)),
                pl.BlockSpec((9 * Cp, Cp), lambda i: (0, 0)),
                pl.BlockSpec((1, Cp), lambda i: (0, 0)),
            ],
            out_specs=[
                pl.BlockSpec((1, H, W, Cp), lambda i: (i, 0, 0, 0)),
                pl.BlockSpec((1, 2, Cp), lambda i: (i, 0, 0)),
            ]),
        compiler_params=pltpu.CompilerParams(
            dimension_semantics=("parallel",)),
    )(y1p, scale, shift, wcols, b)


# ----------------------------- BN2 + ReLU epilogue ----------------------------
def _bn_relu_kernel(y_ref, sc_ref, sh_ref, o_ref):
    y = y_ref[...].astype(jnp.float32)                       # (1, H, W, Cp)
    o_ref[...] = jnp.maximum(y * sc_ref[...] + sh_ref[...], 0.0).astype(o_ref.dtype)


def bn_relu(y, scale, shift):
    N, H, W, Cp = y.shape
    return pl.pallas_call(
        _bn_relu_kernel,
        out_shape=jax.ShapeDtypeStruct((N, H, W, Cp), jnp.float32),
        grid_spec=pltpu.PrefetchScalarGridSpec(
            num_scalar_prefetch=0,
            grid=(N,),
            in_specs=[
                pl.BlockSpec((1, H, W, Cp), lambda i: (i, 0, 0, 0)),
                pl.BlockSpec((1, Cp), lambda i: (0, 0)),
                pl.BlockSpec((1, Cp), lambda i: (0, 0)),
            ],
            out_specs=pl.BlockSpec((1, H, W, Cp), lambda i: (i, 0, 0, 0))),
        compiler_params=pltpu.CompilerParams(
            dimension_semantics=("parallel",)),
    )(y, scale, shift)


# --------------------------------- wrapper ------------------------------------
def _bn_affine(stats, count, gamma, beta):
    # Training-mode BN: batch mean + biased variance; padded channels have
    # zero sums and zero gamma/beta -> scale = shift = 0 (stay exactly zero).
    mean = stats[0] / count
    var = jnp.maximum(stats[1] / count - mean * mean, 0.0)
    scale = gamma * lax.rsqrt(var + EPS)
    shift = beta - mean * scale
    return scale, shift


def double_conv_forward(x_nchw, p):
    N, Cin, H, W = x_nchw.shape
    Cout = p["w1"].shape[-1]
    Cp = _round_up(Cout, LANE)
    pad_c = Cp - Cout
    count = float(N * H * W)

    # NCHW -> NHWC (channels on lanes) and spatial zero-pad for conv1's halo.
    x = jnp.transpose(x_nchw, (0, 2, 3, 1)).astype(jnp.float32)
    xp = jnp.pad(x, ((0, 0), (1, 1), (1, 1), (0, 0)))

    # Parameters: pad channel dims to the lane width, matmul weights in bf16.
    w1 = jnp.pad(p["w1"], ((0, 0), (0, 0), (0, 0), (0, pad_c)))
    w1 = w1.reshape(9, Cin, Cp).astype(jnp.bfloat16)
    b1 = jnp.pad(p["b1"], (0, pad_c)).reshape(1, Cp).astype(jnp.float32)
    w2 = jnp.pad(p["w2"], ((0, 0), (0, 0), (0, pad_c), (0, pad_c)))
    w2 = w2.reshape(9 * Cp, Cp).astype(jnp.bfloat16)
    b2 = jnp.pad(p["b2"], (0, pad_c)).reshape(1, Cp).astype(jnp.float32)
    g1 = jnp.pad(p["gamma1"], (0, pad_c)).astype(jnp.float32)
    be1 = jnp.pad(p["beta1"], (0, pad_c)).astype(jnp.float32)
    g2 = jnp.pad(p["gamma2"], (0, pad_c)).astype(jnp.float32)
    be2 = jnp.pad(p["beta2"], (0, pad_c)).astype(jnp.float32)

    # conv1 (+ per-image BN1 stats, reduced here so the grid axis stays parallel)
    y1, s1 = conv1(xp, w1, b1, Cp)
    scale1, shift1 = _bn_affine(jnp.sum(s1, axis=0), count, g1, be1)

    # conv2 with BN1 + ReLU fused into its input path.
    # TODO(synk): handle this 1-pixel halo in-kernel (sublane roll + mask) to
    # drop the remaining XLA pad pass over y1.
    y1p = jnp.pad(y1, ((0, 0), (1, 1), (1, 1), (0, 0)))
    y2, s2 = conv2(y1p,
                   scale1.reshape(1, Cp), shift1.reshape(1, Cp),
                   w2, b2, Cp)
    scale2, shift2 = _bn_affine(jnp.sum(s2, axis=0), count, g2, be2)

    # BN2 + ReLU epilogue (lane-dense Cp output), then crop + NCHW.
    out = bn_relu(y2, scale2.reshape(1, Cp), shift2.reshape(1, Cp))
    # TODO(synk): fuse this crop + NHWC->NCHW transpose into the epilogue
    # kernel's out_spec (needs an in-kernel (H*W, C) -> (C, H*W) transpose).
    return jnp.transpose(out[..., :Cout], (0, 3, 1, 2))


# --------------------------------- reference ----------------------------------
def _ref_forward(x_nchw, p):
    """Pure-JAX reference (mirrors the PyTorch module in training mode)."""
    def conv(x, w_hwio, b):
        y = lax.conv_general_dilated(
            x, w_hwio, window_strides=(1, 1), padding="SAME",
            dimension_numbers=("NCHW", "HWIO", "NCHW"))
        return y + b[None, :, None, None]

    def bn_relu_ref(y, gamma, beta):
        mean = jnp.mean(y, axis=(0, 2, 3), keepdims=True)
        var = jnp.var(y, axis=(0, 2, 3), keepdims=True)      # biased variance
        yn = (y - mean) * lax.rsqrt(var + EPS)
        return jnp.maximum(
            yn * gamma[None, :, None, None] + beta[None, :, None, None], 0.0)

    y1 = bn_relu_ref(conv(x_nchw, p["w1"], p["b1"]), p["gamma1"], p["beta1"])
    y2 = bn_relu_ref(conv(y1, p["w2"], p["b2"]), p["gamma2"], p["beta2"])
    return y2


if __name__ == "__main__":
    in_ch, out_ch = 4, 8
    N, H, W = 2, 16, 16

    key = jax.random.PRNGKey(0)
    ks = jax.random.split(key, 7)
    x = jax.random.normal(ks[0], (N, in_ch, H, W), jnp.float32)

    # Deterministic synthetic parameters (fan-in scaled, like PyTorch defaults).
    p = {
        "w1": jax.random.normal(ks[1], (3, 3, in_ch, out_ch), jnp.float32)
              * (1.0 / np.sqrt(9 * in_ch)),
        "b1": 0.05 * jax.random.normal(ks[2], (out_ch,), jnp.float32),
        "w2": jax.random.normal(ks[3], (3, 3, out_ch, out_ch), jnp.float32)
              * (1.0 / np.sqrt(9 * out_ch)),
        "b2": 0.05 * jax.random.normal(ks[4], (out_ch,), jnp.float32),
        "gamma1": 1.0 + 0.1 * jax.random.normal(ks[5], (out_ch,), jnp.float32),
        "beta1": 0.1 * jax.random.normal(ks[6], (out_ch,), jnp.float32),
        "gamma2": jnp.ones((out_ch,), jnp.float32),   # PyTorch BN default init
        "beta2": jnp.zeros((out_ch,), jnp.float32),
    }

    out = jax.jit(double_conv_forward)(x, p)
    out = jax.block_until_ready(out)

    ref = _ref_forward(x, p)
    # bf16 matmuls / bf16 intermediates -> compare at bf16-appropriate tolerance.
    np.testing.assert_allclose(np.asarray(out), np.asarray(ref),
                               rtol=2e-2, atol=2e-2)
    assert out.shape == (N, out_ch, H, W)
    print("KERNEL_OK")
</pallas_src>

<mosaic_0001>
module attributes {stable_mosaic.version = 11 : i64} {
  func.func @_conv1_kernel(%arg0: i32, %arg1: memref<1x18x18x4xf32, #tpu.memory_space<vmem>>, %arg2: memref<9x4x128xbf16, #tpu.memory_space<vmem>>, %arg3: memref<1x128xf32, #tpu.memory_space<vmem>>, %arg4: memref<1x16x16x128xbf16, #tpu.memory_space<vmem>>, %arg5: memref<1x2x128xf32, #tpu.memory_space<vmem>>, %arg6: memref<256x128xf32, #tpu.memory_space<vmem>>) attributes {dimension_semantics = [#tpu.dimension_semantics<parallel>], iteration_bounds = array<i64: 2>, scalar_prefetch = 0 : i64, scratch_operands = 1 : i64, tpu.core_type = #tpu.core_type<tc>, window_params = [{transform_indices = @transform_0, window_bounds = array<i64: 1, 18, 18, 4>}, {pipeline_mode = #tpu.pipeline_mode<synchronous>, transform_indices = @transform_1, window_bounds = array<i64: 9, 4, 128>}, {pipeline_mode = #tpu.pipeline_mode<synchronous>, transform_indices = @transform_2, window_bounds = array<i64: 1, 128>}, {transform_indices = @transform_3, window_bounds = array<i64: 1, 16, 16, 128>}, {transform_indices = @transform_4, window_bounds = array<i64: 1, 2, 128>}]} {
    %c0 = arith.constant 0 : index
    %c0_0 = arith.constant 0 : index
    %c0_1 = arith.constant 0 : index
    %c0_2 = arith.constant 0 : index
    %0 = vector.load %arg1[%c0, %c0_0, %c0_1, %c0_2] : memref<1x18x18x4xf32, #tpu.memory_space<vmem>>, vector<1x18x18x4xf32>
    %1 = vector.shape_cast %0 : vector<1x18x18x4xf32> to vector<18x18x4xf32>
    %cst = arith.constant 0.000000e+00 : f32
    %2 = vector.broadcast %cst : f32 to vector<256x128xf32>
    %c0_3 = arith.constant 0 : index
    %c0_4 = arith.constant 0 : index
    %3 = vector.load %arg6[%c0_3, %c0_4] : memref<256x128xf32, #tpu.memory_space<vmem>>, vector<256x128xf32>
    tpu.vector_store %arg6[%c0_3, %c0_4], %2 {strides = array<i32>} : memref<256x128xf32, #tpu.memory_space<vmem>>, vector<256x128xf32>,
    %4 = vector.extract_strided_slice %1 {offsets = [0, 0, 0], sizes = [16, 16, 4], strides = [1, 1, 1]} : vector<18x18x4xf32> to vector<16x16x4xf32>
    %5 = vector.shape_cast %4 : vector<16x16x4xf32> to vector<256x4xf32>
    %c0_5 = arith.constant 0 : index
    %c0_6 = arith.constant 0 : index
    %6 = vector.load %arg6[%c0_5, %c0_6] : memref<256x128xf32, #tpu.memory_space<vmem>>, vector<256x128xf32>
    %7 = arith.truncf %5 : vector<256x4xf32> to vector<256x4xbf16>
    %c0_7 = arith.constant 0 : index
    %c0_8 = arith.constant 0 : index
    %c0_9 = arith.constant 0 : index
    %8 = vector.load %arg2[%c0_7, %c0_8, %c0_9] : memref<9x4x128xbf16, #tpu.memory_space<vmem>>, vector<1x4x128xbf16>
    %9 = vector.shape_cast %8 : vector<1x4x128xbf16> to vector<4x128xbf16>
    %cst_10 = arith.constant dense<0.000000e+00> : vector<256x128xf32>
    %10 = tpu.matmul %7, %9, %cst_10 {dimension_numbers = #tpu.dot_dimension_numbers<[1], [0], [0], [1], [0, 0, 1, 1], [], []>} : vector<256x4xbf16>, vector<4x128xbf16>, vector<256x128xf32> -> vector<256x128xf32>
    %11 = arith.addf %6, %10 : vector<256x128xf32>
    %c0_11 = arith.constant 0 : index
    %c0_12 = arith.constant 0 : index
    %12 = vector.load %arg6[%c0_11, %c0_12] : memref<256x128xf32, #tpu.memory_space<vmem>>, vector<256x128xf32>
    tpu.vector_store %arg6[%c0_11, %c0_12], %11 {strides = array<i32>} : memref<256x128xf32, #tpu.memory_space<vmem>>, vector<256x128xf32>,
    %13 = vector.extract_strided_slice %1 {offsets = [0, 1, 0], sizes = [16, 16, 4], strides = [1, 1, 1]} : vector<18x18x4xf32> to vector<16x16x4xf32>
    %14 = vector.shape_cast %13 : vector<16x16x4xf32> to vector<256x4xf32>
    %c0_13 = arith.constant 0 : index
    %c0_14 = arith.constant 0 : index
    %15 = vector.load %arg6[%c0_13, %c0_14] : memref<256x128xf32, #tpu.memory_space<vmem>>, vector<256x128xf32>
    %16 = arith.truncf %14 : vector<256x4xf32> to vector<256x4xbf16>
    %c1 = arith.constant 1 : index
    %c0_15 = arith.constant 0 : index
    %c0_16 = arith.constant 0 : index
    %17 = vector.load %arg2[%c1, %c0_15, %c0_16] : memref<9x4x128xbf16, #tpu.memory_space<vmem>>, vector<1x4x128xbf16>
    %18 = vector.shape_cast %17 : vector<1x4x128xbf16> to vector<4x128xbf16>
    %cst_17 = arith.constant dense<0.000000e+00> : vector<256x128xf32>
    %19 = tpu.matmul %16, %18, %cst_17 {dimension_numbers = #tpu.dot_dimension_numbers<[1], [0], [0], [1], [0, 0, 1, 1], [], []>} : vector<256x4xbf16>, vector<4x128xbf16>, vector<256x128xf32> -> vector<256x128xf32>
    %20 = arith.addf %15, %19 : vector<256x128xf32>
    %c0_18 = arith.constant 0 : index
    %c0_19 = arith.constant 0 : index
    %21 = vector.load %arg6[%c0_18, %c0_19] : memref<256x128xf32, #tpu.memory_space<vmem>>, vector<256x128xf32>
    tpu.vector_store %arg6[%c0_18, %c0_19], %20 {strides = array<i32>} : memref<256x128xf32, #tpu.memory_space<vmem>>, vector<256x128xf32>,
    %22 = vector.extract_strided_slice %1 {offsets = [0, 2, 0], sizes = [16, 16, 4], strides = [1, 1, 1]} : vector<18x18x4xf32> to vector<16x16x4xf32>
    %23 = vector.shape_cast %22 : vector<16x16x4xf32> to vector<256x4xf32>
    %c0_20 = arith.constant 0 : index
    %c0_21 = arith.constant 0 : index
    %24 = vector.load %arg6[%c0_20, %c0_21] : memref<256x128xf32, #tpu.memory_space<vmem>>, vector<256x128xf32>
    %25 = arith.truncf %23 : vector<256x4xf32> to vector<256x4xbf16>
    %c2 = arith.constant 2 : index
    %c0_22 = arith.constant 0 : index
    %c0_23 = arith.constant 0 : index
    %26 = vector.load %arg2[%c2, %c0_22, %c0_23] : memref<9x4x128xbf16, #tpu.memory_space<vmem>>, vector<1x4x128xbf16>
    %27 = vector.shape_cast %26 : vector<1x4x128xbf16> to vector<4x128xbf16>
    %cst_24 = arith.constant dense<0.000000e+00> : vector<256x128xf32>
    %28 = tpu.matmul %25, %27, %cst_24 {dimension_numbers = #tpu.dot_dimension_numbers<[1], [0], [0], [1], [0, 0, 1, 1], [], []>} : vector<256x4xbf16>, vector<4x128xbf16>, vector<256x128xf32> -> vector<256x128xf32>
    %29 = arith.addf %24, %28 : vector<256x128xf32>
    %c0_25 = arith.constant 0 : index
    %c0_26 = arith.constant 0 : index
    %30 = vector.load %arg6[%c0_25, %c0_26] : memref<256x128xf32, #tpu.memory_space<vmem>>, vector<256x128xf32>
    tpu.vector_store %arg6[%c0_25, %c0_26], %29 {strides = array<i32>} : memref<256x128xf32, #tpu.memory_space<vmem>>, vector<256x128xf32>,
    %31 = vector.extract_strided_slice %1 {offsets = [1, 0, 0], sizes = [16, 16, 4], strides = [1, 1, 1]} : vector<18x18x4xf32> to vector<16x16x4xf32>
    %32 = vector.shape_cast %31 : vector<16x16x4xf32> to vector<256x4xf32>
    %c0_27 = arith.constant 0 : index
    %c0_28 = arith.constant 0 : index
    %33 = vector.load %arg6[%c0_27, %c0_28] : memref<256x128xf32, #tpu.memory_space<vmem>>, vector<256x128xf32>
    %34 = arith.truncf %32 : vector<256x4xf32> to vector<256x4xbf16>
    %c3 = arith.constant 3 : index
    %c0_29 = arith.constant 0 : index
    %c0_30 = arith.constant 0 : index
    %35 = vector.load %arg2[%c3, %c0_29, %c0_30] : memref<9x4x128xbf16, #tpu.memory_space<vmem>>, vector<1x4x128xbf16>
    %36 = vector.shape_cast %35 : vector<1x4x128xbf16> to vector<4x128xbf16>
    %cst_31 = arith.constant dense<0.000000e+00> : vector<256x128xf32>
    %37 = tpu.matmul %34, %36, %cst_31 {dimension_numbers = #tpu.dot_dimension_numbers<[1], [0], [0], [1], [0, 0, 1, 1], [], []>} : vector<256x4xbf16>, vector<4x128xbf16>, vector<256x128xf32> -> vector<256x128xf32>
    %38 = arith.addf %33, %37 : vector<256x128xf32>
    %c0_32 = arith.constant 0 : index
    %c0_33 = arith.constant 0 : index
    %39 = vector.load %arg6[%c0_32, %c0_33] : memref<256x128xf32, #tpu.memory_space<vmem>>, vector<256x128xf32>
    tpu.vector_store %arg6[%c0_32, %c0_33], %38 {strides = array<i32>} : memref<256x128xf32, #tpu.memory_space<vmem>>, vector<256x128xf32>,
    %40 = vector.extract_strided_slice %1 {offsets = [1, 1, 0], sizes = [16, 16, 4], strides = [1, 1, 1]} : vector<18x18x4xf32> to vector<16x16x4xf32>
    %41 = vector.shape_cast %40 : vector<16x16x4xf32> to vector<256x4xf32>
    %c0_34 = arith.constant 0 : index
    %c0_35 = arith.constant 0 : index
    %42 = vector.load %arg6[%c0_34, %c0_35] : memref<256x128xf32, #tpu.memory_space<vmem>>, vector<256x128xf32>
    %43 = arith.truncf %41 : vector<256x4xf32> to vector<256x4xbf16>
    %c4 = arith.constant 4 : index
    %c0_36 = arith.constant 0 : index
    %c0_37 = arith.constant 0 : index
    %44 = vector.load %arg2[%c4, %c0_36, %c0_37] : memref<9x4x128xbf16, #tpu.memory_space<vmem>>, vector<1x4x128xbf16>
    %45 = vector.shape_cast %44 : vector<1x4x128xbf16> to vector<4x128xbf16>
    %cst_38 = arith.constant dense<0.000000e+00> : vector<256x128xf32>
    %46 = tpu.matmul %43, %45, %cst_38 {dimension_numbers = #tpu.dot_dimension_numbers<[1], [0], [0], [1], [0, 0, 1, 1], [], []>} : vector<256x4xbf16>, vector<4x128xbf16>, vector<256x128xf32> -> vector<256x128xf32>
    %47 = arith.addf %42, %46 : vector<256x128xf32>
    %c0_39 = arith.constant 0 : index
    %c0_40 = arith.constant 0 : index
    %48 = vector.load %arg6[%c0_39, %c0_40] : memref<256x128xf32, #tpu.memory_space<vmem>>, vector<256x128xf32>
    tpu.vector_store %arg6[%c0_39, %c0_40], %47 {strides = array<i32>} : memref<256x128xf32, #tpu.memory_space<vmem>>, vector<256x128xf32>,
    %49 = vector.extract_strided_slice %1 {offsets = [1, 2, 0], sizes = [16, 16, 4], strides = [1, 1, 1]} : vector<18x18x4xf32> to vector<16x16x4xf32>
    %50 = vector.shape_cast %49 : vector<16x16x4xf32> to vector<256x4xf32>
    %c0_41 = arith.constant 0 : index
    %c0_42 = arith.constant 0 : index
    %51 = vector.load %arg6[%c0_41, %c0_42] : memref<256x128xf32, #tpu.memory_space<vmem>>, vector<256x128xf32>
    %52 = arith.truncf %50 : vector<256x4xf32> to vector<256x4xbf16>
    %c5 = arith.constant 5 : index
    %c0_43 = arith.constant 0 : index
    %c0_44 = arith.constant 0 : index
    %53 = vector.load %arg2[%c5, %c0_43, %c0_44] : memref<9x4x128xbf16, #tpu.memory_space<vmem>>, vector<1x4x128xbf16>
    %54 = vector.shape_cast %53 : vector<1x4x128xbf16> to vector<4x128xbf16>
    %cst_45 = arith.constant dense<0.000000e+00> : vector<256x128xf32>
    %55 = tpu.matmul %52, %54, %cst_45 {dimension_numbers = #tpu.dot_dimension_numbers<[1], [0], [0], [1], [0, 0, 1, 1], [], []>} : vector<256x4xbf16>, vector<4x128xbf16>, vector<256x128xf32> -> vector<256x128xf32>
    %56 = arith.addf %51, %55 : vector<256x128xf32>
    %c0_46 = arith.constant 0 : index
    %c0_47 = arith.constant 0 : index
    %57 = vector.load %arg6[%c0_46, %c0_47] : memref<256x128xf32, #tpu.memory_space<vmem>>, vector<256x128xf32>
    tpu.vector_store %arg6[%c0_46, %c0_47], %56 {strides = array<i32>} : memref<256x128xf32, #tpu.memory_space<vmem>>, vector<256x128xf32>,
    %58 = vector.extract_strided_slice %1 {offsets = [2, 0, 0], sizes = [16, 16, 4], strides = [1, 1, 1]} : vector<18x18x4xf32> to vector<16x16x4xf32>
    %59 = vector.shape_cast %58 : vector<16x16x4xf32> to vector<256x4xf32>
    %c0_48 = arith.constant 0 : index
    %c0_49 = arith.constant 0 : index
    %60 = vector.load %arg6[%c0_48, %c0_49] : memref<256x128xf32, #tpu.memory_space<vmem>>, vector<256x128xf32>
    %61 = arith.truncf %59 : vector<256x4xf32> to vector<256x4xbf16>
    %c6 = arith.constant 6 : index
    %c0_50 = arith.constant 0 : index
    %c0_51 = arith.constant 0 : index
    %62 = vector.load %arg2[%c6, %c0_50, %c0_51] : memref<9x4x128xbf16, #tpu.memory_space<vmem>>, vector<1x4x128xbf16>
    %63 = vector.shape_cast %62 : vector<1x4x128xbf16> to vector<4x128xbf16>
    %cst_52 = arith.constant dense<0.000000e+00> : vector<256x128xf32>
    %64 = tpu.matmul %61, %63, %cst_52 {dimension_numbers = #tpu.dot_dimension_numbers<[1], [0], [0], [1], [0, 0, 1, 1], [], []>} : vector<256x4xbf16>, vector<4x128xbf16>, vector<256x128xf32> -> vector<256x128xf32>
    %65 = arith.addf %60, %64 : vector<256x128xf32>
    %c0_53 = arith.constant 0 : index
    %c0_54 = arith.constant 0 : index
    %66 = vector.load %arg6[%c0_53, %c0_54] : memref<256x128xf32, #tpu.memory_space<vmem>>, vector<256x128xf32>
    tpu.vector_store %arg6[%c0_53, %c0_54], %65 {strides = array<i32>} : memref<256x128xf32, #tpu.memory_space<vmem>>, vector<256x128xf32>,
    %67 = vector.extract_strided_slice %1 {offsets = [2, 1, 0], sizes = [16, 16, 4], strides = [1, 1, 1]} : vector<18x18x4xf32> to vector<16x16x4xf32>
    %68 = vector.shape_cast %67 : vector<16x16x4xf32> to vector<256x4xf32>
    %c0_55 = arith.constant 0 : index
    %c0_56 = arith.constant 0 : index
    %69 = vector.load %arg6[%c0_55, %c0_56] : memref<256x128xf32, #tpu.memory_space<vmem>>, vector<256x128xf32>
    %70 = arith.truncf %68 : vector<256x4xf32> to vector<256x4xbf16>
    %c7 = arith.constant 7 : index
    %c0_57 = arith.constant 0 : index
    %c0_58 = arith.constant 0 : index
    %71 = vector.load %arg2[%c7, %c0_57, %c0_58] : memref<9x4x128xbf16, #tpu.memory_space<vmem>>, vector<1x4x128xbf16>
    %72 = vector.shape_cast %71 : vector<1x4x128xbf16> to vector<4x128xbf16>
    %cst_59 = arith.constant dense<0.000000e+00> : vector<256x128xf32>
    %73 = tpu.matmul %70, %72, %cst_59 {dimension_numbers = #tpu.dot_dimension_numbers<[1], [0], [0], [1], [0, 0, 1, 1], [], []>} : vector<256x4xbf16>, vector<4x128xbf16>, vector<256x128xf32> -> vector<256x128xf32>
    %74 = arith.addf %69, %73 : vector<256x128xf32>
    %c0_60 = arith.constant 0 : index
    %c0_61 = arith.constant 0 : index
    %75 = vector.load %arg6[%c0_60, %c0_61] : memref<256x128xf32, #tpu.memory_space<vmem>>, vector<256x128xf32>
    tpu.vector_store %arg6[%c0_60, %c0_61], %74 {strides = array<i32>} : memref<256x128xf32, #tpu.memory_space<vmem>>, vector<256x128xf32>,
    %76 = vector.extract_strided_slice %1 {offsets = [2, 2, 0], sizes = [16, 16, 4], strides = [1, 1, 1]} : vector<18x18x4xf32> to vector<16x16x4xf32>
    %77 = vector.shape_cast %76 : vector<16x16x4xf32> to vector<256x4xf32>
    %c0_62 = arith.constant 0 : index
    %c0_63 = arith.constant 0 : index
    %78 = vector.load %arg6[%c0_62, %c0_63] : memref<256x128xf32, #tpu.memory_space<vmem>>, vector<256x128xf32>
    %79 = arith.truncf %77 : vector<256x4xf32> to vector<256x4xbf16>
    %c8 = arith.constant 8 : index
    %c0_64 = arith.constant 0 : index
    %c0_65 = arith.constant 0 : index
    %80 = vector.load %arg2[%c8, %c0_64, %c0_65] : memref<9x4x128xbf16, #tpu.memory_space<vmem>>, vector<1x4x128xbf16>
    %81 = vector.shape_cast %80 : vector<1x4x128xbf16> to vector<4x128xbf16>
    %cst_66 = arith.constant dense<0.000000e+00> : vector<256x128xf32>
    %82 = tpu.matmul %79, %81, %cst_66 {dimension_numbers = #tpu.dot_dimension_numbers<[1], [0], [0], [1], [0, 0, 1, 1], [], []>} : vector<256x4xbf16>, vector<4x128xbf16>, vector<256x128xf32> -> vector<256x128xf32>
    %83 = arith.addf %78, %82 : vector<256x128xf32>
    %c0_67 = arith.constant 0 : index
    %c0_68 = arith.constant 0 : index
    %84 = vector.load %arg6[%c0_67, %c0_68] : memref<256x128xf32, #tpu.memory_space<vmem>>, vector<256x128xf32>
    tpu.vector_store %arg6[%c0_67, %c0_68], %83 {strides = array<i32>} : memref<256x128xf32, #tpu.memory_space<vmem>>, vector<256x128xf32>,
    %c0_69 = arith.constant 0 : index
    %c0_70 = arith.constant 0 : index
    %85 = vector.load %arg6[%c0_69, %c0_70] : memref<256x128xf32, #tpu.memory_space<vmem>>, vector<256x128xf32>
    %c0_71 = arith.constant 0 : index
    %c0_72 = arith.constant 0 : index
    %86 = vector.load %arg3[%c0_71, %c0_72] : memref<1x128xf32, #tpu.memory_space<vmem>>, vector<1x128xf32>
    %87 = vector.broadcast %86 : vector<1x128xf32> to vector<256x128xf32>
    %88 = arith.addf %85, %87 : vector<256x128xf32>
    %89 = vector.shape_cast %88 : vector<256x128xf32> to vector<1x16x16x128xf32>
    %90 = arith.truncf %89 : vector<1x16x16x128xf32> to vector<1x16x16x128xbf16>
    %c0_73 = arith.constant 0 : index
    %c0_74 = arith.constant 0 : index
    %c0_75 = arith.constant 0 : index
    %c0_76 = arith.constant 0 : index
    %91 = vector.load %arg4[%c0_73, %c0_74, %c0_75, %c0_76] : memref<1x16x16x128xbf16, #tpu.memory_space<vmem>>, vector<1x16x16x128xbf16>
    tpu.vector_store %arg4[%c0_73, %c0_74, %c0_75, %c0_76], %90 {strides = array<i32>} : memref<1x16x16x128xbf16, #tpu.memory_space<vmem>>, vector<1x16x16x128xbf16>,
    %cst_77 = arith.constant dense<0.000000e+00> : vector<128xf32>
    %92 = vector.multi_reduction <add>, %88, %cst_77 [0] : vector<256x128xf32> to vector<128xf32>
    %93 = vector.shape_cast %92 : vector<128xf32> to vector<1x128xf32>
    %94 = arith.mulf %88, %88 : vector<256x128xf32>
    %cst_78 = arith.constant dense<0.000000e+00> : vector<128xf32>
    %95 = vector.multi_reduction <add>, %94, %cst_78 [0] : vector<256x128xf32> to vector<128xf32>
    %96 = vector.shape_cast %95 : vector<128xf32> to vector<1x128xf32>
    %97 = tpu.concatenate %93, %96 in 0 : vector<1x128xf32>, vector<1x128xf32> -> vector<2x128xf32>
    %98 = vector.shape_cast %97 : vector<2x128xf32> to vector<1x2x128xf32>
    %c0_79 = arith.constant 0 : index
    %c0_80 = arith.constant 0 : index
    %c0_81 = arith.constant 0 : index
    %99 = vector.load %arg5[%c0_79, %c0_80, %c0_81] : memref<1x2x128xf32, #tpu.memory_space<vmem>>, vector<1x2x128xf32>
    tpu.vector_store %arg5[%c0_79, %c0_80, %c0_81], %98 {strides = array<i32>} : memref<1x2x128xf32, #tpu.memory_space<vmem>>, vector<1x2x128xf32>,
    return
  }
  func.func @transform_0(%arg0: i32) -> (i32, i32, i32, i32) {
    %c0_i32 = arith.constant 0 : i32
    %c0_i32_0 = arith.constant 0 : i32
    %c0_i32_1 = arith.constant 0 : i32
    %c0_i32_2 = arith.constant 0 : i32
    return %arg0, %c0_i32, %c0_i32_0, %c0_i32_1 : i32, i32, i32, i32
  }
  func.func @transform_1(%arg0: i32) -> (i32, i32, i32) {
    %c0_i32 = arith.constant 0 : i32
    %c0_i32_0 = arith.constant 0 : i32
    %c0_i32_1 = arith.constant 0 : i32
    %c0_i32_2 = arith.constant 0 : i32
    return %c0_i32, %c0_i32_0, %c0_i32_1 : i32, i32, i32
  }
  func.func @transform_2(%arg0: i32) -> (i32, i32) {
    %c0_i32 = arith.constant 0 : i32
    %c0_i32_0 = arith.constant 0 : i32
    %c0_i32_1 = arith.constant 0 : i32
    return %c0_i32, %c0_i32_0 : i32, i32
  }
  func.func @transform_3(%arg0: i32) -> (i32, i32, i32, i32) {
    %c0_i32 = arith.constant 0 : i32
    %c0_i32_0 = arith.constant 0 : i32
    %c0_i32_1 = arith.constant 0 : i32
    %c0_i32_2 = arith.constant 0 : i32
    return %arg0, %c0_i32, %c0_i32_0, %c0_i32_1 : i32, i32, i32, i32
  }
  func.func @transform_4(%arg0: i32) -> (i32, i32, i32) {
    %c0_i32 = arith.constant 0 : i32
    %c0_i32_0 = arith.constant 0 : i32
    %c0_i32_1 = arith.constant 0 : i32
    return %arg0, %c0_i32, %c0_i32_0 : i32, i32, i32
  }
}

module attributes {stable_mosaic.version = 11 : i64} {
  func.func @_conv2_kernel(%arg0: i32, %arg1: memref<1x18x18x128xbf16, #tpu.memory_space<vmem>>, %arg2: memref<1x128xf32, #tpu.memory_space<vmem>>, %arg3: memref<1x128xf32, #tpu.memory_space<vmem>>, %arg4: memref<1152x128xbf16, #tpu.memory_space<vmem>>, %arg5: memref<1x128xf32, #tpu.memory_space<vmem>>, %arg6: memref<1x16x16x128xbf16, #tpu.memory_space<vmem>>, %arg7: memref<1x2x128xf32, #tpu.memory_space<vmem>>) attributes {dimension_semantics = [#tpu.dimension_semantics<parallel>], iteration_bounds = array<i64: 2>, scalar_prefetch = 0 : i64, scratch_operands = 0 : i64, tpu.core_type = #tpu.core_type<tc>, window_params = [{transform_indices = @transform_0, window_bounds = array<i64: 1, 18, 18, 128>}, {pipeline_mode = #tpu.pipeline_mode<synchronous>, transform_indices = @transform_1, window_bounds = array<i64: 1, 128>}, {pipeline_mode = #tpu.pipeline_mode<synchronous>, transform_indices = @transform_2, window_bounds = array<i64: 1, 128>}, {pipeline_mode = #tpu.pipeline_mode<synchronous>, transform_indices = @transform_3, window_bounds = array<i64: 1152, 128>}, {pipeline_mode = #tpu.pipeline_mode<synchronous>, transform_indices = @transform_4, window_bounds = array<i64: 1, 128>}, {transform_indices = @transform_5, window_bounds = array<i64: 1, 16, 16, 128>}, {transform_indices = @transform_6, window_bounds = array<i64: 1, 2, 128>}]} {
    %c0 = arith.constant 0 : index
    %c0_0 = arith.constant 0 : index
    %c0_1 = arith.constant 0 : index
    %c0_2 = arith.constant 0 : index
    %0 = vector.load %arg1[%c0, %c0_0, %c0_1, %c0_2] : memref<1x18x18x128xbf16, #tpu.memory_space<vmem>>, vector<1x18x18x128xbf16>
    %1 = vector.shape_cast %0 : vector<1x18x18x128xbf16> to vector<18x18x128xbf16>
    %2 = arith.extf %1 : vector<18x18x128xbf16> to vector<18x18x128xf32>
    %c0_3 = arith.constant 0 : index
    %c0_4 = arith.constant 0 : index
    %3 = vector.load %arg2[%c0_3, %c0_4] : memref<1x128xf32, #tpu.memory_space<vmem>>, vector<1x128xf32>
    %4 = vector.shape_cast %3 : vector<1x128xf32> to vector<1x1x128xf32>
    %5 = vector.broadcast %4 : vector<1x1x128xf32> to vector<18x18x128xf32>
    %6 = arith.mulf %2, %5 : vector<18x18x128xf32>
    %c0_5 = arith.constant 0 : index
    %c0_6 = arith.constant 0 : index
    %7 = vector.load %arg3[%c0_5, %c0_6] : memref<1x128xf32, #tpu.memory_space<vmem>>, vector<1x128xf32>
    %8 = vector.shape_cast %7 : vector<1x128xf32> to vector<1x1x128xf32>
    %9 = vector.broadcast %8 : vector<1x1x128xf32> to vector<18x18x128xf32>
    %10 = arith.addf %6, %9 : vector<18x18x128xf32>
    %cst = arith.constant 0.000000e+00 : f32
    %11 = vector.broadcast %cst : f32 to vector<18x18x128xf32>
    %12 = arith.maximumf %10, %11 : vector<18x18x128xf32>
    %13 = tpu.iota {dimensions = array<i32: 1>} : vector<18x18x128xi32>
    %c1_i32 = arith.constant 1 : i32
    %14 = vector.broadcast %c1_i32 : i32 to vector<18x18x128xi32>
    %15 = arith.cmpi sge, %13, %14 : vector<18x18x128xi32>
    %c16_i32 = arith.constant 16 : i32
    %16 = vector.broadcast %c16_i32 : i32 to vector<18x18x128xi32>
    %17 = arith.cmpi sle, %13, %16 : vector<18x18x128xi32>
    %18 = arith.andi %15, %17 : vector<18x18x128xi1>
    %cst_7 = arith.constant 0.000000e+00 : f32
    %19 = vector.broadcast %cst_7 : f32 to vector<18x18x128xf32>
    %20 = arith.select %18, %12, %19 : vector<18x18x128xi1>, vector<18x18x128xf32>
    %cst_8 = arith.constant 0.000000e+00 : f32
    %21 = vector.broadcast %cst_8 : f32 to vector<1x18x128xf32>
    %22 = vector.extract_strided_slice %20 {offsets = [1, 0, 0], sizes = [16, 18, 128], strides = [1, 1, 1]} : vector<18x18x128xf32> to vector<16x18x128xf32>
    %23 = tpu.concatenate %21, %22, %21 in 0 : vector<1x18x128xf32>, vector<16x18x128xf32>, vector<1x18x128xf32> -> vector<18x18x128xf32>
    %24 = vector.extract_strided_slice %23 {offsets = [0, 0, 0], sizes = [16, 16, 128], strides = [1, 1, 1]} : vector<18x18x128xf32> to vector<16x16x128xf32>
    %25 = vector.shape_cast %24 : vector<16x16x128xf32> to vector<256x128xf32>
    %26 = arith.truncf %25 : vector<256x128xf32> to vector<256x128xbf16>
    %27 = vector.extract_strided_slice %23 {offsets = [0, 1, 0], sizes = [16, 16, 128], strides = [1, 1, 1]} : vector<18x18x128xf32> to vector<16x16x128xf32>
    %28 = vector.shape_cast %27 : vector<16x16x128xf32> to vector<256x128xf32>
    %29 = arith.truncf %28 : vector<256x128xf32> to vector<256x128xbf16>
    %30 = vector.extract_strided_slice %23 {offsets = [0, 2, 0], sizes = [16, 16, 128], strides = [1, 1, 1]} : vector<18x18x128xf32> to vector<16x16x128xf32>
    %31 = vector.shape_cast %30 : vector<16x16x128xf32> to vector<256x128xf32>
    %32 = arith.truncf %31 : vector<256x128xf32> to vector<256x128xbf16>
    %33 = vector.extract_strided_slice %23 {offsets = [1, 0, 0], sizes = [16, 16, 128], strides = [1, 1, 1]} : vector<18x18x128xf32> to vector<16x16x128xf32>
    %34 = vector.shape_cast %33 : vector<16x16x128xf32> to vector<256x128xf32>
    %35 = arith.truncf %34 : vector<256x128xf32> to vector<256x128xbf16>
    %36 = vector.extract_strided_slice %23 {offsets = [1, 1, 0], sizes = [16, 16, 128], strides = [1, 1, 1]} : vector<18x18x128xf32> to vector<16x16x128xf32>
    %37 = vector.shape_cast %36 : vector<16x16x128xf32> to vector<256x128xf32>
    %38 = arith.truncf %37 : vector<256x128xf32> to vector<256x128xbf16>
    %39 = vector.extract_strided_slice %23 {offsets = [1, 2, 0], sizes = [16, 16, 128], strides = [1, 1, 1]} : vector<18x18x128xf32> to vector<16x16x128xf32>
    %40 = vector.shape_cast %39 : vector<16x16x128xf32> to vector<256x128xf32>
    %41 = arith.truncf %40 : vector<256x128xf32> to vector<256x128xbf16>
    %42 = vector.extract_strided_slice %23 {offsets = [2, 0, 0], sizes = [16, 16, 128], strides = [1, 1, 1]} : vector<18x18x128xf32> to vector<16x16x128xf32>
    %43 = vector.shape_cast %42 : vector<16x16x128xf32> to vector<256x128xf32>
    %44 = arith.truncf %43 : vector<256x128xf32> to vector<256x128xbf16>
    %45 = vector.extract_strided_slice %23 {offsets = [2, 1, 0], sizes = [16, 16, 128], strides = [1, 1, 1]} : vector<18x18x128xf32> to vector<16x16x128xf32>
    %46 = vector.shape_cast %45 : vector<16x16x128xf32> to vector<256x128xf32>
    %47 = arith.truncf %46 : vector<256x128xf32> to vector<256x128xbf16>
    %48 = vector.extract_strided_slice %23 {offsets = [2, 2, 0], sizes = [16, 16, 128], strides = [1, 1, 1]} : vector<18x18x128xf32> to vector<16x16x128xf32>
    %49 = vector.shape_cast %48 : vector<16x16x128xf32> to vector<256x128xf32>
    %50 = arith.truncf %49 : vector<256x128xf32> to vector<256x128xbf16>
    %51 = tpu.concatenate %26, %29, %32, %35, %38, %41, %44, %47, %50 in 1 : vector<256x128xbf16>, vector<256x128xbf16>, vector<256x128xbf16>, vector<256x128xbf16>, vector<256x128xbf16>, vector<256x128xbf16>, vector<256x128xbf16>, vector<256x128xbf16>, vector<256x128xbf16> -> vector<256x1152xbf16>
    %c0_9 = arith.constant 0 : index
    %c0_10 = arith.constant 0 : index
    %52 = vector.load %arg4[%c0_9, %c0_10] : memref<1152x128xbf16, #tpu.memory_space<vmem>>, vector<1152x128xbf16>
    %cst_11 = arith.constant dense<0.000000e+00> : vector<256x128xf32>
    %53 = tpu.matmul %51, %52, %cst_11 {dimension_numbers = #tpu.dot_dimension_numbers<[1], [0], [0], [1], [0, 0, 1, 1], [], []>} : vector<256x1152xbf16>, vector<1152x128xbf16>, vector<256x128xf32> -> vector<256x128xf32>
    %c0_12 = arith.constant 0 : index
    %c0_13 = arith.constant 0 : index
    %54 = vector.load %arg5[%c0_12, %c0_13] : memref<1x128xf32, #tpu.memory_space<vmem>>, vector<1x128xf32>
    %55 = vector.broadcast %54 : vector<1x128xf32> to vector<256x128xf32>
    %56 = arith.addf %53, %55 : vector<256x128xf32>
    %57 = vector.shape_cast %56 : vector<256x128xf32> to vector<1x16x16x128xf32>
    %58 = arith.truncf %57 : vector<1x16x16x128xf32> to vector<1x16x16x128xbf16>
    %c0_14 = arith.constant 0 : index
    %c0_15 = arith.constant 0 : index
    %c0_16 = arith.constant 0 : index
    %c0_17 = arith.constant 0 : index
    %59 = vector.load %arg6[%c0_14, %c0_15, %c0_16, %c0_17] : memref<1x16x16x128xbf16, #tpu.memory_space<vmem>>, vector<1x16x16x128xbf16>
    tpu.vector_store %arg6[%c0_14, %c0_15, %c0_16, %c0_17], %58 {strides = array<i32>} : memref<1x16x16x128xbf16, #tpu.memory_space<vmem>>, vector<1x16x16x128xbf16>,
    %cst_18 = arith.constant dense<0.000000e+00> : vector<128xf32>
    %60 = vector.multi_reduction <add>, %56, %cst_18 [0] : vector<256x128xf32> to vector<128xf32>
    %61 = vector.shape_cast %60 : vector<128xf32> to vector<1x128xf32>
    %62 = arith.mulf %56, %56 : vector<256x128xf32>
    %cst_19 = arith.constant dense<0.000000e+00> : vector<128xf32>
    %63 = vector.multi_reduction <add>, %62, %cst_19 [0] : vector<256x128xf32> to vector<128xf32>
    %64 = vector.shape_cast %63 : vector<128xf32> to vector<1x128xf32>
    %65 = tpu.concatenate %61, %64 in 0 : vector<1x128xf32>, vector<1x128xf32> -> vector<2x128xf32>
    %66 = vector.shape_cast %65 : vector<2x128xf32> to vector<1x2x128xf32>
    %c0_20 = arith.constant 0 : index
    %c0_21 = arith.constant 0 : index
    %c0_22 = arith.constant 0 : index
    %67 = vector.load %arg7[%c0_20, %c0_21, %c0_22] : memref<1x2x128xf32, #tpu.memory_space<vmem>>, vector<1x2x128xf32>
    tpu.vector_store %arg7[%c0_20, %c0_21, %c0_22], %66 {strides = array<i32>} : memref<1x2x128xf32, #tpu.memory_space<vmem>>, vector<1x2x128xf32>,
    return
  }
  func.func @transform_0(%arg0: i32) -> (i32, i32, i32, i32) {
    %c0_i32 = arith.constant 0 : i32
    %c0_i32_0 = arith.constant 0 : i32
    %c0_i32_1 = arith.constant 0 : i32
    %c0_i32_2 = arith.constant 0 : i32
    return %arg0, %c0_i32, %c0_i32_0, %c0_i32_1 : i32, i32, i32, i32
  }
  func.func @transform_1(%arg0: i32) -> (i32, i32) {
    %c0_i32 = arith.constant 0 : i32
    %c0_i32_0 = arith.constant 0 : i32
    %c0_i32_1 = arith.constant 0 : i32
    return %c0_i32, %c0_i32_0 : i32, i32
  }
  func.func @transform_2(%arg0: i32) -> (i32, i32) {
    %c0_i32 = arith.constant 0 : i32
    %c0_i32_0 = arith.constant 0 : i32
    %c0_i32_1 = arith.constant 0 : i32
    return %c0_i32, %c0_i32_0 : i32, i32
  }
  func.func @transform_3(%arg0: i32) -> (i32, i32) {
    %c0_i32 = arith.constant 0 : i32
    %c0_i32_0 = arith.constant 0 : i32
    %c0_i32_1 = arith.constant 0 : i32
    return %c0_i32, %c0_i32_0 : i32, i32
  }
  func.func @transform_4(%arg0: i32) -> (i32, i32) {
    %c0_i32 = arith.constant 0 : i32
    %c0_i32_0 = arith.constant 0 : i32
    %c0_i32_1 = arith.constant 0 : i32
    return %c0_i32, %c0_i32_0 : i32, i32
  }
  func.func @transform_5(%arg0: i32) -> (i32, i32, i32, i32) {
    %c0_i32 = arith.constant 0 : i32
    %c0_i32_0 = arith.constant 0 : i32
    %c0_i32_1 = arith.constant 0 : i32
    %c0_i32_2 = arith.constant 0 : i32
    return %arg0, %c0_i32, %c0_i32_0, %c0_i32_1 : i32, i32, i32, i32
  }
  func.func @transform_6(%arg0: i32) -> (i32, i32, i32) {
    %c0_i32 = arith.constant 0 : i32
    %c0_i32_0 = arith.constant 0 : i32
    %c0_i32_1 = arith.constant 0 : i32
    return %arg0, %c0_i32, %c0_i32_0 : i32, i32, i32
  }
}

module attributes {stable_mosaic.version = 11 : i64} {
  func.func @_bn_relu_kernel(%arg0: i32, %arg1: memref<1x16x16x128xbf16, #tpu.memory_space<vmem>>, %arg2: memref<1x128xf32, #tpu.memory_space<vmem>>, %arg3: memref<1x128xf32, #tpu.memory_space<vmem>>, %arg4: memref<1x16x16x128xf32, #tpu.memory_space<vmem>>) attributes {dimension_semantics = [#tpu.dimension_semantics<parallel>], iteration_bounds = array<i64: 2>, scalar_prefetch = 0 : i64, scratch_operands = 0 : i64, tpu.core_type = #tpu.core_type<tc>, window_params = [{transform_indices = @transform_0, window_bounds = array<i64: 1, 16, 16, 128>}, {pipeline_mode = #tpu.pipeline_mode<synchronous>, transform_indices = @transform_1, window_bounds = array<i64: 1, 128>}, {pipeline_mode = #tpu.pipeline_mode<synchronous>, transform_indices = @transform_2, window_bounds = array<i64: 1, 128>}, {transform_indices = @transform_3, window_bounds = array<i64: 1, 16, 16, 128>}]} {
    %c0 = arith.constant 0 : index
    %c0_0 = arith.constant 0 : index
    %c0_1 = arith.constant 0 : index
    %c0_2 = arith.constant 0 : index
    %0 = vector.load %arg1[%c0, %c0_0, %c0_1, %c0_2] : memref<1x16x16x128xbf16, #tpu.memory_space<vmem>>, vector<1x16x16x128xbf16>
    %1 = arith.extf %0 : vector<1x16x16x128xbf16> to vector<1x16x16x128xf32>
    %c0_3 = arith.constant 0 : index
    %c0_4 = arith.constant 0 : index
    %2 = vector.load %arg2[%c0_3, %c0_4] : memref<1x128xf32, #tpu.memory_space<vmem>>, vector<1x128xf32>
    %3 = vector.shape_cast %2 : vector<1x128xf32> to vector<1x1x1x128xf32>
    %4 = vector.broadcast %3 : vector<1x1x1x128xf32> to vector<1x16x16x128xf32>
    %5 = arith.mulf %1, %4 : vector<1x16x16x128xf32>
    %c0_5 = arith.constant 0 : index
    %c0_6 = arith.constant 0 : index
    %6 = vector.load %arg3[%c0_5, %c0_6] : memref<1x128xf32, #tpu.memory_space<vmem>>, vector<1x128xf32>
    %7 = vector.shape_cast %6 : vector<1x128xf32> to vector<1x1x1x128xf32>
    %8 = vector.broadcast %7 : vector<1x1x1x128xf32> to vector<1x16x16x128xf32>
    %9 = arith.addf %5, %8 : vector<1x16x16x128xf32>
    %cst = arith.constant 0.000000e+00 : f32
    %10 = vector.broadcast %cst : f32 to vector<1x16x16x128xf32>
    %11 = arith.maximumf %9, %10 : vector<1x16x16x128xf32>
    %c0_7 = arith.constant 0 : index
    %c0_8 = arith.constant 0 : index
    %c0_9 = arith.constant 0 : index
    %c0_10 = arith.constant 0 : index
    %12 = vector.load %arg4[%c0_7, %c0_8, %c0_9, %c0_10] : memref<1x16x16x128xf32, #tpu.memory_space<vmem>>, vector<1x16x16x128xf32>
    tpu.vector_store %arg4[%c0_7, %c0_8, %c0_9, %c0_10], %11 {strides = array<i32>} : memref<1x16x16x128xf32, #tpu.memory_space<vmem>>, vector<1x16x16x128xf32>,
    return
  }
  func.func @transform_0(%arg0: i32) -> (i32, i32, i32, i32) {
    %c0_i32 = arith.constant 0 : i32
    %c0_i32_0 = arith.constant 0 : i32
    %c0_i32_1 = arith.constant 0 : i32
    %c0_i32_2 = arith.constant 0 : i32
    return %arg0, %c0_i32, %c0_i32_0, %c0_i32_1 : i32, i32, i32, i32
  }
  func.func @transform_1(%arg0: i32) -> (i32, i32) {
    %c0_i32 = arith.constant 0 : i32
    %c0_i32_0 = arith.constant 0 : i32
    %c0_i32_1 = arith.constant 0 : i32
    return %c0_i32, %c0_i32_0 : i32, i32
  }
  func.func @transform_2(%arg0: i32) -> (i32, i32) {
    %c0_i32 = arith.constant 0 : i32
    %c0_i32_0 = arith.constant 0 : i32
    %c0_i32_1 = arith.constant 0 : i32
    return %c0_i32, %c0_i32_0 : i32, i32
  }
  func.func @transform_3(%arg0: i32) -> (i32, i32, i32, i32) {
    %c0_i32 = arith.constant 0 : i32
    %c0_i32_0 = arith.constant 0 : i32
    %c0_i32_1 = arith.constant 0 : i32
    %c0_i32_2 = arith.constant 0 : i32
    return %arg0, %c0_i32, %c0_i32_0, %c0_i32_1 : i32, i32, i32, i32
  }
}

</mosaic_0001>

<bundles_post_ra>
// kernel: double_conv_forward.5
= control target key start
LH: loop header
LB: loop body
LE: loop exit
PB: predicated region body
PF: predicated region fallthrough
CT: control target
= control target key end

     0   :  { %s556_s12 = smov 0   ;;  %s703_s0 = inlined_call_operand.vmem [shape: bf16[2,16,16,128], index: 0, kind: input, shape index: {}]   ;;  %s704_s1 = inlined_call_operand.vmem [shape: f32[1,128], index: 1, kind: input, shape index: {}]   ;;  %s705_s2 = inlined_call_operand.vmem [shape: f32[1,128], index: 2, kind: input, shape index: {}]   ;;  %s706_s3 = inlined_call_operand.vmem [shape: f32[2,16,16,128], index: 3, kind: output, shape index: {}]  }
   0x1 LB: > { %s426_s13 = sadd.s32 4294967295, %s534_s12   ;;  %p430_p0 = scmp.ge.s32.totalorder %s534_s12, 1  ;;  %s534_s12 = sphi %s556_s12, %s13_s12  }
   0x2   : > { %p137_p1 = scmp.lt.s32.totalorder %s534_s12, 3 }
   0x4   : > { %p138_p2 = pnand %p430_p0, %p137_p1 }
   0x5   : > { %p161_p3 = scmp.lt.s32.totalorder (!%p138_p2), %s426_s13, 1 }
   0x6   : > { %141 = sbr.rel (%p138_p2) target bundleno = 55 (0x37), region = 32 }
   0xb   : > { %s708_s13 = smov (!%p161_p3, %s426_s13), 1  ;;  %v575_v0 = vld [vmem:[%s704_s1] ss:$0 sm:$0xff] }
   0xc   : > { %s437_s14 = sshll.u32 %s708_s13, 7  ;;  %v583_v5 = vld [vmem:[%s705_s2] ss:$0 sm:$0xff]  ;;  %s438_s22 = sshll.u32 %s708_s13, 8 }
   0xd   : > { %s570_s17 = scalar_lea.vmem %s703_s0, %s437_s14  ;;  %s602_s25 = scalar_lea.vmem %s706_s3, %s438_s22 }
   0xe   : > { %v440_v1 = vld [vmem:[%s570_s17] sm:$0xff]   ;;  %v503_v2 = vld [vmem:[%s570_s17 + $0x8] sm:$0xff]   ;;  %v504_v3 = vld [vmem:[%s570_s17 + $0x10] sm:$0xff]  }
   0xf   : > { %v441_v4 = vunpack.c.l.bf16 %v440_v1  ;;  %v442_v6 = vunpack.c.h.bf16 %v440_v1  ;;  %v445_v7 = vunpack.c.l.bf16 %v503_v2  ;;  %v446_v8 = vunpack.c.h.bf16 %v503_v2  ;;  %v505_v9 = vld [vmem:[%s570_s17 + $0x18] sm:$0xff]   ;;  %v506_v30 = vld [vmem:[%s570_s17 + $0x20] sm:$0xff]   ;;  %v507_v31 = vld [vmem:[%s570_s17 + $0x28] sm:$0xff]  }
  0x10   : > { %v449_v10 = vunpack.c.l.bf16 %v504_v3  ;;  %v450_v11 = vunpack.c.h.bf16 %v504_v3  ;;  %v453_v12 = vunpack.c.l.bf16 %v505_v9  ;;  %v454_v13 = vunpack.c.h.bf16 %v505_v9  ;;  %v508_v36 = vld [vmem:[%s570_s17 + $0x30] sm:$0xff]   ;;  %v509_v37 = vld [vmem:[%s570_s17 + $0x38] sm:$0xff]   ;;  %v510_v3 = vld [vmem:[%s570_s17 + $0x40] sm:$0xff]  }
  0x11   : > { %v239_v14 = vmul.f32 %v575_v0, %v441_v4  ;;  %v240_v15 = vmul.f32 %v575_v0, %v442_v6  ;;  %v241_v16 = vmul.f32 %v575_v0, %v445_v7  ;;  %v242_v17 = vmul.f32 %v575_v0, %v446_v8  ;;  %v511_v4 = vld [vmem:[%s570_s17 + $0x48] sm:$0xff]   ;;  %v512_v6 = vld [vmem:[%s570_s17 + $0x50] sm:$0xff]  }
  0x12   : > { %v243_v18 = vmul.f32 %v575_v0, %v449_v10  ;;  %v244_v19 = vmul.f32 %v575_v0, %v450_v11  ;;  %v245_v20 = vmul.f32 %v575_v0, %v453_v12  ;;  %v246_v21 = vmul.f32 %v575_v0, %v454_v13  ;;  %v513_v11 = vld [vmem:[%s570_s17 + $0x58] sm:$0xff]  }
  0x13   : > { %v275_v22 = vadd.f32 %v583_v5, %v239_v14  ;;  %v276_v23 = vadd.f32 %v583_v5, %v240_v15  ;;  %v277_v24 = vadd.f32 %v583_v5, %v241_v16  ;;  %v278_v25 = vadd.f32 %v583_v5, %v242_v17 }
  0x14   : > { %v279_v26 = vadd.f32 %v583_v5, %v243_v18  ;;  %v280_v27 = vadd.f32 %v583_v5, %v244_v19  ;;  %v281_v28 = vadd.f32 %v583_v5, %v245_v20  ;;  %v282_v29 = vadd.f32 %v583_v5, %v246_v21 }
  0x15   : > { %v307_v32 = vmax.f32 %v275_v22, 0.0  ;;  %v308_v33 = vmax.f32 %v276_v23, 0.0  ;;  %v309_v34 = vmax.f32 %v277_v24, 0.0  ;;  %v310_v35 = vmax.f32 %v278_v25, 0.0 }
  0x16   : > { %v311_v38 = vmax.f32 %v279_v26, 0.0  ;;  %v312_v39 = vmax.f32 %v280_v27, 0.0  ;;  %v313_v40 = vmax.f32 %v281_v28, 0.0  ;;  %v314_v41 = vmax.f32 %v282_v29, 0.0 }
  0x17   : > { %339 = vst [vmem:[%s602_s25] sm:$0xff] %v307_v32  ;;  %v457_v42 = vunpack.c.l.bf16 %v506_v30  ;;  %v458_v43 = vunpack.c.h.bf16 %v506_v30  ;;  %v461_v44 = vunpack.c.l.bf16 %v507_v31  ;;  %v462_v45 = vunpack.c.h.bf16 %v507_v31 }
  0x18   : > { %340 = vst [vmem:[%s602_s25 + $0x8] sm:$0xff] %v308_v33  ;;  %v465_v46 = vunpack.c.l.bf16 %v508_v36  ;;  %v466_v47 = vunpack.c.h.bf16 %v508_v36  ;;  %v469_v48 = vunpack.c.l.bf16 %v509_v37  ;;  %v470_v49 = vunpack.c.h.bf16 %v509_v37 }
  0x19   : > { %341 = vst [vmem:[%s602_s25 + $0x10] sm:$0xff] %v309_v34  ;;  %v247_v50 = vmul.f32 %v575_v0, %v457_v42  ;;  %v248_v51 = vmul.f32 %v575_v0, %v458_v43  ;;  %v249_v52 = vmul.f32 %v575_v0, %v461_v44  ;;  %v250_v53 = vmul.f32 %v575_v0, %v462_v45  ;;  %v516_v42 = vld [vmem:[%s570_s17 + $0x70] sm:$0xff]  }
  0x1a   : > { %342 = vst [vmem:[%s602_s25 + $0x18] sm:$0xff] %v310_v35  ;;  %v251_v54 = vmul.f32 %v575_v0, %v465_v46  ;;  %v252_v55 = vmul.f32 %v575_v0, %v466_v47  ;;  %v253_v56 = vmul.f32 %v575_v0, %v469_v48  ;;  %v254_v57 = vmul.f32 %v575_v0, %v470_v49  ;;  %v517_v47 = vld [vmem:[%s570_s17 + $0x78] sm:$0xff]  }
  0x1b   : > { %343 = vst [vmem:[%s602_s25 + $0x20] sm:$0xff] %v311_v38  ;;  %v283_v58 = vadd.f32 %v583_v5, %v247_v50  ;;  %v284_v59 = vadd.f32 %v583_v5, %v248_v51  ;;  %v285_v60 = vadd.f32 %v583_v5, %v249_v52  ;;  %v286_v61 = vadd.f32 %v583_v5, %v250_v53 }
  0x1c   : > { %344 = vst [vmem:[%s602_s25 + $0x28] sm:$0xff] %v312_v39  ;;  %v287_v62 = vadd.f32 %v583_v5, %v251_v54  ;;  %v288_v63 = vadd.f32 %v583_v5, %v252_v55  ;;  %v289_v1 = vadd.f32 %v583_v5, %v253_v56  ;;  %v290_v2 = vadd.f32 %v583_v5, %v254_v57 }
  0x1d   : > { %345 = vst [vmem:[%s602_s25 + $0x30] sm:$0xff] %v313_v40  ;;  %v315_v7 = vmax.f32 %v283_v58, 0.0  ;;  %v316_v8 = vmax.f32 %v284_v59, 0.0  ;;  %v317_v9 = vmax.f32 %v285_v60, 0.0  ;;  %v318_v10 = vmax.f32 %v286_v61, 0.0  ;;  %v514_v40 = vld [vmem:[%s570_s17 + $0x60] sm:$0xff]  }
  0x1e   : > { %346 = vst [vmem:[%s602_s25 + $0x38] sm:$0xff] %v314_v41  ;;  %v319_v12 = vmax.f32 %v287_v62, 0.0  ;;  %v320_v13 = vmax.f32 %v288_v63, 0.0  ;;  %v321_v14 = vmax.f32 %v289_v1, 0.0  ;;  %v322_v15 = vmax.f32 %v290_v2, 0.0  ;;  %v515_v41 = vld [vmem:[%s570_s17 + $0x68] sm:$0xff]  }
  0x1f   : > { %347 = vst [vmem:[%s602_s25 + $0x40] sm:$0xff] %v315_v7  ;;  %v473_v16 = vunpack.c.l.bf16 %v510_v3  ;;  %v474_v17 = vunpack.c.h.bf16 %v510_v3  ;;  %v477_v18 = vunpack.c.l.bf16 %v511_v4  ;;  %v478_v19 = vunpack.c.h.bf16 %v511_v4 }
  0x20   : > { %348 = vst [vmem:[%s602_s25 + $0x48] sm:$0xff] %v316_v8  ;;  %v481_v20 = vunpack.c.l.bf16 %v512_v6  ;;  %v482_v21 = vunpack.c.h.bf16 %v512_v6  ;;  %v485_v22 = vunpack.c.l.bf16 %v513_v11  ;;  %v486_v23 = vunpack.c.h.bf16 %v513_v11 }
  0x21   : > { %349 = vst [vmem:[%s602_s25 + $0x50] sm:$0xff] %v317_v9  ;;  %v255_v24 = vmul.f32 %v575_v0, %v473_v16  ;;  %v256_v25 = vmul.f32 %v575_v0, %v474_v17  ;;  %v257_v26 = vmul.f32 %v575_v0, %v477_v18  ;;  %v258_v27 = vmul.f32 %v575_v0, %v478_v19 }
  0x22   : > { %350 = vst [vmem:[%s602_s25 + $0x58] sm:$0xff] %v318_v10  ;;  %v259_v28 = vmul.f32 %v575_v0, %v481_v20  ;;  %v260_v29 = vmul.f32 %v575_v0, %v482_v21  ;;  %v261_v30 = vmul.f32 %v575_v0, %v485_v22  ;;  %v262_v31 = vmul.f32 %v575_v0, %v486_v23 }
  0x23   : > { %351 = vst [vmem:[%s602_s25 + $0x60] sm:$0xff] %v319_v12  ;;  %v291_v32 = vadd.f32 %v583_v5, %v255_v24  ;;  %v292_v33 = vadd.f32 %v583_v5, %v256_v25  ;;  %v293_v34 = vadd.f32 %v583_v5, %v257_v26  ;;  %v294_v35 = vadd.f32 %v583_v5, %v258_v27 }
  0x24   : > { %352 = vst [vmem:[%s602_s25 + $0x68] sm:$0xff] %v320_v13  ;;  %v295_v36 = vadd.f32 %v583_v5, %v259_v28  ;;  %v296_v37 = vadd.f32 %v583_v5, %v260_v29  ;;  %v297_v38 = vadd.f32 %v583_v5, %v261_v30  ;;  %v298_v39 = vadd.f32 %v583_v5, %v262_v31 }
  0x25   : > { %353 = vst [vmem:[%s602_s25 + $0x70] sm:$0xff] %v321_v14  ;;  %v323_v43 = vmax.f32 %v291_v32, 0.0  ;;  %v324_v44 = vmax.f32 %v292_v33, 0.0  ;;  %v325_v45 = vmax.f32 %v293_v34, 0.0  ;;  %v326_v46 = vmax.f32 %v294_v35, 0.0 }
  0x26   : > { %354 = vst [vmem:[%s602_s25 + $0x78] sm:$0xff] %v322_v15  ;;  %v327_v48 = vmax.f32 %v295_v36, 0.0  ;;  %v328_v49 = vmax.f32 %v296_v37, 0.0  ;;  %v329_v50 = vmax.f32 %v297_v38, 0.0  ;;  %v330_v51 = vmax.f32 %v298_v39, 0.0 }
  0x27   : > { %355 = vst [vmem:[%s602_s25 + $0x80] sm:$0xff] %v323_v43  ;;  %v489_v52 = vunpack.c.l.bf16 %v514_v40  ;;  %v490_v53 = vunpack.c.h.bf16 %v514_v40  ;;  %v493_v54 = vunpack.c.l.bf16 %v515_v41  ;;  %v494_v55 = vunpack.c.h.bf16 %v515_v41 }
  0x28   : > { %356 = vst [vmem:[%s602_s25 + $0x88] sm:$0xff] %v324_v44  ;;  %v497_v56 = vunpack.c.l.bf16 %v516_v42  ;;  %v498_v57 = vunpack.c.h.bf16 %v516_v42  ;;  %v501_v58 = vunpack.c.l.bf16 %v517_v47  ;;  %v502_v59 = vunpack.c.h.bf16 %v517_v47 }
  0x29   : > { %357 = vst [vmem:[%s602_s25 + $0x90] sm:$0xff] %v325_v45  ;;  %v263_v60 = vmul.f32 %v575_v0, %v489_v52  ;;  %v264_v61 = vmul.f32 %v575_v0, %v490_v53  ;;  %v265_v62 = vmul.f32 %v575_v0, %v493_v54  ;;  %v266_v63 = vmul.f32 %v575_v0, %v494_v55 }
  0x2a   : > { %358 = vst [vmem:[%s602_s25 + $0x98] sm:$0xff] %v326_v46  ;;  %v267_v1 = vmul.f32 %v575_v0, %v497_v56  ;;  %v268_v2 = vmul.f32 %v575_v0, %v498_v57  ;;  %v269_v3 = vmul.f32 %v575_v0, %v501_v58  ;;  %v270_v4 = vmul.f32 %v575_v0, %v502_v59 }
  0x2b   : > { %359 = vst [vmem:[%s602_s25 + $0xa0] sm:$0xff] %v327_v48  ;;  %v299_v6 = vadd.f32 %v583_v5, %v263_v60  ;;  %v300_v7 = vadd.f32 %v583_v5, %v264_v61  ;;  %v301_v8 = vadd.f32 %v583_v5, %v265_v62  ;;  %v302_v9 = vadd.f32 %v583_v5, %v266_v63 }
  0x2c   : > { %360 = vst [vmem:[%s602_s25 + $0xa8] sm:$0xff] %v328_v49  ;;  %v303_v10 = vadd.f32 %v583_v5, %v267_v1  ;;  %v304_v11 = vadd.f32 %v583_v5, %v268_v2  ;;  %v305_v14 = vadd.f32 %v583_v5, %v269_v3  ;;  %v306_v16 = vadd.f32 %v583_v5, %v270_v4 }
  0x2d   : > { %361 = vst [vmem:[%s602_s25 + $0xb0] sm:$0xff] %v329_v50  ;;  %v331_v0 = vmax.f32 %v299_v6, 0.0  ;;  %v332_v12 = vmax.f32 %v300_v7, 0.0  ;;  %v333_v13 = vmax.f32 %v301_v8, 0.0  ;;  %v334_v15 = vmax.f32 %v302_v9, 0.0 }
  0x2e   : > { %362 = vst [vmem:[%s602_s25 + $0xb8] sm:$0xff] %v330_v51  ;;  %v335_v17 = vmax.f32 %v303_v10, 0.0  ;;  %v336_v18 = vmax.f32 %v304_v11, 0.0  ;;  %v337_v19 = vmax.f32 %v305_v14, 0.0  ;;  %v338_v20 = vmax.f32 %v306_v16, 0.0 }
  0x2f   : > { %363 = vst [vmem:[%s602_s25 + $0xc0] sm:$0xff] %v331_v0 }
  0x30   : > { %364 = vst [vmem:[%s602_s25 + $0xc8] sm:$0xff] %v332_v12 }
  0x31   : > { %365 = vst [vmem:[%s602_s25 + $0xd0] sm:$0xff] %v333_v13 }
  0x32   : > { %366 = vst [vmem:[%s602_s25 + $0xd8] sm:$0xff] %v334_v15 }
  0x33   : > { %367 = vst [vmem:[%s602_s25 + $0xe0] sm:$0xff] %v335_v17 }
  0x34   : > { %368 = vst [vmem:[%s602_s25 + $0xe8] sm:$0xff] %v336_v18 }
  0x35   : > { %369 = vst [vmem:[%s602_s25 + $0xf0] sm:$0xff] %v337_v19 }
  0x36   : > { %370 = vst [vmem:[%s602_s25 + $0xf8] sm:$0xff] %v338_v20 }
  0x37 PF: > { %s13_s12 = sadd.s32 1, %s534_s12  }
  0x38   : > { %p10_p4 = scmp.ge.s32.totalorder %s13_s12, 4  }
  0x3a   :  { %12 = sbr.rel (!%p10_p4) target bundleno = 1 (0x1), region = 62 }

// kernel: double_conv_forward.4
= control target key start
LH: loop header
LB: loop body
LE: loop exit
PB: predicated region body
PF: predicated region fallthrough
CT: control target
= control target key end

     0   :  { %s3484_s21 = smov 0   ;;  %s4735_s0 = inlined_call_operand.vmem [shape: bf16[2,18,18,128], index: 0, kind: input, shape index: {}]   ;;  %s4736_s1 = inlined_call_operand.vmem [shape: f32[1,128], index: 1, kind: input, shape index: {}]   ;;  %s4737_s2 = inlined_call_operand.vmem [shape: f32[1,128], index: 2, kind: input, shape index: {}]   ;;  %s4738_s3 = inlined_call_operand.vmem [shape: bf16[1152,128], index: 3, kind: input, shape index: {}]   ;;  %s4739_s4 = inlined_call_operand.vmem [shape: f32[1,128], index: 4, kind: input, shape index: {}]   ;;  %s4740_s5 = inlined_call_operand.vmem [shape: bf16[2,16,16,128], index: 5, kind: output, shape index: {0}]   ;;  %s4741_s6 = inlined_call_operand.vmem [shape: f32[2,2,128], index: 6, kind: output, shape index: {1}]  }
   0x1 LB: > { %s2892_s22 = sadd.s32 4294967295, %s3445_s21   ;;  %p2896_p0 = scmp.ge.s32.totalorder %s3445_s21, 1  ;;  %s3445_s21 = sphi %s3484_s21, %s17_s21  }
   0x2   : > { %p215_p1 = scmp.lt.s32.totalorder %s3445_s21, 3 }
   0x4   : > { %p216_p2 = pnand %p2896_p0, %p215_p1 }
   0x6   : > { %219 = sbr.rel (%p216_p2) target bundleno = 767 (0x2ff), region = 40 }
   0xb   : > { %v3199_v0 = vld [vmem:[%s4738_s3 + $0x38] sm:$0xff]  ;;  %p249_p3 = scmp.lt.s32.totalorder %s2892_s22, 1  ;;  %v3198_v1 = vld [vmem:[%s4738_s3 + $0x30] sm:$0xff]  ;;  %v3197_v2 = vld [vmem:[%s4738_s3 + $0x28] sm:$0xff]  ;;  %v511_v4 = vlaneseq  ;;  %v3447_v57 = vmov 0.0|0.0   ;;  %vm649_vm2 = vcmask 1046528  }
   0xc   : > { %3399 = vmatpush.bf16.msra.mxu1 %v3199_v0  ;;  %3400 = vmatpush.bf16.msra.mxu2 %v3199_v0  ;;  %v3512_v3 = vld [vmem:[%s4736_s1] ss:$0 sm:$0xff]  ;;  %v3195_v31 = vld [vmem:[%s4738_s3 + $0x18] sm:$0xff]  ;;  %v3194_v43 = vld [vmem:[%s4738_s3 + $0x10] sm:$0xff]  ;;  %v983_v58 = vunpack.c.l.b16 %v3447_v57  ;;  %vm789_vm3 = vcmask 1045504   ;;  %vm2803_vm4 = vcmask 1040384  }
   0xd   : > { %s4889_s22 = smov (!%p249_p3, %s2892_s22), 1  ;;  %3401 = vmatpush.bf16.msra.mxu3 %v3199_v0  ;;  %1832 = vmatpush.bf16.msra.mxu0 %v3199_v0  ;;  %v3520_v10 = vld [vmem:[%s4737_s2] ss:$0 sm:$0xff]  ;;  %v3528_v19 = vshrl.u32 %v511_v4, 7  ;;  %v3193_v55 = vld [vmem:[%s4738_s3 + $0x8] sm:$0xff] }
   0xe   : > { %s3423_s27 = smul.u32 216, %s4889_s22  ;;  %v3196_v16 = vld [vmem:[%s4738_s3 + $0x20] sm:$0xff]  ;;  %s2900_s13 = sshll.u32 %s4889_s22, 1 }
   0xf   : > { %4785 = vst [vmem:[#allocation2_spill] sm:$0xff] %v3528_v19  ;;  %vm515_vm0 = vcmp.ge.s32.totalorder %v3528_v19, 1  ;;  %s262_s16 = scalar_lea.vmem %s4741_s6, %s2900_s13 }
  0x10   : > { %3402 = vmatpush.bf16.msra.mxu1 %v3198_v1  ;;  %3403 = vmatpush.bf16.msra.mxu2 %v3198_v1  ;;  %s3507_s8 = scalar_lea.vmem %s4735_s0, %s3423_s27 }
  0x11   : > { %3404 = vmatpush.bf16.msra.mxu3 %v3198_v1  ;;  %1833 = vmatpush.bf16.msra.mxu0 %v3198_v1  ;;  %v3377_v5 = vld [vmem:[%s3507_s8 + $0x30] sm:$0xff]   ;;  %v3379_v6 = vld [vmem:[%s3507_s8 + $0x60] sm:$0xff]  }
  0x12   : > { %v3381_v7 = vld [vmem:[%s3507_s8 + $0x90] sm:$0xff]   ;;  %v3270_v8 = vunpack.c.l.bf16 %v3377_v5  ;;  %v3271_v9 = vunpack.c.h.bf16 %v3377_v5  ;;  %v3278_v11 = vunpack.c.l.bf16 %v3379_v6  ;;  %v3279_v12 = vunpack.c.h.bf16 %v3379_v6  ;;  %v275_v13 = vld [vmem:[%s3507_s8 + $0x3c] sm:$0xff]  }
  0x13   : > { %v3286_v14 = vunpack.c.l.bf16 %v3381_v7  ;;  %v3287_v15 = vunpack.c.h.bf16 %v3381_v7  ;;  %v323_v24 = vunpack.c.l.bf16 %v275_v13  ;;  %v324_v34 = vunpack.c.h.bf16 %v275_v13  ;;  %v287_v38 = vld [vmem:[%s3507_s8 + $0x6c] sm:$0xff]   ;;  %v299_v54 = vld [vmem:[%s3507_s8 + $0x9c] sm:$0xff]  }
  0x14   : > { %3405 = vmatpush.bf16.msra.mxu1 %v3197_v2  ;;  %3406 = vmatpush.bf16.msra.mxu2 %v3197_v2  ;;  %v372_v17 = vmul.f32 %v3512_v3, %v3270_v8  ;;  %v373_v18 = vmul.f32 %v3512_v3, %v3271_v9  ;;  %v384_v20 = vmul.f32 %v3512_v3, %v3278_v11  ;;  %v335_v45 = vunpack.c.l.bf16 %v287_v38  ;;  %v263_v60 = vld [vmem:[%s3507_s8 + $0xc] sm:$0xff]   ;;  %v3192_v11 = vld [vmem:[%s4738_s3] sm:$0xff] }
  0x15   : > { %3407 = vmatpush.bf16.msra.mxu3 %v3197_v2  ;;  %1834 = vmatpush.bf16.msra.mxu0 %v3197_v2  ;;  %v385_v21 = vmul.f32 %v3512_v3, %v3279_v12  ;;  %v396_v22 = vmul.f32 %v3512_v3, %v3286_v14  ;;  %v397_v23 = vmul.f32 %v3512_v3, %v3287_v15  ;;  %v336_v49 = vunpack.c.h.bf16 %v287_v38 }
  0x16   : > { %v424_v25 = vadd.f32 %v3520_v10, %v372_v17  ;;  %v425_v26 = vadd.f32 %v3520_v10, %v373_v18  ;;  %v436_v27 = vadd.f32 %v3520_v10, %v384_v20  ;;  %v375_v37 = vmul.f32 %v3512_v3, %v323_v24  ;;  %v3215_v18 = vld [vmem:[%s4738_s3 + $0xb8] sm:$0xff] }
  0x17   : > { %v437_v28 = vadd.f32 %v3520_v10, %v385_v21  ;;  %v448_v29 = vadd.f32 %v3520_v10, %v396_v22  ;;  %v449_v30 = vadd.f32 %v3520_v10, %v397_v23  ;;  %v376_v44 = vmul.f32 %v3512_v3, %v324_v34  ;;  %v3223_v21 = vld [vmem:[%s4738_s3 + $0xf8] sm:$0xff] }
  0x18   : > { %3408 = vmatpush.bf16.msra.mxu1 %v3196_v16  ;;  %3409 = vmatpush.bf16.msra.mxu2 %v3196_v16  ;;  %v472_v32 = vmax.f32 %v424_v25, 0.0  ;;  %v484_v33 = vmax.f32 %v436_v27, 0.0  ;;  %v3544_v35 = vmax.f32 %v425_v26, 0.0  ;;  %v427_v48 = vadd.f32 %v3520_v10, %v375_v37  ;;  %v3207_v34 = vld [vmem:[%s4738_s3 + $0x78] sm:$0xff] }
  0x19   : > { %3410 = vmatpush.bf16.msra.mxu3 %v3196_v16  ;;  %1835 = vmatpush.bf16.msra.mxu0 %v3196_v16  ;;  %v496_v36 = vmax.f32 %v448_v29, 0.0  ;;  %v3552_v40 = vmax.f32 %v437_v28, 0.0  ;;  %v3558_v42 = vmax.f32 %v449_v30, 0.0  ;;  %v428_v59 = vadd.f32 %v3520_v10, %v376_v44  ;;  %v3378_v29 = vld [vmem:[%s3507_s8 + $0x48] sm:$0xff]   ;;  %v3214_v44 = vld [vmem:[%s4738_s3 + $0xb0] sm:$0xff] }
  0x1a   : > { %v3550_v39 = vsel %vm515_vm0, %v472_v32, 0.0  ;;  %v3556_v41 = vsel %vm515_vm0, %v484_v33, 0.0  ;;  %v580_v46 = vpack.c.bf16 %v3544_v35, %v3544_v35  ;;  %v475_v62 = vmax.f32 %v427_v48, 0.0 }
  0x1b   : > { %v3568_v47 = vsel %vm515_vm0, %v496_v36, 0.0  ;;  %v579_v50 = vpack.c.bf16 %v3550_v39, %v3550_v39  ;;  %v587_v51 = vpack.c.bf16 %v3556_v41, %v3556_v41  ;;  %v588_v52 = vpack.c.bf16 %v3552_v40, %v3552_v40  ;;  %v3231_v36 = vld [vmem:[%s4738_s3 + $0x138] sm:$0xff] }
  0x1c   : > { %3411 = vmatpush.bf16.msra.mxu1 %v3195_v31  ;;  %3412 = vmatpush.bf16.msra.mxu2 %v3195_v31  ;;  %v596_v53 = vpack.c.bf16 %v3558_v42, %v3558_v42  ;;  %v595_v56 = vpack.c.bf16 %v3568_v47, %v3568_v47  ;;  %v991_v61 = vunpack.c.l.b16 %v580_v46  ;;  %v387_v63 = vmul.f32 %v3512_v3, %v335_v45  ;;  %v3222_v45 = vld [vmem:[%s4738_s3 + $0xf0] sm:$0xff] }
  0x1d   : > { %3413 = vmatpush.bf16.msra.mxu3 %v3195_v31  ;;  %1836 = vmatpush.bf16.msra.mxu0 %v3195_v31  ;;  %v388_v0 = vmul.f32 %v3512_v3, %v336_v49  ;;  %v990_v1 = vunpack.c.l.b16 %v579_v50  ;;  %v998_v2 = vunpack.c.l.b16 %v587_v51  ;;  %v347_v4 = vunpack.c.l.bf16 %v299_v54 }
  0x1e   : > { %v348_v5 = vunpack.c.h.bf16 %v299_v54  ;;  %v999_v6 = vunpack.c.l.b16 %v588_v52  ;;  %v1007_v7 = vunpack.c.l.b16 %v596_v53  ;;  %v439_v8 = vadd.f32 %v3520_v10, %v387_v63  ;;  %v3380_v54 = vld [vmem:[%s3507_s8 + $0x78] sm:$0xff]   ;;  %v3213_v63 = vld [vmem:[%s4738_s3 + $0xa8] sm:$0xff] }
  0x1f   : > { %v311_v9 = vunpack.c.l.bf16 %v263_v60  ;;  %v1006_v12 = vunpack.c.l.b16 %v595_v56  ;;  %v399_v13 = vmul.f32 %v3512_v3, %v347_v4  ;;  %v312_v15 = vunpack.c.h.bf16 %v263_v60 }
  0x20   : > { %3414 = vmatpush.bf16.msra.mxu1 %v3194_v43  ;;  %3415 = vmatpush.bf16.msra.mxu2 %v3194_v43  ;;  %v400_v14 = vmul.f32 %v3512_v3, %v348_v5  ;;  %v440_v16 = vadd.f32 %v3520_v10, %v388_v0  ;;  %v3600_v20 = vpack.c.b16 %v983_v58, %v983_v58  ;;  %v487_v22 = vmax.f32 %v439_v8, 0.0  ;;  %v3221_v0 = vld [vmem:[%s4738_s3 + $0xe8] sm:$0xff] }
  0x21   : > { %3416 = vmatpush.bf16.msra.mxu3 %v3194_v43  ;;  %1837 = vmatpush.bf16.msra.mxu0 %v3194_v43  ;;  %v363_v17 = vmul.f32 %v3512_v3, %v311_v9  ;;  %v451_v23 = vadd.f32 %v3520_v10, %v399_v13  ;;  %v364_v24 = vmul.f32 %v3512_v3, %v312_v15  ;;  %v3616_v31 = vmax.f32 %v428_v59, 0.0  ;;  %v3230_v59 = vld [vmem:[%s4738_s3 + $0x130] sm:$0xff]  ;;  %v3205_v15 = vld [vmem:[%s4738_s3 + $0x68] sm:$0xff] }
  0x22   : > { %4786 = vst [vmem:[#allocation3_spill] sm:$0xff] %v3600_v20  ;;  %v3607_v25 = vpack.c.b16 %v991_v61, %v990_v1  ;;  %v3609_v26 = vpack.c.b16 %v999_v6, %v998_v2  ;;  %v452_v27 = vadd.f32 %v3520_v10, %v400_v14  ;;  %v3614_v30 = vpack.c.b16 %v1007_v7, %v1006_v12  ;;  %v3382_v61 = vld [vmem:[%s3507_s8 + $0xa8] sm:$0xff]   ;;  %v3376_v12 = vld [vmem:[%s3507_s8 + $0x18] sm:$0xff]  }
  0x23   : > { %v415_v28 = vadd.f32 %v3520_v10, %v363_v17  ;;  %v3620_v32 = vsel %vm515_vm0, %v475_v62, 0.0  ;;  %v499_v33 = vmax.f32 %v451_v23, 0.0  ;;  %v3628_v37 = vmax.f32 %v440_v16, 0.0  ;;  %v3229_v16 = vld [vmem:[%s4738_s3 + $0x128] sm:$0xff]  ;;  %v3220_v23 = vld [vmem:[%s4738_s3 + $0xe0] sm:$0xff] }
  0x24   : > { %3417 = vmatpush.bf16.msra.mxu1 %v3193_v55  ;;  %3418 = vmatpush.bf16.msra.mxu2 %v3193_v55  ;;  %4787 = vst [vmem:[#allocation4_spill] sm:$0xff] %v3607_v25  ;;  %v416_v38 = vadd.f32 %v3520_v10, %v364_v24  ;;  %v3639_v46 = vsel %vm515_vm0, %v487_v22, 0.0  ;;  %v3274_v48 = vunpack.c.l.bf16 %v3378_v29  ;;  %v581_v49 = vpack.c.bf16 %v3620_v32, %v3620_v32  ;;  %v3212_v22 = vld [vmem:[%s4738_s3 + $0xa0] sm:$0xff] }
  0x25   : > { %3419 = vmatpush.bf16.msra.mxu3 %v3193_v55  ;;  %1838 = vmatpush.bf16.msra.mxu0 %v3193_v55  ;;  %4788 = vst [vmem:[#allocation5_spill] sm:$0xff] %v3609_v26  ;;  %v463_v43 = vmax.f32 %v415_v28, 0.0  ;;  %v3645_v50 = vmax.f32 %v452_v27, 0.0  ;;  %v3649_v51 = vsel %vm515_vm0, %v499_v33, 0.0  ;;  %v582_v52 = vpack.c.bf16 %v3616_v31, %v3616_v31  ;;  %v3206_v55 = vld [vmem:[%s4738_s3 + $0x70] sm:$0xff] }
  0x26   : > { %v3655_v53 = vmax.f32 %v416_v38, 0.0  ;;  %v589_v56 = vpack.c.bf16 %v3639_v46, %v3639_v46  ;;  %v590_v57 = vpack.c.bf16 %v3628_v37, %v3628_v37  ;;  %v3275_v60 = vunpack.c.h.bf16 %v3378_v29 }
  0x27   : > { %v3667_v58 = vsel %vm515_vm0, %v463_v43, 0.0  ;;  %v597_v62 = vpack.c.bf16 %v3649_v51, %v3649_v51  ;;  %v378_v1 = vmul.f32 %v3512_v3, %v3274_v48  ;;  %v992_v2 = vunpack.c.l.b16 %v581_v49  ;;  %v3204_v48 = vld [vmem:[%s4738_s3 + $0x60] sm:$0xff] }
  0x28   : > { %3420 = vmatpush.bf16.msra.mxu1 %v3192_v11  ;;  %3421 = vmatpush.bf16.msra.mxu2 %v3192_v11  ;;  %v598_v4 = vpack.c.bf16 %v3645_v50, %v3645_v50  ;;  %v3282_v5 = vunpack.c.l.bf16 %v3380_v54  ;;  %v3283_v6 = vunpack.c.h.bf16 %v3380_v54  ;;  %v993_v7 = vunpack.c.l.b16 %v582_v52 }
  0x29   : > { %3422 = vmatpush.bf16.msra.mxu3 %v3192_v11  ;;  %1839 = vmatpush.bf16.msra.mxu0 %v3192_v11  ;;  %v573_v8 = vpack.c.bf16 %v3667_v58, %v3667_v58  ;;  %v574_v9 = vpack.c.bf16 %v3655_v53, %v3655_v53  ;;  %v3290_v11 = vunpack.c.l.bf16 %v3382_v61  ;;  %v1000_v13 = vunpack.c.l.b16 %v589_v56 }
  0x2a   : > { %v1001_v14 = vunpack.c.l.b16 %v590_v57  ;;  %v379_v17 = vmul.f32 %v3512_v3, %v3275_v60  ;;  %v430_v24 = vadd.f32 %v3520_v10, %v378_v1  ;;  %v391_v27 = vmul.f32 %v3512_v3, %v3283_v6  ;;  %v3211_v60 = vld [vmem:[%s4738_s3 + $0x98] sm:$0xff] }
  0x2b   : > { %1860 = vmatmul.bf16.vlgmr.msra.gmra.mxu1 %v3607_v25  ;;  %1880 = vmatmul.bf16.vlgmr.msra.gmra.mxu2 %v3609_v26  ;;  %v3291_v28 = vunpack.c.h.bf16 %v3382_v61  ;;  %v1009_v29 = vunpack.c.l.b16 %v598_v4  ;;  %v984_v38 = vunpack.c.l.b16 %v573_v8  ;;  %v985_v43 = vunpack.c.l.b16 %v574_v9  ;;  %v3732_v4 = vld [vmem:[%s3507_s8 + $0x54] sm:$0xff]  }
  0x2c   : > { %2010 = vmatpush.bf16.msrb.mxu2 %v3215_v18  ;;  %1900 = vmatmul.bf16.vlgmr.msra.gmra.mxu3 %v3614_v30  ;;  %v390_v18 = vmul.f32 %v3512_v3, %v3282_v5  ;;  %v431_v49 = vadd.f32 %v3520_v10, %v379_v17  ;;  %v3717_v56 = vpack.c.b16 %v993_v7, %v992_v2  ;;  %v478_v57 = vmax.f32 %v430_v24, 0.0  ;;  %v3218_v17 = vld [vmem:[%s4738_s3 + $0xd0] sm:$0xff] }
  0x2d   : > { %2099 = vmatpush.bf16.msrb.mxu3 %v3223_v21  ;;  %1840 = vmatmul.bf16.vlgmr.msra.gmra.mxu0 %v3600_v20  ;;  %v1008_v21 = vunpack.c.l.b16 %v597_v62  ;;  %v3219_v62 = vld [vmem:[%s4738_s3 + $0xd8] sm:$0xff]  ;;  %v3736_v6 = vpack.c.b16 %v985_v43, %v984_v38  ;;  %v330_v38 = vunpack.c.h.bf16 %v3732_v4  ;;  %v3226_v43 = vld [vmem:[%s4738_s3 + $0x110] sm:$0xff] }
  0x2e   : > { %1921 = vmatpush.bf16.msrb.mxu1 %v3207_v34  ;;  %2188 = vmatpush.bf16.msrb.mxu0 %v3231_v36  ;;  %v442_v33 = vadd.f32 %v3520_v10, %v390_v18  ;;  %v402_v34 = vmul.f32 %v3512_v3, %v3290_v11  ;;  %v3266_v36 = vunpack.c.l.bf16 %v3376_v12  ;;  %4789 = vst [vmem:[#allocation6_spill] sm:$0xff] %v3717_v56  ;;  %v3738_v8 = vmax.f32 %v431_v49, 0.0 }
  0x2f   : > { %v3734_v5 = vpack.c.b16 %v1009_v29, %v1008_v21  ;;  %v329_v18 = vunpack.c.l.bf16 %v3732_v4 }
  0x30   : > { %2011 = vmatpush.bf16.msrb.mxu2 %v3214_v44  ;;  %v403_v44 = vmul.f32 %v3512_v3, %v3291_v28  ;;  %v454_v52 = vadd.f32 %v3520_v10, %v402_v34  ;;  %v366_v54 = vmul.f32 %v3512_v3, %v3266_v36  ;;  %v305_v28 = vld [vmem:[%s3507_s8 + $0xb4] sm:$0xff]  }
  0x31   : > { %2100 = vmatpush.bf16.msrb.mxu3 %v3222_v45  ;;  %v3267_v45 = vunpack.c.h.bf16 %v3376_v12  ;;  %4791 = vst [vmem:[#allocation8_spill] sm:$0xff] %v3734_v5  ;;  %v3203_v12 = vld [vmem:[%s4738_s3 + $0x58] sm:$0xff]  ;;  %v3202_v36 = vld [vmem:[%s4738_s3 + $0x50] sm:$0xff] }
  0x32   : > { %1922 = vmatpush.bf16.msrb.mxu1 %v3206_v55  ;;  %2189 = vmatpush.bf16.msrb.mxu0 %v3230_v59  ;;  %v3228_v55 = vld [vmem:[%s4738_s3 + $0x120] sm:$0xff]  ;;  %v443_v59 = vadd.f32 %v3520_v10, %v391_v27  ;;  %v455_v1 = vadd.f32 %v3520_v10, %v403_v44  ;;  %v418_v2 = vadd.f32 %v3520_v10, %v366_v54  ;;  %v502_v7 = vmax.f32 %v454_v52, 0.0  ;;  %v3209_v52 = vld [vmem:[%s4738_s3 + $0x88] sm:$0xff] }
  0x33   : > { %v367_v61 = vmul.f32 %v3512_v3, %v3267_v45  ;;  %v3217_v54 = vld [vmem:[%s4738_s3 + $0xc8] sm:$0xff] }
  0x34   : > { %2012 = vmatpush.bf16.msrb.mxu2 %v3213_v63  ;;  %v3727_v63 = vpack.c.b16 %v1001_v14, %v1000_v13  ;;  %v466_v11 = vmax.f32 %v418_v2, 0.0  ;;  %v3227_v13 = vld [vmem:[%s4738_s3 + $0x118] sm:$0xff]  ;;  %v3749_v14 = vsel %vm515_vm0, %v478_v57, 0.0  ;;  %v3773_v24 = vsel %vm515_vm0, %v502_v7, 0.0 }
  0x35   : > { %2101 = vmatpush.bf16.msrb.mxu3 %v3221_v0  ;;  %v490_v0 = vmax.f32 %v442_v33, 0.0  ;;  %v419_v9 = vadd.f32 %v3520_v10, %v367_v61  ;;  %4793 = vst [vmem:[#allocation10_spill] sm:$0xff] %v3773_v24  ;;  %v583_v29 = vpack.c.bf16 %v3749_v14, %v3749_v14  ;;  %v584_v33 = vpack.c.bf16 %v3738_v8, %v3738_v8  ;;  %v269_v61 = vld [vmem:[%s3507_s8 + $0x24] sm:$0xff]  }
  0x36   : > { %1923 = vmatpush.bf16.msrb.mxu1 %v3205_v15  ;;  %2190 = vmatpush.bf16.msrb.mxu0 %v3229_v16  ;;  %4790 = vst [vmem:[#allocation7_spill] sm:$0xff] %v3727_v63  ;;  %v3751_v15 = vmax.f32 %v443_v59, 0.0  ;;  %v3210_v16 = vld [vmem:[%s4738_s3 + $0x90] sm:$0xff]  ;;  %v3784_v34 = vsel %vm515_vm0, %v466_v11, 0.0  ;;  %v354_v2 = vunpack.c.h.bf16 %v305_v28  ;;  %v3201_v11 = vld [vmem:[%s4738_s3 + $0x48] sm:$0xff] }
  0x37   : > { %v3764_v21 = vsel %vm515_vm0, %v490_v0, 0.0  ;;  %v3775_v27 = vmax.f32 %v419_v9, 0.0  ;;  %v994_v4 = vunpack.c.l.b16 %v583_v29  ;;  %v995_v7 = vunpack.c.l.b16 %v584_v33 }
  0x38   : > { %2013 = vmatpush.bf16.msrb.mxu2 %v3212_v22  ;;  %v3766_v22 = vmax.f32 %v455_v1, 0.0  ;;  %v591_v44 = vpack.c.bf16 %v3764_v21, %v3764_v21  ;;  %v592_v45 = vpack.c.bf16 %v3751_v15, %v3751_v15 }
  0x39   : > { %2102 = vmatpush.bf16.msrb.mxu3 %v3220_v23  ;;  %v293_v23 = vld [vmem:[%s3507_s8 + $0x84] sm:$0xff]   ;;  %v576_v0 = vpack.c.bf16 %v3775_v27, %v3775_v27 }
  0x3a   : > { %1924 = vmatpush.bf16.msrb.mxu1 %v3204_v48  ;;  %2191 = vmatpush.bf16.msrb.mxu0 %v3228_v55  ;;  %4792 = vst [vmem:[#allocation9_spill] sm:$0xff] %v3766_v22  ;;  %v381_v48 = vmul.f32 %v3512_v3, %v329_v18  ;;  %v341_v49 = vunpack.c.l.bf16 %v293_v23  ;;  %v599_v55 = vpack.c.bf16 %v3773_v24, %v3773_v24  ;;  %v342_v59 = vunpack.c.h.bf16 %v293_v23  ;;  %v3208_v23 = vld [vmem:[%s4738_s3 + $0x80] sm:$0xff] }
  0x3b   : > { %1865 = vmatmul.bf16.gmra.mxu1 %v3717_v56  ;;  %1885 = vmatmul.bf16.gmra.mxu2 %v3727_v63  ;;  %v600_v57 = vpack.c.bf16 %v3766_v22, %v3766_v22  ;;  %v317_v18 = vunpack.c.l.bf16 %v269_v61 }
  0x3c   : > { %2014 = vmatpush.bf16.msrb.mxu2 %v3211_v60  ;;  %1905 = vmatmul.bf16.gmra.mxu3 %v3734_v5  ;;  %v353_v60 = vunpack.c.l.bf16 %v305_v28  ;;  %v393_v1 = vmul.f32 %v3512_v3, %v341_v49  ;;  %v3216_v28 = vld [vmem:[%s4738_s3 + $0xc0] sm:$0xff]  ;;  %v1010_v29 = vunpack.c.l.b16 %v599_v55  ;;  %v433_v33 = vadd.f32 %v3520_v10, %v381_v48 }
  0x3d   : > { %2103 = vmatpush.bf16.msrb.mxu3 %v3219_v62  ;;  %1845 = vmatmul.bf16.gmra.mxu0 %v3736_v6  ;;  %v575_v62 = vpack.c.bf16 %v3784_v34, %v3784_v34  ;;  %v3200_v55 = vld [vmem:[%s4738_s3 + $0x40] sm:$0xff] }
  0x3e   : > { %1925 = vmatpush.bf16.msrb.mxu1 %v3203_v12  ;;  %2192 = vmatpush.bf16.msrb.mxu0 %v3227_v13  ;;  %v405_v9 = vmul.f32 %v3512_v3, %v353_v60  ;;  %v3225_v12 = vld [vmem:[%s4738_s3 + $0x108] sm:$0xff]  ;;  %v1002_v13 = vunpack.c.l.b16 %v591_v44  ;;  %v1011_v44 = vunpack.c.l.b16 %v600_v57  ;;  %v445_v49 = vadd.f32 %v3520_v10, %v393_v1  ;;  %v3224_v48 = vld [vmem:[%s4738_s3 + $0x100] sm:$0xff] }
  0x3f   : > { %v369_v60 = vmul.f32 %v3512_v3, %v317_v18 }
  0x40   : > { %2015 = vmatpush.bf16.msrb.mxu2 %v3210_v16  ;;  %v1003_v16 = vunpack.c.l.b16 %v592_v45  ;;  %v987_v45 = vunpack.c.l.b16 %v576_v0 }
  0x41   : > { %2104 = vmatpush.bf16.msrb.mxu3 %v3218_v17  ;;  %v382_v17 = vmul.f32 %v3512_v3, %v330_v38  ;;  %v986_v38 = vunpack.c.l.b16 %v575_v62  ;;  %v481_v62 = vmax.f32 %v433_v33, 0.0 }
  0x42   : > { %1926 = vmatpush.bf16.msrb.mxu1 %v3202_v36  ;;  %2193 = vmatpush.bf16.msrb.mxu0 %v3226_v43  ;;  %v394_v36 = vmul.f32 %v3512_v3, %v342_v59  ;;  %v406_v43 = vmul.f32 %v3512_v3, %v354_v2  ;;  %v3839_v59 = vpack.c.b16 %v995_v7, %v994_v4  ;;  %v493_v4 = vmax.f32 %v445_v49, 0.0 }
  0x43   : > { %v434_v57 = vadd.f32 %v3520_v10, %v382_v17  ;;  %v3847_v2 = vpack.c.b16 %v1011_v44, %v1010_v29  ;;  %v3861_v18 = vsel %vm515_vm0, %v481_v62, 0.0 }
  0x44   : > { %2016 = vmatpush.bf16.msrb.mxu2 %v3209_v52  ;;  %v457_v52 = vadd.f32 %v3520_v10, %v405_v9  ;;  %4794 = vst [vmem:[#allocation11_spill] sm:$0xff] %v3839_v59  ;;  %v446_v0 = vadd.f32 %v3520_v10, %v394_v36  ;;  %v458_v1 = vadd.f32 %v3520_v10, %v406_v43  ;;  %v3871_v29 = vsel %vm515_vm0, %v493_v4, 0.0  ;;  %v3247_v43 = vld [vmem:[%s4738_s3 + $0x1b8] sm:$0xff] }
  0x45   : > { %2105 = vmatpush.bf16.msrb.mxu3 %v3217_v54  ;;  %v318_v54 = vunpack.c.h.bf16 %v269_v61  ;;  %v3843_v61 = vpack.c.b16 %v1003_v16, %v1002_v13  ;;  %4796 = vst [vmem:[#allocation13_spill] sm:$0xff] %v3847_v2  ;;  %v3849_v9 = vpack.c.b16 %v987_v45, %v986_v38  ;;  %v3853_v17 = vmax.f32 %v434_v57, 0.0  ;;  %v3255_v38 = vld [vmem:[%s4738_s3 + $0x1f8] sm:$0xff] }
  0x46   : > { %1927 = vmatpush.bf16.msrb.mxu1 %v3201_v11  ;;  %2194 = vmatpush.bf16.msrb.mxu0 %v3225_v12  ;;  %v505_v11 = vmax.f32 %v457_v52, 0.0  ;;  %v265_v12 = vld [vmem:[%s3507_s8 + $0x14] sm:$0x1]  ;;  %v421_v13 = vadd.f32 %v3520_v10, %v369_v60  ;;  %v3239_v45 = vld [vmem:[%s4738_s3 + $0x178] sm:$0xff]  ;;  %v593_v60 = vpack.c.bf16 %v3871_v29, %v3871_v29 }
  0x47   : > { %4795 = vst [vmem:[#allocation12_spill] sm:$0xff] %v3843_v61  ;;  %v370_v7 = vmul.f32 %v3512_v3, %v318_v54  ;;  %v313_v44 = vunpack.c.l.bf16 %v265_v12  ;;  %v3263_v52 = vld [vmem:[%s4738_s3 + $0x238] sm:$0xff]  ;;  %v585_v54 = vpack.c.bf16 %v3861_v18, %v3861_v18 }
  0x48   : > { %2017 = vmatpush.bf16.msrb.mxu2 %v3208_v23  ;;  %v3863_v23 = vmax.f32 %v446_v0, 0.0  ;;  %v469_v33 = vmax.f32 %v421_v13, 0.0  ;;  %v3886_v49 = vsel %vm515_vm0, %v505_v11, 0.0 }
  0x49   : > { %2106 = vmatpush.bf16.msrb.mxu3 %v3216_v28  ;;  %v422_v16 = vadd.f32 %v3520_v10, %v370_v7  ;;  %v3865_v28 = vmax.f32 %v458_v1, 0.0  ;;  %4798 = vst [vmem:[#allocation15_spill] sm:$0xff] %v3886_v49  ;;  %v365_v57 = vmul.f32 %v3512_v3, %v313_v44  ;;  %v3907_v1 = vadd.s32 16, %v3528_v19 }
  0x4a   : > { %1928 = vmatpush.bf16.msrb.mxu1 %v3200_v55  ;;  %2195 = vmatpush.bf16.msrb.mxu0 %v3224_v48  ;;  %v586_v55 = vpack.c.bf16 %v3853_v17, %v3853_v17  ;;  %v3897_v48 = vsel %vm515_vm0, %v469_v33, 0.0  ;;  %v594_v62 = vpack.c.bf16 %v3863_v23, %v3863_v23  ;;  %v601_v4 = vpack.c.bf16 %v3886_v49, %v3886_v49 }
  0x4b   : > { %1870 = vmatmul.bf16.gmra.mxu1 %v3839_v59  ;;  %1890 = vmatmul.bf16.gmra.mxu2 %v3843_v61  ;;  %4797 = vst [vmem:[#allocation14_spill] sm:$0xff] %v3865_v28  ;;  %v3873_v36 = vmax.f32 %v422_v16, 0.0  ;;  %v602_v0 = vpack.c.bf16 %v3865_v28, %v3865_v28  ;;  %v577_v7 = vpack.c.bf16 %v3897_v48, %v3897_v48  ;;  %v996_v13 = vunpack.c.l.b16 %v585_v54 }
  0x4c   : > { %1910 = vmatmul.bf16.gmra.mxu3 %v3847_v2  ;;  %2366 = vmatpush.bf16.msra.mxu2 %v3247_v43  ;;  %v417_v12 = vadd.f32 %v3520_v10, %v365_v57  ;;  %v997_v33 = vunpack.c.l.b16 %v586_v55  ;;  %v1004_v43 = vunpack.c.l.b16 %v593_v60  ;;  %v1005_v44 = vunpack.c.l.b16 %v594_v62 }
  0x4d   : > { %1850 = vmatmul.bf16.gmra.mxu0 %v3849_v9  ;;  %2455 = vmatpush.bf16.msra.mxu3 %v3255_v38  ;;  %v578_v11 = vpack.c.bf16 %v3873_v36, %v3873_v36  ;;  %vm520_vm1 = vcmp.le.s32.totalorder %v3907_v1, 16  ;;  %v268_v38 = vld [vmem:[%s3507_s8 + $0x20] sm:$0x1]  ;;  %v988_v20 = vunpack.c.l.b16 %v577_v7  ;;  %v652_v57 = vrot.slane %v3667_v58, 1 }
  0x4e   : > { %2277 = vmatpush.bf16.msra.mxu1 %v3239_v45  ;;  %2544 = vmatpush.bf16.msra.mxu0 %v3263_v52  ;;  %v465_v16 = vmax.f32 %v417_v12, 0.0  ;;  %v1012_v45 = vunpack.c.l.b16 %v601_v4  ;;  %v1013_v52 = vunpack.c.l.b16 %v602_v0  ;;  %v316_v28 = vunpack.c.l.bf16 %v268_v38 }
  0x4f   : > { %v989_v19 = vunpack.c.l.b16 %v578_v11  ;;  %v3920_v49 = vpack.c.b16 %v997_v33, %v996_v13  ;;  %v3922_v5 = vpack.c.b16 %v1005_v44, %v1004_v43  ;;  %v653_v60 = vrot.slane %v3655_v53, 1 }
  0x50   : > { %v526_v2 = vsel %vm520_vm1, %v465_v16, 0.0  ;;  %v3924_v54 = vpack.c.b16 %v1013_v52, %v1012_v45  ;;  %v368_v0 = vmul.f32 %v3512_v3, %v316_v28  ;;  %v3448_v4 = vmov 0.0   ;;  %v271_v45 = vld [vmem:[%s3507_s8 + $0x2c] sm:$0x1] }
  0x51   : > { %4799 = vst [vmem:[#allocation16_spill] sm:$0xff] %v3920_v49  ;;  %v3926_v55 = vpack.c.b16 %v989_v19, %v988_v20  ;;  %v655_v62 = vrot.slane %v526_v2, 1  ;;  %v650_v7 = vrot.slane %v3448_v4, 1  ;;  %v790_v11 = vrot.slane %v3448_v4, 2 }
  0x52   : > { %4800 = vst [vmem:[#allocation17_spill] sm:$0xff] %v3924_v54  ;;  %v654_v19 = vsel %vm649_vm2, %v652_v57, %v653_v60  ;;  %v420_v12 = vadd.f32 %v3520_v10, %v368_v0  ;;  %v319_v22 = vunpack.c.l.bf16 %v271_v45  ;;  %v793_v0 = vrot.slane %v3655_v53, 2 }
  0x53   : > { %v656_v20 = vsel %vm649_vm2, %v653_v60, %v655_v62  ;;  %v758_v13 = vpack.c.bf16 %v650_v7, %v650_v7  ;;  %v898_v28 = vpack.c.bf16 %v790_v11, %v790_v11  ;;  %v759_v16 = vpack.c.bf16 %v654_v19, %v654_v19 }
  0x54   : > { %v760_v33 = vpack.c.bf16 %v656_v20, %v656_v20  ;;  %v468_v43 = vmax.f32 %v420_v12, 0.0  ;;  %v792_v60 = vrot.slane %v3667_v58, 2  ;;  %v795_v7 = vrot.slane %v526_v2, 2  ;;  %v3246_v2 = vld [vmem:[%s4738_s3 + $0x1b0] sm:$0xff] }
  0x55   : > { %v1077_v44 = vunpack.c.l.b16 %v758_v13  ;;  %v1171_v38 = vunpack.c.l.b16 %v898_v28  ;;  %v1078_v52 = vunpack.c.l.b16 %v759_v16  ;;  %v657_v11 = vrot.slane %v3784_v34, 1  ;;  %v3254_v13 = vld [vmem:[%s4738_s3 + $0x1f0] sm:$0xff]  ;;  %2367 = vmatpush.bf16.msra.mxu2 %v3246_v2 }
  0x56   : > { %v1079_v4 = vunpack.c.l.b16 %v760_v33  ;;  %v658_v19 = vrot.slane %v3775_v27, 1  ;;  %v371_v12 = vmul.f32 %v3512_v3, %v319_v22  ;;  %v794_v58 = vsel %vm789_vm3, %v792_v60, %v793_v0  ;;  %v3238_v22 = vld [vmem:[%s4738_s3 + $0x170] sm:$0xff]  ;;  %2456 = vmatpush.bf16.msra.mxu3 %v3254_v13 }
  0x57   : > { %v3941_v24 = vpack.c.b16 %v1077_v44, %v1077_v44  ;;  %v3943_v57 = vpack.c.b16 %v1171_v38, %v1171_v38  ;;  %v796_v53 = vsel %vm789_vm3, %v793_v0, %v795_v7  ;;  %v3262_v16 = vld [vmem:[%s4738_s3 + $0x230] sm:$0xff]  ;;  %2278 = vmatpush.bf16.msra.mxu1 %v3238_v22  ;;  %v274_v0 = vld [vmem:[%s3507_s8 + $0x38] sm:$0x1]  ;;  %v662_v22 = vrot.slane %v3897_v48, 1 }
  0x58   : > { %v1109_v62 = vpack.c.b16 %v1079_v4, %v1078_v52  ;;  %v423_v33 = vadd.f32 %v3520_v10, %v371_v12  ;;  %v900_v44 = vpack.c.bf16 %v796_v53, %v796_v53  ;;  %2545 = vmatpush.bf16.msra.mxu0 %v3262_v16  ;;  %v797_v12 = vrot.slane %v3784_v34, 2 }
  0x59   : > { %4801 = vst [vmem:[#allocation18_spill] sm:$0xff] %v3941_v24  ;;  %v798_v53 = vrot.slane %v3775_v27, 2 }
  0x5a   : > { %4802 = vst [vmem:[#allocation19_spill] sm:$0xff] %v3943_v57  ;;  %v471_v52 = vmax.f32 %v423_v33, 0.0  ;;  %v1173_v60 = vunpack.c.l.b16 %v900_v44 }
  0x5b   : > { %1875 = vmatmul.bf16.gmra.mxu1 %v3920_v49  ;;  %1895 = vmatmul.bf16.gmra.mxu2 %v3922_v5  ;;  %v799_v34 = vsel %vm789_vm3, %v797_v12, %v798_v53 }
  0x5c   : > { %1915 = vmatmul.bf16.gmra.mxu3 %v3924_v54  ;;  %v529_v54 = vsel %vm520_vm1, %v468_v43, 0.0  ;;  %v899_v43 = vpack.c.bf16 %v794_v58, %v794_v58  ;;  %v901_v44 = vpack.c.bf16 %v799_v34, %v799_v34  ;;  %v668_v34 = vrot.slane %v3544_v35, 1 }
  0x5d   : > { %1855 = vmatmul.bf16.gmra.mxu0 %v3926_v55  ;;  %v660_v20 = vrot.slane %v529_v54, 1  ;;  %v800_v13 = vrot.slane %v529_v54, 2 }
  0x5e   : > { %v1172_v4 = vunpack.c.l.b16 %v899_v43 }
  0x5f   : > { %v661_v28 = vsel %vm649_vm2, %v658_v19, %v660_v20  ;;  %v322_v20 = vunpack.c.l.bf16 %v274_v0  ;;  %v801_v27 = vsel %vm789_vm3, %v798_v53, %v800_v13  ;;  %v277_v0 = vld [vmem:[%s3507_s8 + $0x44] sm:$0x1]  ;;  %v802_v13 = vrot.slane %v3897_v48, 2 }
  0x60   : > { %v762_v45 = vpack.c.bf16 %v661_v28, %v661_v28  ;;  %v3973_v2 = vpack.c.b16 %v1173_v60, %v1172_v4  ;;  %v1174_v4 = vunpack.c.l.b16 %v901_v44  ;;  %v325_v12 = vunpack.c.l.bf16 %v277_v0 }
  0x61   : > { %v374_v16 = vmul.f32 %v3512_v3, %v322_v20 }
  0x63   : > { %v426_v43 = vadd.f32 %v3520_v10, %v374_v16  ;;  %v667_v16 = vrot.slane %v3550_v39, 1 }
  0x6b   : > { %1929 = vmatmul.bf16.vlgmr.msrb.gmra.mxu1 %v3941_v24  ;;  %2018 = vmatmul.bf16.vlgmr.msrb.gmra.mxu2 %v3943_v57  ;;  %v817_v57 = vrot.slane %v3749_v14, 2 }
  0x6c   : > { %2107 = vmatmul.bf16.vlgmr.msrb.gmra.mxu3 %v3736_v6  ;;  %v659_v6 = vsel %vm649_vm2, %v657_v11, %v658_v19  ;;  %v1081_v11 = vunpack.c.l.b16 %v762_v45  ;;  %v532_v19 = vsel %vm520_vm1, %v471_v52, 0.0  ;;  %v474_v52 = vmax.f32 %v426_v43, 0.0 }
  0x6d   : > { %2196 = vmatmul.bf16.vlgmr.msrb.gmra.mxu0 %v1109_v62  ;;  %v761_v38 = vpack.c.bf16 %v659_v6, %v659_v6  ;;  %v663_v6 = vrot.slane %v3873_v36, 1  ;;  %v665_v28 = vrot.slane %v532_v19, 1  ;;  %v669_v43 = vsel %vm649_vm2, %v667_v16, %v668_v34 }
  0x6e   : > { %v535_v20 = vsel %vm520_vm1, %v474_v52, 0.0  ;;  %v765_v52 = vpack.c.bf16 %v669_v43, %v669_v43  ;;  %v673_v43 = vrot.slane %v3616_v31, 1 }
  0x6f   : > { %v1080_v7 = vunpack.c.l.b16 %v761_v38  ;;  %v664_v54 = vsel %vm649_vm2, %v662_v22, %v663_v6  ;;  %v666_v33 = vsel %vm649_vm2, %v663_v6, %v665_v28  ;;  %v902_v38 = vpack.c.bf16 %v801_v27, %v801_v27 }
  0x70   : > { %v764_v45 = vpack.c.bf16 %v666_v33, %v666_v33  ;;  %v803_v6 = vrot.slane %v3873_v36, 2  ;;  %v805_v28 = vrot.slane %v532_v19, 2  ;;  %v670_v27 = vrot.slane %v535_v20, 1  ;;  %v3245_v19 = vld [vmem:[%s4738_s3 + $0x1a8] sm:$0xff] }
  0x71   : > { %v3976_v58 = vpack.c.b16 %v1081_v11, %v1080_v7  ;;  %v1175_v60 = vunpack.c.l.b16 %v902_v38  ;;  %v3253_v33 = vld [vmem:[%s4738_s3 + $0x1e8] sm:$0xff]  ;;  %2368 = vmatpush.bf16.msra.mxu2 %v3245_v19  ;;  %v810_v19 = vrot.slane %v535_v20, 2 }
  0x72   : > { %v1083_v11 = vunpack.c.l.b16 %v764_v45  ;;  %v804_v48 = vsel %vm789_vm3, %v802_v13, %v803_v6  ;;  %v806_v36 = vsel %vm789_vm3, %v803_v6, %v805_v28  ;;  %v671_v44 = vsel %vm649_vm2, %v668_v34, %v670_v27  ;;  %2457 = vmatpush.bf16.msra.mxu3 %v3253_v33  ;;  %v280_v13 = vld [vmem:[%s3507_s8 + $0x50] sm:$0x1] }
  0x73   : > { %v3993_v53 = vpack.c.b16 %v1175_v60, %v1174_v4  ;;  %v904_v45 = vpack.c.bf16 %v806_v36, %v806_v36  ;;  %v766_v4 = vpack.c.bf16 %v671_v44, %v671_v44  ;;  %v3237_v60 = vld [vmem:[%s4738_s3 + $0x168] sm:$0xff]  ;;  %v1084_v6 = vunpack.c.l.b16 %v765_v52 }
  0x74   : > { %2279 = vmatpush.bf16.msra.mxu1 %v3237_v60  ;;  %v328_v34 = vunpack.c.l.bf16 %v280_v13  ;;  %v808_v36 = vrot.slane %v3544_v35, 2  ;;  %v672_v33 = vrot.slane %v3620_v32, 1 }
  0x75   : > { %v1085_v28 = vunpack.c.l.b16 %v766_v4 }
  0x76   : > { %v811_v35 = vsel %vm789_vm3, %v808_v36, %v810_v19  ;;  %v674_v20 = vsel %vm649_vm2, %v672_v33, %v673_v43 }
  0x77   : > { %v906_v52 = vpack.c.bf16 %v811_v35, %v811_v35  ;;  %v767_v4 = vpack.c.bf16 %v674_v20, %v674_v20  ;;  %v678_v20 = vrot.slane %v3738_v8, 1 }
  0x79   : > { %v1086_v13 = vunpack.c.l.b16 %v767_v4 }
  0x7b   : > { %1934 = vmatmul.bf16.gmra.mxu1 %v1109_v62  ;;  %2023 = vmatmul.bf16.gmra.mxu2 %v3973_v2  ;;  %v763_v62 = vpack.c.bf16 %v664_v54, %v664_v54  ;;  %v377_v54 = vmul.f32 %v3512_v3, %v325_v12  ;;  %v1177_v12 = vunpack.c.l.b16 %v904_v45 }
  0x7c   : > { %2112 = vmatmul.bf16.gmra.mxu3 %v3849_v9 }
  0x7d   : > { %2201 = vmatmul.bf16.gmra.mxu0 %v3976_v58  ;;  %v1082_v7 = vunpack.c.l.b16 %v763_v62  ;;  %v429_v38 = vadd.f32 %v3520_v10, %v377_v54  ;;  %v903_v62 = vpack.c.bf16 %v804_v48, %v804_v48  ;;  %v807_v54 = vrot.slane %v3550_v39, 2 }
  0x7e   : > { %v4029_v48 = vpack.c.b16 %v1085_v28, %v1084_v6  ;;  %v4048_v28 = vld [vmem:[%s4739_s4] ss:$0 sm:$0xff] }
  0x7f   : > { %v3996_v22 = vpack.c.b16 %v1083_v11, %v1082_v7  ;;  %v477_v0 = vmax.f32 %v429_v38, 0.0  ;;  %v3261_v7 = vld [vmem:[%s4738_s3 + $0x228] sm:$0xff]  ;;  %v1176_v11 = vunpack.c.l.b16 %v903_v62  ;;  %v380_v38 = vmul.f32 %v3512_v3, %v328_v34 }
  0x80   : > { %2546 = vmatpush.bf16.msra.mxu0 %v3261_v7  ;;  %4805 = vst [vmem:[#allocation22_spill] sm:$0xff] %v4029_v48  ;;  %v809_v39 = vsel %vm789_vm3, %v807_v54, %v808_v36  ;;  %v812_v36 = vrot.slane %v3620_v32, 2  ;;  %v4071_v32 = vld [vmem:[%s4736_s1] ss:$0 sm:$0xff] }
  0x81   : > { %4803 = vst [vmem:[#allocation20_spill] sm:$0xff] %v3996_v22  ;;  %v538_v16 = vsel %vm520_vm1, %v477_v0, 0.0  ;;  %v4026_v27 = vpack.c.b16 %v1177_v12, %v1176_v11  ;;  %v432_v45 = vadd.f32 %v3520_v10, %v380_v38  ;;  %v905_v3 = vpack.c.bf16 %v809_v39, %v809_v39  ;;  %v283_v12 = vld [vmem:[%s3507_s8 + $0x5c] sm:$0x1] }
  0x82   : > { %v675_v44 = vrot.slane %v538_v16, 1  ;;  %v1179_v11 = vunpack.c.l.b16 %v906_v52  ;;  %v331_v10 = vunpack.c.l.bf16 %v283_v12  ;;  %v677_v38 = vrot.slane %v3749_v14, 1  ;;  %v3252_v52 = vld [vmem:[%s4738_s3 + $0x1e0] sm:$0xff] }
  0x83   : > { %4804 = vst [vmem:[#allocation21_spill] sm:$0xff] %v4026_v27  ;;  %v480_v0 = vmax.f32 %v432_v45, 0.0  ;;  %v1178_v7 = vunpack.c.l.b16 %v905_v3  ;;  %v3244_v3 = vld [vmem:[%s4738_s3 + $0x1a0] sm:$0xff]  ;;  %2458 = vmatpush.bf16.msra.mxu3 %v3252_v52  ;;  %v286_v52 = vld [vmem:[%s3507_s8 + $0x68] sm:$0x1] }
  0x84   : > { %v676_v62 = vsel %vm649_vm2, %v673_v43, %v675_v44  ;;  %v813_v43 = vrot.slane %v3616_v31, 2  ;;  %v815_v44 = vrot.slane %v538_v16, 2  ;;  %v383_v45 = vmul.f32 %v4071_v32, %v331_v10  ;;  %2369 = vmatpush.bf16.msra.mxu2 %v3244_v3 }
  0x85   : > { %v768_v60 = vpack.c.bf16 %v676_v62, %v676_v62  ;;  %v4052_v34 = vsel %vm520_vm1, %v480_v0, 0.0  ;;  %v4054_v54 = vpack.c.b16 %v1179_v11, %v1178_v7  ;;  %v679_v4 = vsel %vm649_vm2, %v677_v38, %v678_v20  ;;  %v4091_v7 = vld [vmem:[%s4737_s2] ss:$0 sm:$0xff] }
  0x86   : > { %v680_v62 = vrot.slane %v4052_v34, 1  ;;  %v814_v31 = vsel %vm789_vm3, %v812_v36, %v813_v43  ;;  %v816_v16 = vsel %vm789_vm3, %v813_v43, %v815_v44  ;;  %v435_v11 = vadd.f32 %v4091_v7, %v383_v45  ;;  %v3236_v38 = vld [vmem:[%s4738_s3 + $0x160] sm:$0xff] }
  0x87   : > { %v1087_v6 = vunpack.c.l.b16 %v768_v60  ;;  %4806 = vst [vmem:[#allocation23_spill] sm:$0xff] %v4054_v54  ;;  %v908_v10 = vpack.c.bf16 %v816_v16, %v816_v16  ;;  %v769_v43 = vpack.c.bf16 %v679_v4, %v679_v4  ;;  %2280 = vmatpush.bf16.msra.mxu1 %v3236_v38 }
  0x88   : > { %v681_v60 = vsel %vm649_vm2, %v678_v20, %v680_v62  ;;  %v483_v45 = vmax.f32 %v435_v11, 0.0 }
  0x89   : > { %v4057_v33 = vpack.c.b16 %v1087_v6, %v1086_v13  ;;  %v907_v6 = vpack.c.bf16 %v814_v31, %v814_v31  ;;  %v770_v44 = vpack.c.bf16 %v681_v60, %v681_v60  ;;  %v3260_v31 = vld [vmem:[%s4738_s3 + $0x220] sm:$0xff]  ;;  %v1181_v3 = vunpack.c.l.b16 %v908_v10 }
  0x8a   : > { %v1088_v4 = vunpack.c.l.b16 %v769_v43  ;;  %2547 = vmatpush.bf16.msra.mxu0 %v3260_v31  ;;  %v682_v31 = vrot.slane %v3861_v18, 1 }
  0x8b   : > { %1939 = vmatmul.bf16.gmra.mxu1 %v3976_v58  ;;  %2028 = vmatmul.bf16.gmra.mxu2 %v3993_v53  ;;  %4807 = vst [vmem:[#allocation24_spill] sm:$0xff] %v4057_v33  ;;  %v1180_v16 = vunpack.c.l.b16 %v907_v6  ;;  %v1089_v60 = vunpack.c.l.b16 %v770_v44  ;;  %v818_v44 = vrot.slane %v3738_v8, 2 }
  0x8c   : > { %2117 = vmatmul.bf16.gmra.mxu3 %v3926_v55 }
  0x8d   : > { %2206 = vmatmul.bf16.gmra.mxu0 %v3996_v22  ;;  %v4120_v24 = vpack.c.b16 %v1181_v3, %v1180_v16  ;;  %v4125_v43 = vpack.c.b16 %v1089_v60, %v1088_v4  ;;  %v683_v16 = vrot.slane %v3853_v17, 1  ;;  %v819_v8 = vsel %vm789_vm3, %v817_v57, %v818_v44 }
  0x8f   : > { %4809 = vst [vmem:[#allocation26_spill] sm:$0xff] %v4120_v24  ;;  %v684_v4 = vsel %vm649_vm2, %v682_v31, %v683_v16 }
  0x90   : > { %4811 = vst [vmem:[#allocation28_spill] sm:$0xff] %v4125_v43 }
  0x9b   : > { %1944 = vmatmul.bf16.gmra.mxu1 %v3996_v22  ;;  %2033 = vmatmul.bf16.gmra.mxu2 %v4026_v27 }
  0x9c   : > { %2122 = vmatmul.bf16.gmra.mxu3 %v3607_v25  ;;  %v827_v25 = vrot.slane %v3556_v41, 2 }
  0x9d   : > { %2211 = vmatmul.bf16.gmra.mxu0 %v4029_v48 }
  0xa8   : > { %v1861_v19 = vpop.f32.mrf.mxu1 }
  0xa9   : > { %v4062_v39 = vadd.f32 %v4048_v28, %v1861_v19 }
  0xaa   : > { %v4064_v35 = vpop.f32.mrf.mxu0 }
  0xab   : > { %1949 = vmatmul.bf16.gmra.mxu1 %v4029_v48  ;;  %2038 = vmatmul.bf16.gmra.mxu2 %v4054_v54 }
  0xac   : > { %2127 = vmatmul.bf16.gmra.mxu3 %v3717_v56  ;;  %v289_v56 = vld [vmem:[%s3507_s8 + $0x74] sm:$0x1] }
  0xad   : > { %2216 = vmatmul.bf16.gmra.mxu0 %v4057_v33 }
  0xae   : > { %v1881_v0 = vpop.f32.mrf.mxu2 }
  0xaf   : > { %v4095_v12 = vadd.f32 %v4048_v28, %v1881_v0  ;;  %v1901_v13 = vpop.f32.mrf.mxu3 }
  0xb0   : > { %v4098_v36 = vadd.f32 %v4048_v28, %v1901_v13  ;;  %v1863_v19 = vpop.f32.mrf.mxu1  ;;  %v4114_v13 = vsel %vm520_vm1, %v483_v45, 0.0  ;;  %v820_v45 = vrot.slane %v4052_v34, 2 }
  0xb1   : > { %v4104_v20 = vadd.f32 %v4048_v28, %v1863_v19  ;;  %v334_v19 = vunpack.c.l.bf16 %v286_v52  ;;  %v685_v3 = vrot.slane %v4114_v13, 1 }
  0xb2   : > { %4808 = vst [vmem:[#allocation25_spill] sm:$0xff] %v4098_v36  ;;  %v4106_v62 = vpop.f32.mrf.mxu0  ;;  %v821_v34 = vsel %vm789_vm3, %v818_v44, %v820_v45  ;;  %v909_v36 = vpack.c.bf16 %v819_v8, %v819_v8 }
  0xb3   : > { %v686_v60 = vsel %vm649_vm2, %v683_v16, %v685_v3 }
  0xb4   : > { %v772_v44 = vpack.c.bf16 %v686_v60, %v686_v60  ;;  %v1182_v3 = vunpack.c.l.b16 %v909_v36 }
  0xb6   : > { %v1883_v0 = vpop.f32.mrf.mxu2  ;;  %v1091_v54 = vunpack.c.l.b16 %v772_v44  ;;  %v825_v44 = vrot.slane %v4114_v13, 2  ;;  %v3243_v13 = vld [vmem:[%s4738_s3 + $0x198] sm:$0xff] }
  0xb7   : > { %v4118_v11 = vadd.f32 %v4048_v28, %v1883_v0  ;;  %v1903_v38 = vpop.f32.mrf.mxu3  ;;  %v386_v0 = vmul.f32 %v4071_v32, %v334_v19  ;;  %2370 = vmatpush.bf16.msra.mxu2 %v3243_v13 }
  0xb8   : > { %v4123_v6 = vadd.f32 %v4048_v28, %v1903_v38  ;;  %v1866_v10 = vpop.f32.mrf.mxu1 }
  0xb9   : > { %v4131_v14 = vadd.f32 %v4048_v28, %v1866_v10  ;;  %v438_v19 = vadd.f32 %v4091_v7, %v386_v0 }
  0xba   : > { %4810 = vst [vmem:[#allocation27_spill] sm:$0xff] %v4123_v6  ;;  %v4133_v52 = vpop.f32.mrf.mxu0 }
  0xbb   : > { %1954 = vmatmul.bf16.gmra.mxu1 %v4057_v33  ;;  %2043 = vmatmul.bf16.gmra.mxu2 %v4120_v24  ;;  %v771_v33 = vpack.c.bf16 %v684_v4, %v684_v4  ;;  %v486_v16 = vmax.f32 %v438_v19, 0.0  ;;  %v823_v19 = vrot.slane %v3853_v17, 2 }
  0xbc   : > { %2132 = vmatmul.bf16.gmra.mxu3 %v3839_v59  ;;  %v910_v59 = vpack.c.bf16 %v821_v34, %v821_v34  ;;  %v822_v34 = vrot.slane %v3861_v18, 2 }
  0xbd   : > { %2221 = vmatmul.bf16.gmra.mxu0 %v4125_v43  ;;  %v4161_v8 = vsel %vm520_vm1, %v486_v16, 0.0  ;;  %v688_v16 = vrot.slane %v3552_v40, 1 }
  0xbe   : > { %v1886_v38 = vpop.f32.mrf.mxu2  ;;  %v1183_v0 = vunpack.c.l.b16 %v910_v59  ;;  %v824_v17 = vsel %vm789_vm3, %v822_v34, %v823_v19 }
  0xbf   : > { %v4148_v10 = vadd.f32 %v4048_v28, %v1886_v38  ;;  %v1906_v6 = vpop.f32.mrf.mxu3  ;;  %v1090_v38 = vunpack.c.l.b16 %v771_v33 }
  0xc0   : > { %v4151_v24 = vadd.f32 %v4048_v28, %v1906_v6  ;;  %v1868_v57 = vpop.f32.mrf.mxu1  ;;  %v337_v6 = vunpack.c.l.bf16 %v289_v56  ;;  %v687_v56 = vrot.slane %v3556_v41, 1 }
  0xc1   : > { %v4154_v45 = vadd.f32 %v4048_v28, %v1868_v57  ;;  %v4167_v57 = vpack.c.b16 %v1183_v0, %v1182_v3  ;;  %v4172_v33 = vpack.c.b16 %v1091_v54, %v1090_v38  ;;  %v690_v3 = vrot.slane %v4161_v8, 1  ;;  %v3251_v38 = vld [vmem:[%s4738_s3 + $0x1d8] sm:$0xff] }
  0xc2   : > { %4812 = vst [vmem:[#allocation29_spill] sm:$0xff] %v4151_v24  ;;  %v4156_v31 = vpop.f32.mrf.mxu0  ;;  %v389_v0 = vmul.f32 %v4071_v32, %v337_v6  ;;  %v826_v54 = vsel %vm789_vm3, %v823_v19, %v825_v44  ;;  %v689_v6 = vsel %vm649_vm2, %v687_v56, %v688_v16  ;;  %2459 = vmatpush.bf16.msra.mxu3 %v3251_v38 }
  0xc3   : > { %4814 = vst [vmem:[#allocation31_spill] sm:$0xff] %v4167_v57  ;;  %v911_v44 = vpack.c.bf16 %v824_v17, %v824_v17  ;;  %v3259_v17 = vld [vmem:[%s4738_s3 + $0x218] sm:$0xff] }
  0xc4   : > { %4816 = vst [vmem:[#allocation33_spill] sm:$0xff] %v4172_v33  ;;  %2548 = vmatpush.bf16.msra.mxu0 %v3259_v17  ;;  %v692_v17 = vrot.slane %v3639_v46, 1 }
  0xc5   : > { %v1184_v13 = vunpack.c.l.b16 %v911_v44 }
  0xc6   : > { %v1888_v48 = vpop.f32.mrf.mxu2 }
  0xc7   : > { %v4165_v4 = vadd.f32 %v4048_v28, %v1888_v48  ;;  %v1908_v60 = vpop.f32.mrf.mxu3 }
  0xc8   : > { %v4170_v36 = vadd.f32 %v4048_v28, %v1908_v60  ;;  %v1871_v59 = vpop.f32.mrf.mxu1  ;;  %v691_v60 = vsel %vm649_vm2, %v688_v16, %v690_v3 }
  0xc9   : > { %4813 = vst [vmem:[#allocation30_spill] sm:$0xff] %v4165_v4  ;;  %v4178_v18 = vadd.f32 %v4048_v28, %v1871_v59  ;;  %v774_v56 = vpack.c.bf16 %v691_v60, %v691_v60 }
  0xca   : > { %4815 = vst [vmem:[#allocation32_spill] sm:$0xff] %v4170_v36  ;;  %v4180_v48 = vpop.f32.mrf.mxu0  ;;  %v441_v36 = vadd.f32 %v4091_v7, %v389_v0  ;;  %v3235_v0 = vld [vmem:[%s4738_s3 + $0x158] sm:$0xff] }
  0xcb   : > { %1959 = vmatmul.bf16.gmra.mxu1 %v4125_v43  ;;  %2048 = vmatmul.bf16.gmra.mxu2 %v4167_v57  ;;  %v773_v43 = vpack.c.bf16 %v689_v6, %v689_v6  ;;  %v292_v6 = vld [vmem:[%s3507_s8 + $0x80] sm:$0x1] }
  0xcc   : > { %2137 = vmatmul.bf16.gmra.mxu3 %v3920_v49  ;;  %v912_v49 = vpack.c.bf16 %v826_v54, %v826_v54  ;;  %v489_v54 = vmax.f32 %v441_v36, 0.0  ;;  %2281 = vmatpush.bf16.msra.mxu1 %v3235_v0  ;;  %v830_v0 = vrot.slane %v4161_v8, 2 }
  0xcd   : > { %2226 = vmatmul.bf16.gmra.mxu0 %v4172_v33  ;;  %v1092_v60 = vunpack.c.l.b16 %v773_v43 }
  0xce   : > { %v1891_v59 = vpop.f32.mrf.mxu2  ;;  %v1185_v38 = vunpack.c.l.b16 %v912_v49 }
  0xcf   : > { %v4201_v34 = vadd.f32 %v4048_v28, %v1891_v59  ;;  %v1911_v19 = vpop.f32.mrf.mxu3  ;;  %v1093_v59 = vunpack.c.l.b16 %v774_v56  ;;  %v828_v56 = vrot.slane %v3552_v40, 2 }
  0xd0   : > { %v4204_v24 = vadd.f32 %v4048_v28, %v1911_v19  ;;  %v1873_v57 = vpop.f32.mrf.mxu1  ;;  %v4220_v19 = vsel %vm520_vm1, %v489_v54, 0.0  ;;  %v4226_v36 = vpack.c.b16 %v1185_v38, %v1184_v13  ;;  %v693_v13 = vrot.slane %v3628_v37, 1 }
  0xd1   : > { %4817 = vst [vmem:[#allocation34_spill] sm:$0xff] %v4201_v34  ;;  %v4207_v16 = vadd.f32 %v4048_v28, %v1873_v57  ;;  %v4231_v43 = vpack.c.b16 %v1093_v59, %v1092_v60  ;;  %v695_v38 = vrot.slane %v4220_v19, 1  ;;  %v829_v40 = vsel %vm789_vm3, %v827_v25, %v828_v56 }
  0xd2   : > { %4818 = vst [vmem:[#allocation35_spill] sm:$0xff] %v4204_v24  ;;  %v4209_v3 = vpop.f32.mrf.mxu0  ;;  %v340_v24 = vunpack.c.l.bf16 %v292_v6  ;;  %v831_v8 = vsel %vm789_vm3, %v828_v56, %v830_v0  ;;  %v694_v6 = vsel %vm649_vm2, %v692_v17, %v693_v13 }
  0xd3   : > { %4820 = vst [vmem:[#allocation37_spill] sm:$0xff] %v4226_v36  ;;  %v696_v60 = vsel %vm649_vm2, %v693_v13, %v695_v38 }
  0xd4   : > { %4822 = vst [vmem:[#allocation39_spill] sm:$0xff] %v4231_v43  ;;  %v776_v56 = vpack.c.bf16 %v696_v60, %v696_v60  ;;  %v1842_v60 = vadd.f32 %v4048_v28, %v4064_v35 }
  0xd6   : > { %v1893_v57 = vpop.f32.mrf.mxu2 }
  0xd7   : > { %v4224_v34 = vadd.f32 %v4048_v28, %v1893_v57  ;;  %v1913_v4 = vpop.f32.mrf.mxu3 }
  0xd8   : > { %v4229_v49 = vadd.f32 %v4048_v28, %v1913_v4  ;;  %v1876_v44 = vpop.f32.mrf.mxu1  ;;  %v392_v4 = vmul.f32 %v4071_v32, %v340_v24 }
  0xd9   : > { %4819 = vst [vmem:[#allocation36_spill] sm:$0xff] %v4224_v34  ;;  %v4237_v41 = vadd.f32 %v4048_v28, %v1876_v44  ;;  %v295_v34 = vld [vmem:[%s3507_s8 + $0x8c] sm:$0x1] }
  0xda   : > { %4821 = vst [vmem:[#allocation38_spill] sm:$0xff] %v4229_v49  ;;  %v4239_v54 = vpop.f32.mrf.mxu0  ;;  %v444_v24 = vadd.f32 %v4091_v7, %v392_v4  ;;  %v913_v49 = vpack.c.bf16 %v829_v40, %v829_v40 }
  0xdb   : > { %1964 = vmatmul.bf16.gmra.mxu1 %v4172_v33  ;;  %2053 = vmatmul.bf16.gmra.mxu2 %v4226_v36  ;;  %v775_v33 = vpack.c.bf16 %v694_v6, %v694_v6  ;;  %v832_v6 = vrot.slane %v3639_v46, 2  ;;  %v697_v46 = vrot.slane %v3764_v21, 1 }
  0xdc   : > { %2142 = vmatmul.bf16.gmra.mxu3 %v3609_v26  ;;  %v914_v26 = vpack.c.bf16 %v831_v8, %v831_v8  ;;  %v492_v13 = vmax.f32 %v444_v24, 0.0  ;;  %v1186_v38 = vunpack.c.l.b16 %v913_v49  ;;  %v343_v8 = vunpack.c.l.bf16 %v295_v34 }
  0xdd   : > { %2231 = vmatmul.bf16.gmra.mxu0 %v4231_v43  ;;  %v835_v34 = vrot.slane %v4220_v19, 2 }
  0xde   : > { %v1896_v59 = vpop.f32.mrf.mxu2  ;;  %v1187_v4 = vunpack.c.l.b16 %v914_v26  ;;  %v4267_v40 = vsel %vm520_vm1, %v492_v13, 0.0 }
  0xdf   : > { %v4254_v57 = vadd.f32 %v4048_v28, %v1896_v59  ;;  %v1916_v44 = vpop.f32.mrf.mxu3  ;;  %v1094_v59 = vunpack.c.l.b16 %v775_v33 }
  0xe0   : > { %v4257_v36 = vadd.f32 %v4048_v28, %v1916_v44  ;;  %v1878_v25 = vpop.f32.mrf.mxu1  ;;  %v4275_v49 = vpack.c.b16 %v1187_v4, %v1186_v38  ;;  %v395_v38 = vmul.f32 %v4071_v32, %v343_v8  ;;  %v3250_v4 = vld [vmem:[%s4738_s3 + $0x1d0] sm:$0xff] }
  0xe1   : > { %4823 = vst [vmem:[#allocation40_spill] sm:$0xff] %v4254_v57  ;;  %v4260_v0 = vadd.f32 %v4048_v28, %v1878_v25  ;;  %v1095_v57 = vunpack.c.l.b16 %v776_v56  ;;  %v833_v56 = vrot.slane %v3628_v37, 2  ;;  %2460 = vmatpush.bf16.msra.mxu3 %v3250_v4 }
  0xe2   : > { %4824 = vst [vmem:[#allocation41_spill] sm:$0xff] %v4257_v36  ;;  %v4262_v17 = vpop.f32.mrf.mxu0  ;;  %v700_v36 = vrot.slane %v4267_v40, 1 }
  0xe3   : > { %4826 = vst [vmem:[#allocation43_spill] sm:$0xff] %v4275_v49  ;;  %v4280_v25 = vpack.c.b16 %v1095_v57, %v1094_v59  ;;  %v834_v37 = vsel %vm789_vm3, %v832_v6, %v833_v56  ;;  %v836_v19 = vsel %vm789_vm3, %v833_v56, %v835_v34  ;;  %v3242_v57 = vld [vmem:[%s4738_s3 + $0x190] sm:$0xff]  ;;  %v1844_v6 = vadd.f32 %v4048_v28, %v4106_v62 }
  0xe4   : > { %2371 = vmatpush.bf16.msra.mxu2 %v3242_v57  ;;  %v915_v34 = vpack.c.bf16 %v834_v37, %v834_v37  ;;  %v298_v37 = vld [vmem:[%s3507_s8 + $0x98] sm:$0x1] }
  0xe6   : > { %v1898_v27 = vpop.f32.mrf.mxu2 }
  0xe7   : > { %v4273_v44 = vadd.f32 %v4048_v28, %v1898_v27  ;;  %v1918_v24 = vpop.f32.mrf.mxu3  ;;  %v698_v27 = vrot.slane %v3751_v15, 1 }
  0xe8   : > { %v4278_v26 = vadd.f32 %v4048_v28, %v1918_v24  ;;  %v1930_v33 = vpop.f32.mrf.mxu1  ;;  %v447_v24 = vadd.f32 %v4091_v7, %v395_v38 }
  0xe9   : > { %4825 = vst [vmem:[#allocation42_spill] sm:$0xff] %v4273_v44  ;;  %v1931_v13 = vadd.f32 %v1930_v33, %v1842_v60  ;;  %v699_v59 = vsel %vm649_vm2, %v697_v46, %v698_v27  ;;  %v701_v8 = vsel %vm649_vm2, %v698_v27, %v700_v36  ;;  %v3234_v36 = vld [vmem:[%s4738_s3 + $0x150] sm:$0xff] }
  0xea   : > { %4827 = vst [vmem:[#allocation44_spill] sm:$0xff] %v4278_v26  ;;  %v2197_v35 = vpop.f32.mrf.mxu0  ;;  %v916_v26 = vpack.c.bf16 %v836_v19, %v836_v19  ;;  %v3258_v27 = vld [vmem:[%s4738_s3 + $0x210] sm:$0xff]  ;;  %v495_v62 = vmax.f32 %v447_v24, 0.0  ;;  %2282 = vmatpush.bf16.msra.mxu1 %v3234_v36  ;;  %v1847_v24 = vadd.f32 %v4048_v28, %v4133_v52 }
  0xeb   : > { %1969 = vmatmul.bf16.gmra.mxu1 %v4231_v43  ;;  %2058 = vmatmul.bf16.gmra.mxu2 %v4275_v49  ;;  %v777_v49 = vpack.c.bf16 %v699_v59, %v699_v59  ;;  %v778_v43 = vpack.c.bf16 %v701_v8, %v701_v8  ;;  %v346_v8 = vunpack.c.l.bf16 %v298_v37 }
  0xec   : > { %2147 = vmatmul.bf16.gmra.mxu3 %v3727_v63  ;;  %v1189_v38 = vunpack.c.l.b16 %v916_v26  ;;  %2549 = vmatpush.bf16.msra.mxu0 %v3258_v27  ;;  %v4316_v59 = vsel %vm520_vm1, %v495_v62, 0.0 }
  0xed   : > { %2236 = vmatmul.bf16.gmra.mxu0 %v4280_v25  ;;  %v1096_v57 = vunpack.c.l.b16 %v777_v49  ;;  %v1097_v4 = vunpack.c.l.b16 %v778_v43  ;;  %v838_v43 = vrot.slane %v3751_v15, 2  ;;  %v705_v52 = vrot.slane %v4316_v59, 1 }
  0xee   : > { %v2019_v60 = vpop.f32.mrf.mxu2 }
  0xef   : > { %v2020_v33 = vadd.f32 %v2019_v60, %v1931_v13  ;;  %v2108_v56 = vpop.f32.mrf.mxu3  ;;  %v1188_v13 = vunpack.c.l.b16 %v915_v34  ;;  %v837_v60 = vrot.slane %v3764_v21, 2  ;;  %v4324_v49 = vpack.c.b16 %v1097_v4, %v1096_v57 }
  0xf0   : > { %v1932_v63 = vpop.f32.mrf.mxu1  ;;  %v703_v21 = vrot.slane %v3863_v23, 1 }
  0xf1   : > { %v2109_v44 = vadd.f32 %v2108_v56, %v2020_v33  ;;  %v1933_v46 = vadd.f32 %v1932_v63, %v1844_v6  ;;  %v4321_v33 = vpack.c.b16 %v1189_v38, %v1188_v13  ;;  %v840_v56 = vrot.slane %v4267_v40, 2 }
  0xf2   : > { %v2199_v22 = vpop.f32.mrf.mxu0  ;;  %v839_v15 = vsel %vm789_vm3, %v837_v60, %v838_v43  ;;  %v706_v38 = vsel %vm649_vm2, %v703_v21, %v705_v52  ;;  %v301_v52 = vld [vmem:[%s3507_s8 + $0xa4] sm:$0x1] }
  0xf3   : > { %v4312_v19 = vadd.f32 %v2197_v35, %v2109_v44  ;;  %v702_v44 = vrot.slane %v3871_v29, 1  ;;  %v841_v40 = vsel %vm789_vm3, %v838_v43, %v840_v56  ;;  %v780_v60 = vpack.c.bf16 %v706_v38, %v706_v38 }
  0xf5   : > { %4828 = vst [vmem:[#allocation45_spill] sm:$0xff] %v4312_v19  ;;  %v704_v13 = vsel %vm649_vm2, %v702_v44, %v703_v21  ;;  %v1099_v19 = vunpack.c.l.b16 %v780_v60  ;;  %v3249_v60 = vld [vmem:[%s4738_s3 + $0x1c8] sm:$0xff] }
  0xf6   : > { %v2021_v63 = vpop.f32.mrf.mxu2  ;;  %2461 = vmatpush.bf16.msra.mxu3 %v3249_v60 }
  0xf7   : > { %v2022_v6 = vadd.f32 %v2021_v63, %v1933_v46  ;;  %v2110_v26 = vpop.f32.mrf.mxu3  ;;  %v398_v46 = vmul.f32 %v4071_v32, %v346_v8  ;;  %v917_v8 = vpack.c.bf16 %v839_v15, %v839_v15  ;;  %v707_v15 = vrot.slane %v3568_v47, 1 }
  0xf8   : > { %v1935_v35 = vpop.f32.mrf.mxu1 }
  0xf9   : > { %v2111_v34 = vadd.f32 %v2110_v26, %v2022_v6  ;;  %v1936_v36 = vadd.f32 %v1935_v35, %v1847_v24  ;;  %v450_v57 = vadd.f32 %v4091_v7, %v398_v46  ;;  %v918_v24 = vpack.c.bf16 %v841_v40, %v841_v40 }
  0xfa   : > { %v2202_v27 = vpop.f32.mrf.mxu0  ;;  %v779_v26 = vpack.c.bf16 %v704_v13, %v704_v13  ;;  %v1852_v40 = vadd.f32 %v4048_v28, %v4180_v48 }
  0xfb   : > { %1974 = vmatmul.bf16.gmra.mxu1 %v4280_v25  ;;  %2063 = vmatmul.bf16.gmra.mxu2 %v4321_v33  ;;  %v4333_v62 = vadd.f32 %v2199_v22, %v2111_v34  ;;  %v1849_v22 = vadd.f32 %v4048_v28, %v4156_v31  ;;  %v498_v44 = vmax.f32 %v450_v57, 0.0  ;;  %v1190_v34 = vunpack.c.l.b16 %v917_v8 }
  0xfc   : > { %2152 = vmatmul.bf16.gmra.mxu3 %v3843_v61  ;;  %v1191_v21 = vunpack.c.l.b16 %v918_v24  ;;  %v1098_v46 = vunpack.c.l.b16 %v779_v26  ;;  %v708_v26 = vrot.slane %v3558_v42, 1 }
  0xfd   : > { %4829 = vst [vmem:[#allocation46_spill] sm:$0xff] %v4333_v62  ;;  %2241 = vmatmul.bf16.gmra.mxu0 %v4324_v49  ;;  %v4349_v31 = vsel %vm520_vm1, %v498_v44, 0.0 }
  0xfe   : > { %v2024_v37 = vpop.f32.mrf.mxu2  ;;  %v710_v48 = vrot.slane %v4349_v31, 1 }
  0xff   : > { %v2025_v4 = vadd.f32 %v2024_v37, %v1936_v36  ;;  %v2113_v63 = vpop.f32.mrf.mxu3  ;;  %v349_v36 = vunpack.c.l.bf16 %v301_v52  ;;  %v4354_v37 = vpack.c.b16 %v1191_v21, %v1190_v34  ;;  %v1854_v34 = vadd.f32 %v4048_v28, %v4209_v3  ;;  %v304_v3 = vld [vmem:[%s3507_s8 + $0xb0] sm:$0x1] }
 0x100   : > { %v1937_v6 = vpop.f32.mrf.mxu1 }
 0x101   : > { %v2114_v35 = vadd.f32 %v2113_v63, %v2025_v4  ;;  %v1938_v43 = vadd.f32 %v1937_v6, %v1849_v22  ;;  %v4357_v22 = vpack.c.b16 %v1099_v19, %v1098_v46  ;;  %v843_v4 = vrot.slane %v3863_v23, 2 }
 0x102   : > { %v2204_v56 = vpop.f32.mrf.mxu0  ;;  %v845_v63 = vrot.slane %v4316_v59, 2  ;;  %v3241_v59 = vld [vmem:[%s4738_s3 + $0x188] sm:$0xff] }
 0x103   : > { %v4345_v62 = vadd.f32 %v2202_v27, %v2114_v35  ;;  %v842_v27 = vrot.slane %v3871_v29, 2  ;;  %v709_v35 = vsel %vm649_vm2, %v707_v15, %v708_v26  ;;  %2372 = vmatpush.bf16.msra.mxu2 %v3241_v59  ;;  %v847_v59 = vrot.slane %v3568_v47, 2 }
 0x104   : > { %v846_v19 = vsel %vm789_vm3, %v843_v4, %v845_v63  ;;  %v3257_v63 = vld [vmem:[%s4738_s3 + $0x208] sm:$0xff]  ;;  %v850_v47 = vrot.slane %v4349_v31, 2 }
 0x105   : > { %v844_v23 = vsel %vm789_vm3, %v842_v27, %v843_v4  ;;  %v3233_v4 = vld [vmem:[%s4738_s3 + $0x148] sm:$0xff]  ;;  %2550 = vmatpush.bf16.msra.mxu0 %v3257_v63 }
 0x106   : > { %v2026_v61 = vpop.f32.mrf.mxu2  ;;  %v919_v46 = vpack.c.bf16 %v844_v23, %v844_v23  ;;  %2283 = vmatpush.bf16.msra.mxu1 %v3233_v4 }
 0x107   : > { %v2027_v13 = vadd.f32 %v2026_v61, %v1938_v43  ;;  %v2115_v38 = vpop.f32.mrf.mxu3  ;;  %v401_v61 = vmul.f32 %v4071_v32, %v349_v36  ;;  %v711_v43 = vsel %vm649_vm2, %v708_v26, %v710_v48  ;;  %v920_v36 = vpack.c.bf16 %v846_v19, %v846_v19 }
 0x108   : > { %v1940_v57 = vpop.f32.mrf.mxu1  ;;  %v352_v19 = vunpack.c.l.bf16 %v304_v3 }
 0x109   : > { %v2116_v8 = vadd.f32 %v2115_v38, %v2027_v13  ;;  %v1941_v24 = vadd.f32 %v1940_v57, %v1852_v40  ;;  %v453_v44 = vadd.f32 %v4091_v7, %v401_v61  ;;  %v781_v13 = vpack.c.bf16 %v709_v35, %v709_v35 }
 0x10a   : > { %v2207_v6 = vpop.f32.mrf.mxu0  ;;  %v782_v38 = vpack.c.bf16 %v711_v43, %v711_v43  ;;  %v1193_v26 = vunpack.c.l.b16 %v920_v36  ;;  %v712_v43 = vrot.slane %v3649_v51, 1  ;;  %v713_v36 = vrot.slane %v3645_v50, 1 }
 0x10b   : > { %1979 = vmatmul.bf16.gmra.mxu1 %v4324_v49  ;;  %2068 = vmatmul.bf16.gmra.mxu2 %v4354_v37  ;;  %v4366_v29 = vadd.f32 %v2204_v56, %v2116_v8  ;;  %v501_v8 = vmax.f32 %v453_v44, 0.0  ;;  %v1100_v61 = vunpack.c.l.b16 %v781_v13 }
 0x10c   : > { %2157 = vmatmul.bf16.gmra.mxu3 %v3922_v5  ;;  %v1101_v23 = vunpack.c.l.b16 %v782_v38  ;;  %v714_v4 = vsel %vm649_vm2, %v712_v43, %v713_v36 }
 0x10d   : > { %2246 = vmatmul.bf16.gmra.mxu0 %v4357_v22  ;;  %v4395_v35 = vsel %vm520_vm1, %v501_v8, 0.0 }
 0x10e   : > { %v2029_v56 = vpop.f32.mrf.mxu2 }
 0x10f   : > { %v2030_v21 = vadd.f32 %v2029_v56, %v1941_v24  ;;  %v2118_v52 = vpop.f32.mrf.mxu3  ;;  %v1192_v24 = vunpack.c.l.b16 %v919_v46  ;;  %v1857_v56 = vadd.f32 %v4048_v28, %v4239_v54  ;;  %v848_v46 = vrot.slane %v3558_v42, 2 }
 0x110   : > { %v1942_v40 = vpop.f32.mrf.mxu1  ;;  %v404_v54 = vmul.f32 %v4071_v32, %v352_v19 }
 0x111   : > { %v2119_v27 = vadd.f32 %v2118_v52, %v2030_v21  ;;  %v1943_v15 = vadd.f32 %v1942_v40, %v1854_v34  ;;  %v4400_v21 = vpack.c.b16 %v1193_v26, %v1192_v24  ;;  %v4402_v52 = vpack.c.b16 %v1101_v23, %v1100_v61 }
 0x112   : > { %v2209_v57 = vpop.f32.mrf.mxu0  ;;  %v849_v42 = vsel %vm789_vm3, %v847_v59, %v848_v46  ;;  %v851_v31 = vsel %vm789_vm3, %v848_v46, %v850_v47  ;;  %v456_v8 = vadd.f32 %v4091_v7, %v404_v54 }
 0x113   : > { %v4390_v48 = vadd.f32 %v2207_v6, %v2119_v27  ;;  %v715_v27 = vrot.slane %v4395_v35, 1  ;;  %v921_v61 = vpack.c.bf16 %v849_v42, %v849_v42  ;;  %v922_v23 = vpack.c.bf16 %v851_v31, %v851_v31  ;;  %v4830_v42 = vld [vmem:[#allocation10_spill] sm:$0xff] }
 0x114   : > { %v504_v43 = vmax.f32 %v456_v8, 0.0  ;;  %v717_v31 = vrot.slane %v4830_v42, 1 }
 0x115   : > { %v716_v63 = vsel %vm649_vm2, %v713_v36, %v715_v27  ;;  %v1194_v46 = vunpack.c.l.b16 %v921_v61  ;;  %v1195_v47 = vunpack.c.l.b16 %v922_v23 }
 0x116   : > { %v2031_v60 = vpop.f32.mrf.mxu2  ;;  %v784_v59 = vpack.c.bf16 %v716_v63, %v716_v63 }
 0x117   : > { %v2032_v44 = vadd.f32 %v2031_v60, %v1943_v15  ;;  %v2120_v34 = vpop.f32.mrf.mxu3  ;;  %v783_v60 = vpack.c.bf16 %v714_v4, %v714_v4  ;;  %v4431_v8 = vpack.c.b16 %v1195_v47, %v1194_v46  ;;  %v3248_v46 = vld [vmem:[%s4738_s3 + $0x1c0] sm:$0xff] }
 0x118   : > { %v1945_v6 = vpop.f32.mrf.mxu1  ;;  %v1103_v27 = vunpack.c.l.b16 %v784_v59  ;;  %2462 = vmatpush.bf16.msra.mxu3 %v3248_v46  ;;  %v857_v46 = vrot.slane %v4830_v42, 2 }
 0x119   : > { %v2121_v40 = vadd.f32 %v2120_v34, %v2032_v44  ;;  %v1946_v13 = vadd.f32 %v1945_v6, %v1857_v56  ;;  %v307_v6 = vld [vmem:[%s3507_s8 + $0xbc] sm:$0x1] }
 0x11a   : > { %v2212_v38 = vpop.f32.mrf.mxu0 }
 0x11b   : > { %1984 = vmatmul.bf16.gmra.mxu1 %v4357_v22  ;;  %2073 = vmatmul.bf16.gmra.mxu2 %v4400_v21  ;;  %v4411_v15 = vadd.f32 %v2209_v57, %v2121_v40  ;;  %v1859_v57 = vadd.f32 %v4048_v28, %v4262_v17  ;;  %v1102_v40 = vunpack.c.l.b16 %v783_v60  ;;  %v4427_v28 = vsel %vm520_vm1, %v504_v43, 0.0 }
 0x11c   : > { %2162 = vmatmul.bf16.gmra.mxu3 %v3614_v30  ;;  %v355_v17 = vunpack.c.l.bf16 %v307_v6  ;;  %v720_v23 = vrot.slane %v4427_v28, 1  ;;  %v3240_v6 = vld [vmem:[%s4738_s3 + $0x180] sm:$0xff] }
 0x11d   : > { %2251 = vmatmul.bf16.gmra.mxu0 %v4402_v52  ;;  %2373 = vmatpush.bf16.msra.mxu2 %v3240_v6 }
 0x11e   : > { %v2034_v3 = vpop.f32.mrf.mxu2  ;;  %v407_v59 = vmul.f32 %v4071_v32, %v355_v17 }
 0x11f   : > { %v2035_v24 = vadd.f32 %v2034_v3, %v1946_v13  ;;  %v2123_v26 = vpop.f32.mrf.mxu3  ;;  %v852_v13 = vrot.slane %v3649_v51, 2  ;;  %v853_v3 = vrot.slane %v3645_v50, 2 }
 0x120   : > { %v1947_v19 = vpop.f32.mrf.mxu1 }
 0x121   : > { %v2124_v56 = vadd.f32 %v2123_v26, %v2035_v24  ;;  %v1948_v44 = vadd.f32 %v1947_v19, %v1859_v57  ;;  %v4434_v57 = vpack.c.b16 %v1103_v27, %v1102_v40  ;;  %v855_v24 = vrot.slane %v4395_v35, 2  ;;  %v4831_v26 = vld [vmem:[#allocation9_spill] sm:$0xff] }
 0x122   : > { %v2214_v34 = vpop.f32.mrf.mxu0  ;;  %v718_v61 = vrot.slane %v4831_v26, 1  ;;  %v854_v50 = vsel %vm789_vm3, %v852_v13, %v853_v3 }
 0x123   : > { %v4423_v36 = vadd.f32 %v2212_v38, %v2124_v56  ;;  %v856_v35 = vsel %vm789_vm3, %v853_v3, %v855_v24  ;;  %v923_v40 = vpack.c.bf16 %v854_v50, %v854_v50 }
 0x124   : > { %v719_v43 = vsel %vm649_vm2, %v717_v31, %v718_v61  ;;  %v924_v13 = vpack.c.bf16 %v856_v35, %v856_v35 }
 0x126   : > { %v2036_v54 = vpop.f32.mrf.mxu2 }
 0x127   : > { %v2037_v4 = vadd.f32 %v2036_v54, %v1948_v44  ;;  %v2125_v63 = vpop.f32.mrf.mxu3  ;;  %v4833_v44 = vld [vmem:[#allocation8_spill] sm:$0xff]  ;;  %v785_v54 = vpack.c.bf16 %v719_v43, %v719_v43  ;;  %v310_v43 = vld [vmem:[%s3507_s8 + $0xc8] sm:$0x1] }
 0x128   : > { %v1950_v38 = vpop.f32.mrf.mxu1 }
 0x129   : > { %v2126_v19 = vadd.f32 %v2125_v63, %v2037_v4  ;;  %v1951_v51 = vadd.f32 %v1950_v38, %v4062_v39  ;;  %v721_v39 = vsel %vm649_vm2, %v718_v61, %v720_v23  ;;  %v3232_v61 = vld [vmem:[%s4738_s3 + $0x140] sm:$0xff]  ;;  %v1104_v50 = vunpack.c.l.b16 %v785_v54 }
 0x12a   : > { %v2217_v60 = vpop.f32.mrf.mxu0  ;;  %v786_v31 = vpack.c.bf16 %v721_v39, %v721_v39  ;;  %v3256_v23 = vld [vmem:[%s4738_s3 + $0x200] sm:$0xff]  ;;  %2284 = vmatpush.bf16.msra.mxu1 %v3232_v61 }
 0x12b   : > { %1989 = vmatmul.bf16.gmra.mxu1 %v4402_v52  ;;  %2078 = vmatmul.bf16.gmra.mxu2 %v4431_v8  ;;  %v4444_v56 = vadd.f32 %v2214_v34, %v2126_v19  ;;  %v459_v34 = vadd.f32 %v4091_v7, %v407_v59  ;;  %v1196_v19 = vunpack.c.l.b16 %v923_v40  ;;  %v1197_v59 = vunpack.c.l.b16 %v924_v13 }
 0x12c   : > { %2167 = vmatmul.bf16.gmra.mxu3 %v4833_v44  ;;  %v1105_v35 = vunpack.c.l.b16 %v786_v31  ;;  %2551 = vmatpush.bf16.msra.mxu0 %v3256_v23 }
 0x12d   : > { %4832 = vst [vmem:[#allocation10_spill] sm:$0xff] %v4444_v56  ;;  %2256 = vmatmul.bf16.gmra.mxu0 %v4434_v57  ;;  %v507_v24 = vmax.f32 %v459_v34, 0.0  ;;  %v4475_v54 = vpack.c.b16 %v1197_v59, %v1196_v19 }
 0x12e   : > { %v2039_v47 = vpop.f32.mrf.mxu2  ;;  %v4477_v31 = vpack.c.b16 %v1105_v35, %v1104_v50 }
 0x12f   : > { %v2040_v27 = vadd.f32 %v2039_v47, %v1951_v51  ;;  %v2128_v17 = vpop.f32.mrf.mxu3  ;;  %v3383_v51 = vld [vmem:[%s3507_s8 + $0xc0] sm:$0xff]   ;;  %v358_v47 = vunpack.c.l.bf16 %v310_v43  ;;  %s3191_s8 = sshll.u32 %s4889_s22, 7 }
 0x130   : > { %v1952_v4 = vpop.f32.mrf.mxu1  ;;  %v3294_v6 = vunpack.c.l.bf16 %v3383_v51  ;;  %v3295_v56 = vunpack.c.h.bf16 %v3383_v51  ;;  %s4651_s12 = scalar_lea.vmem %s4740_s5, %s3191_s8 }
 0x131   : > { %v2129_v63 = vadd.f32 %v2128_v17, %v2040_v27  ;;  %v1953_v3 = vadd.f32 %v1952_v4, %v4104_v20  ;;  %v4471_v20 = vsel %vm520_vm1, %v507_v24, 0.0  ;;  %v4835_v27 = vld [vmem:[#allocation15_spill] sm:$0xff]  ;;  %v4836_v24 = vld [vmem:[#allocation14_spill] sm:$0xff]  ;;  %v410_v19 = vmul.f32 %v4071_v32, %v358_v47 }
 0x132   : > { %v2219_v38 = vpop.f32.mrf.mxu0  ;;  %v722_v40 = vrot.slane %v4835_v27, 1  ;;  %v723_v61 = vrot.slane %v4836_v24, 1  ;;  %v725_v23 = vrot.slane %v4471_v20, 1  ;;  %v409_v35 = vmul.f32 %v4071_v32, %v3295_v56 }
 0x133   : > { %v4467_v39 = vadd.f32 %v2217_v60, %v2129_v63  ;;  %v858_v60 = vrot.slane %v4831_v26, 2  ;;  %v860_v63 = vrot.slane %v4427_v28, 2  ;;  %v4838_v28 = vld [vmem:[#allocation13_spill] sm:$0xff] }
 0x134   : > { %v724_v51 = vsel %vm649_vm2, %v722_v40, %v723_v61  ;;  %v726_v50 = vsel %vm649_vm2, %v723_v61, %v725_v23 }
 0x135   : > { %4834 = vst [vmem:[#allocation9_spill] sm:$0xff] %v4467_v39  ;;  %v859_v59 = vsel %vm789_vm3, %v857_v46, %v858_v60  ;;  %v788_v46 = vpack.c.bf16 %v726_v50, %v726_v50 }
 0x136   : > { %v2041_v34 = vpop.f32.mrf.mxu2 }
 0x137   : > { %v2042_v17 = vadd.f32 %v2041_v34, %v1953_v3  ;;  %v2130_v13 = vpop.f32.mrf.mxu3  ;;  %v408_v3 = vmul.f32 %v4071_v32, %v3294_v6 }
 0x138   : > { %v1955_v4 = vpop.f32.mrf.mxu1 }
 0x139   : > { %v2131_v42 = vadd.f32 %v2130_v13, %v2042_v17  ;;  %v1956_v43 = vadd.f32 %v1955_v4, %v4131_v14  ;;  %v861_v14 = vsel %vm789_vm3, %v858_v60, %v860_v63  ;;  %v460_v6 = vadd.f32 %v4091_v7, %v408_v3 }
 0x13a   : > { %v2222_v39 = vpop.f32.mrf.mxu0  ;;  %v925_v13 = vpack.c.bf16 %v859_v59, %v859_v59  ;;  %v926_v4 = vpack.c.bf16 %v861_v14, %v861_v14  ;;  %v461_v63 = vadd.f32 %v4091_v7, %v409_v35 }
 0x13b   : > { %1994 = vmatmul.bf16.gmra.mxu1 %v4434_v57  ;;  %2083 = vmatmul.bf16.gmra.mxu2 %v4475_v54  ;;  %v4488_v26 = vadd.f32 %v2219_v38, %v2131_v42  ;;  %v462_v38 = vadd.f32 %v4091_v7, %v410_v19  ;;  %v508_v61 = vmax.f32 %v460_v6, 0.0  ;;  %v862_v7 = vrot.slane %v4835_v27, 2 }
 0x13c   : > { %2172 = vmatmul.bf16.gmra.mxu3 %v4838_v28  ;;  %v1198_v56 = vunpack.c.l.b16 %v925_v13  ;;  %v1199_v23 = vunpack.c.l.b16 %v926_v4 }
 0x13d   : > { %4837 = vst [vmem:[#allocation8_spill] sm:$0xff] %v4488_v26  ;;  %2261 = vmatmul.bf16.gmra.mxu0 %v4477_v31  ;;  %v787_v26 = vpack.c.bf16 %v724_v51, %v724_v51  ;;  %v510_v32 = vmax.f32 %v462_v38, 0.0  ;;  %v4507_v14 = vsel %vm515_vm0, %v508_v61, 0.0  ;;  %v865_v38 = vrot.slane %v4471_v20, 2 }
 0x13e   : > { %v2044_v34 = vpop.f32.mrf.mxu2  ;;  %v4514_v6 = vpack.c.b16 %v1199_v23, %v1198_v56 }
 0x13f   : > { %v2045_v47 = vadd.f32 %v2044_v34, %v1956_v43  ;;  %v2133_v17 = vpop.f32.mrf.mxu3  ;;  %v1106_v19 = vunpack.c.l.b16 %v787_v26  ;;  %v1107_v43 = vunpack.c.l.b16 %v788_v46  ;;  %v4503_v34 = vmax.f32 %v461_v63, 0.0  ;;  %v4841_v46 = vld [vmem:[#allocation17_spill] sm:$0xff] }
 0x140   : > { %v1957_v42 = vpop.f32.mrf.mxu1 }
 0x141   : > { %v2134_v28 = vadd.f32 %v2133_v17, %v2045_v47  ;;  %v1958_v60 = vadd.f32 %v1957_v42, %v4154_v45  ;;  %v4511_v45 = vsel %vm520_vm1, %v510_v32, 0.0  ;;  %v4516_v26 = vpack.c.b16 %v1107_v43, %v1106_v19 }
 0x142   : > { %v2224_v40 = vpop.f32.mrf.mxu0  ;;  %v934_v47 = vrot.slane %v4507_v14, 1  ;;  %v935_v4 = vrot.slane %v4503_v34, 1  ;;  %v937_v27 = vrot.slane %v4511_v45, 1  ;;  %v930_v43 = vpack.c.bf16 %v4503_v34, %v4503_v34 }
 0x143   : > { %v4501_v3 = vadd.f32 %v2222_v39, %v2134_v28  ;;  %v863_v28 = vrot.slane %v4836_v24, 2 }
 0x145   : > { %v864_v20 = vsel %vm789_vm3, %v862_v7, %v863_v28  ;;  %v866_v24 = vsel %vm789_vm3, %v863_v28, %v865_v38 }
 0x146   : > { %v2046_v51 = vpop.f32.mrf.mxu2  ;;  %v927_v56 = vpack.c.bf16 %v864_v20, %v864_v20  ;;  %v928_v23 = vpack.c.bf16 %v866_v24, %v866_v24 }
 0x147   : > { %v2047_v50 = vadd.f32 %v2046_v51, %v1958_v60  ;;  %v2135_v35 = vpop.f32.mrf.mxu3  ;;  %v938_v60 = vsel %vm649_vm2, %v935_v4, %v937_v27 }
 0x148   : > { %v1960_v39 = vpop.f32.mrf.mxu1  ;;  %v942_v51 = vpack.c.bf16 %v938_v60, %v938_v60  ;;  %v1201_v28 = vunpack.c.l.b16 %v928_v23 }
 0x149   : > { %v2136_v17 = vadd.f32 %v2135_v35, %v2047_v50  ;;  %v1961_v1 = vadd.f32 %v1960_v39, %v4178_v18  ;;  %v936_v18 = vsel %vm649_vm2, %v934_v47, %v935_v4  ;;  %v1200_v39 = vunpack.c.l.b16 %v927_v56 }
 0x14a   : > { %v2227_v13 = vpop.f32.mrf.mxu0  ;;  %v941_v59 = vpack.c.bf16 %v936_v18, %v936_v18  ;;  %v1243_v4 = vunpack.c.l.b16 %v942_v51 }
 0x14b   : > { %1999 = vmatmul.bf16.gmra.mxu1 %v4477_v31  ;;  %2088 = vmatmul.bf16.gmra.mxu2 %v4514_v6  ;;  %v4526_v42 = vadd.f32 %v2224_v40, %v2136_v17  ;;  %v929_v40 = vpack.c.bf16 %v4507_v14, %v4507_v14  ;;  %v1237_v17 = vunpack.c.l.b16 %v930_v43 }
 0x14c   : > { %2177 = vmatmul.bf16.gmra.mxu3 %v4841_v46 }
 0x14d   : > { %4840 = vst [vmem:[#allocation15_spill] sm:$0xff] %v4526_v42  ;;  %2266 = vmatmul.bf16.gmra.mxu0 %v4516_v26  ;;  %v1236_v47 = vunpack.c.l.b16 %v929_v40 }
 0x14e   : > { %v2049_v63 = vpop.f32.mrf.mxu2 }
 0x14f   : > { %v2050_v61 = vadd.f32 %v2049_v63, %v1961_v1  ;;  %v2138_v32 = vpop.f32.mrf.mxu3  ;;  %v1242_v1 = vunpack.c.l.b16 %v941_v59  ;;  %v4541_v63 = vpack.c.b16 %v1201_v28, %v1200_v39  ;;  %v4543_v18 = vpack.c.b16 %v1237_v17, %v1236_v47 }
 0x150   : > { %v1962_v19 = vpop.f32.mrf.mxu1 }
 0x151   : > { %v2139_v7 = vadd.f32 %v2138_v32, %v2050_v61  ;;  %v1963_v50 = vadd.f32 %v1962_v19, %v4207_v16  ;;  %v4545_v60 = vpack.c.b16 %v1243_v4, %v1242_v1 }
 0x152   : > { %v2229_v35 = vpop.f32.mrf.mxu0 }
 0x153   : > { %v4539_v38 = vadd.f32 %v2227_v13, %v2139_v7 }
 0x156   : > { %v2051_v27 = vpop.f32.mrf.mxu2 }
 0x157   : > { %v2052_v20 = vadd.f32 %v2051_v27, %v1963_v50  ;;  %v2140_v24 = vpop.f32.mrf.mxu3 }
 0x158   : > { %v1965_v42 = vpop.f32.mrf.mxu1 }
 0x159   : > { %v2141_v16 = vadd.f32 %v2140_v24, %v2052_v20  ;;  %v1966_v61 = vadd.f32 %v1965_v42, %v4237_v41 }
 0x15a   : > { %v2232_v32 = vpop.f32.mrf.mxu0 }
 0x15b   : > { %2004 = vmatmul.bf16.gmra.mxu1 %v4516_v26  ;;  %2093 = vmatmul.bf16.gmra.mxu2 %v4541_v63  ;;  %v4550_v13 = vadd.f32 %v2229_v35, %v2141_v16 }
 0x15c   : > { %2182 = vmatmul.bf16.gmra.mxu3 %v4543_v18 }
 0x15d   : > { %2271 = vmatmul.bf16.gmra.mxu0 %v4545_v60 }
 0x15e   : > { %v2054_v56 = vpop.f32.mrf.mxu2 }
 0x15f   : > { %v2055_v23 = vadd.f32 %v2054_v56, %v1966_v61  ;;  %v2143_v19 = vpop.f32.mrf.mxu3 }
 0x160   : > { %v1967_v40 = vpop.f32.mrf.mxu1 }
 0x161   : > { %v2144_v43 = vadd.f32 %v2143_v19, %v2055_v23  ;;  %v1968_v59 = vadd.f32 %v1967_v40, %v4260_v0  ;;  %v4842_v40 = vld [vmem:[#allocation20_spill] sm:$0xff] }
 0x162   : > { %v2234_v51 = vpop.f32.mrf.mxu0 }
 0x163   : > { %v4555_v41 = vadd.f32 %v2232_v32, %v2144_v43 }
 0x166   : > { %v2056_v42 = vpop.f32.mrf.mxu2 }
 0x167   : > { %v2057_v7 = vadd.f32 %v2056_v42, %v1968_v59  ;;  %v2145_v50 = vpop.f32.mrf.mxu3 }
 0x168   : > { %v1970_v39 = vpop.f32.mrf.mxu1 }
 0x169   : > { %v2146_v35 = vadd.f32 %v2145_v50, %v2057_v7  ;;  %v1971_v28 = vadd.f32 %v1970_v39, %v4095_v12  ;;  %v4844_v50 = vld [vmem:[#allocation30_spill] sm:$0xff] }
 0x16a   : > { %v2237_v47 = vpop.f32.mrf.mxu0 }
 0x16b   : > { %2285 = vmatmul.bf16.vlgmr.msra.gmra.mxu1 %v3973_v2  ;;  %2374 = vmatmul.bf16.vlgmr.msra.gmra.mxu2 %v3849_v9  ;;  %v4560_v17 = vadd.f32 %v2234_v51, %v2146_v35 }
 0x16c   : > { %2463 = vmatmul.bf16.vlgmr.msra.gmra.mxu3 %v3976_v58 }
 0x16d   : > { %2552 = vmatmul.bf16.vlgmr.msra.gmra.mxu0 %v3993_v53 }
 0x16e   : > { %v2059_v0 = vpop.f32.mrf.mxu2 }
 0x16f   : > { %v2060_v1 = vadd.f32 %v2059_v0, %v1971_v28  ;;  %v2148_v4 = vpop.f32.mrf.mxu3 }
 0x170   : > { %v1972_v27 = vpop.f32.mrf.mxu1 }
 0x171   : > { %v2149_v20 = vadd.f32 %v2148_v4, %v2060_v1  ;;  %v1973_v24 = vadd.f32 %v1972_v27, %v4118_v11  ;;  %v4843_v11 = vld [vmem:[#allocation21_spill] sm:$0xff]  ;;  %v4845_v1 = vld [vmem:[#allocation34_spill] sm:$0xff] }
 0x172   : > { %v2239_v16 = vpop.f32.mrf.mxu0 }
 0x173   : > { %v4565_v12 = vadd.f32 %v2237_v47, %v2149_v20  ;;  %v4846_v20 = vld [vmem:[#allocation4_spill] sm:$0xff] }
 0x176   : > { %v2061_v61 = vpop.f32.mrf.mxu2 }
 0x177   : > { %v2062_v2 = vadd.f32 %v2061_v61, %v1973_v24  ;;  %v2150_v32 = vpop.f32.mrf.mxu3  ;;  %v4848_v61 = vld [vmem:[#allocation23_spill] sm:$0xff] }
 0x178   : > { %v1975_v9 = vpop.f32.mrf.mxu1 }
 0x179   : > { %v2151_v56 = vadd.f32 %v2150_v32, %v2062_v2  ;;  %v1976_v23 = vadd.f32 %v1975_v9, %v4148_v10 }
 0x17a   : > { %v2242_v58 = vpop.f32.mrf.mxu0 }
 0x17b   : > { %2290 = vmatmul.bf16.gmra.mxu1 %v3993_v53  ;;  %2379 = vmatmul.bf16.gmra.mxu2 %v3926_v55  ;;  %v4570_v19 = vadd.f32 %v2239_v16, %v2151_v56  ;;  %v4847_v16 = vld [vmem:[#allocation22_spill] sm:$0xff] }
 0x17c   : > { %2468 = vmatmul.bf16.gmra.mxu3 %v4842_v40 }
 0x17d   : > { %2557 = vmatmul.bf16.gmra.mxu0 %v4843_v11 }
 0x17e   : > { %v2064_v43 = vpop.f32.mrf.mxu2 }
 0x17f   : > { %v2065_v59 = vadd.f32 %v2064_v43, %v1976_v23  ;;  %v2153_v51 = vpop.f32.mrf.mxu3 }
 0x180   : > { %v1977_v42 = vpop.f32.mrf.mxu1 }
 0x181   : > { %v2154_v7 = vadd.f32 %v2153_v51, %v2065_v59  ;;  %v1978_v39 = vadd.f32 %v1977_v42, %v4844_v50 }
 0x182   : > { %v2244_v35 = vpop.f32.mrf.mxu0 }
 0x183   : > { %v4575_v10 = vadd.f32 %v2242_v58, %v2154_v7  ;;  %v4849_v58 = vld [vmem:[#allocation36_spill] sm:$0xff] }
 0x186   : > { %v2066_v28 = vpop.f32.mrf.mxu2 }
 0x187   : > { %v2067_v53 = vadd.f32 %v2066_v28, %v1978_v39  ;;  %v2155_v47 = vpop.f32.mrf.mxu3  ;;  %v4850_v39 = vld [vmem:[#allocation40_spill] sm:$0xff] }
 0x188   : > { %v1980_v55 = vpop.f32.mrf.mxu1 }
 0x189   : > { %v2156_v0 = vadd.f32 %v2155_v47, %v2067_v53  ;;  %v1981_v4 = vadd.f32 %v1980_v55, %v4845_v1  ;;  %v4851_v53 = vld [vmem:[#allocation6_spill] sm:$0xff]  ;;  %v4852_v55 = vld [vmem:[#allocation24_spill] sm:$0xff] }
 0x18a   : > { %v2247_v27 = vpop.f32.mrf.mxu0 }
 0x18b   : > { %2295 = vmatmul.bf16.gmra.mxu1 %v4843_v11  ;;  %2384 = vmatmul.bf16.gmra.mxu2 %v4846_v20  ;;  %v4580_v24 = vadd.f32 %v2244_v35, %v2156_v0  ;;  %v4853_v0 = vld [vmem:[#allocation26_spill] sm:$0xff] }
 0x18c   : > { %2473 = vmatmul.bf16.gmra.mxu3 %v4847_v16 }
 0x18d   : > { %2562 = vmatmul.bf16.gmra.mxu0 %v4848_v61 }
 0x18e   : > { %v2069_v2 = vpop.f32.mrf.mxu2 }
 0x18f   : > { %v2070_v32 = vadd.f32 %v2069_v2, %v1981_v4  ;;  %v2158_v9 = vpop.f32.mrf.mxu3  ;;  %v4854_v2 = vld [vmem:[#allocation42_spill] sm:$0xff] }
 0x190   : > { %v1982_v56 = vpop.f32.mrf.mxu1 }
 0x191   : > { %v2159_v23 = vadd.f32 %v2158_v9, %v2070_v32  ;;  %v1983_v40 = vadd.f32 %v1982_v56, %v4849_v58 }
 0x192   : > { %v2249_v43 = vpop.f32.mrf.mxu0 }
 0x193   : > { %v4585_v59 = vadd.f32 %v2247_v27, %v2159_v23 }
 0x196   : > { %v2071_v51 = vpop.f32.mrf.mxu2 }
 0x197   : > { %v2072_v11 = vadd.f32 %v2071_v51, %v1983_v40  ;;  %v2160_v42 = vpop.f32.mrf.mxu3  ;;  %v4855_v51 = vld [vmem:[#allocation25_spill] sm:$0xff] }
 0x198   : > { %v1985_v7 = vpop.f32.mrf.mxu1 }
 0x199   : > { %v2161_v50 = vadd.f32 %v2160_v42, %v2072_v11  ;;  %v1986_v35 = vadd.f32 %v1985_v7, %v4850_v39  ;;  %v4856_v7 = vld [vmem:[#allocation11_spill] sm:$0xff]  ;;  %v4857_v39 = vld [vmem:[#allocation28_spill] sm:$0xff] }
 0x19a   : > { %v2252_v28 = vpop.f32.mrf.mxu0 }
 0x19b   : > { %2300 = vmatmul.bf16.gmra.mxu1 %v4848_v61  ;;  %2389 = vmatmul.bf16.gmra.mxu2 %v4851_v53  ;;  %v4590_v47 = vadd.f32 %v2249_v43, %v2161_v50 }
 0x19c   : > { %2478 = vmatmul.bf16.gmra.mxu3 %v4852_v55 }
 0x19d   : > { %2567 = vmatmul.bf16.gmra.mxu0 %v4853_v0 }
 0x19e   : > { %v2074_v1 = vpop.f32.mrf.mxu2 }
 0x19f   : > { %v2075_v4 = vadd.f32 %v2074_v1, %v1986_v35  ;;  %v2163_v27 = vpop.f32.mrf.mxu3  ;;  %v4858_v35 = vld [vmem:[#allocation31_spill] sm:$0xff] }
 0x1a0   : > { %v1987_v20 = vpop.f32.mrf.mxu1 }
 0x1a1   : > { %v2164_v16 = vadd.f32 %v2163_v27, %v2075_v4  ;;  %v1988_v32 = vadd.f32 %v1987_v20, %v4854_v2  ;;  %v4859_v27 = vld [vmem:[#allocation27_spill] sm:$0xff] }
 0x1a2   : > { %v2254_v9 = vpop.f32.mrf.mxu0 }
 0x1a3   : > { %v4595_v56 = vadd.f32 %v2252_v28, %v2164_v16 }
 0x1a6   : > { %v2076_v23 = vpop.f32.mrf.mxu2 }
 0x1a7   : > { %v2077_v61 = vadd.f32 %v2076_v23, %v1988_v32  ;;  %v2165_v58 = vpop.f32.mrf.mxu3 }
 0x1a8   : > { %v1990_v40 = vpop.f32.mrf.mxu1 }
 0x1a9   : > { %v2166_v43 = vadd.f32 %v2165_v58, %v2077_v61  ;;  %v1991_v11 = vadd.f32 %v1990_v40, %v4855_v51  ;;  %v4860_v58 = vld [vmem:[#allocation29_spill] sm:$0xff]  ;;  %v4861_v51 = vld [vmem:[#allocation16_spill] sm:$0xff] }
 0x1aa   : > { %v2257_v42 = vpop.f32.mrf.mxu0 }
 0x1ab   : > { %2305 = vmatmul.bf16.gmra.mxu1 %v4853_v0  ;;  %2394 = vmatmul.bf16.gmra.mxu2 %v4856_v7  ;;  %v4600_v50 = vadd.f32 %v2254_v9, %v2166_v43  ;;  %v4862_v7 = vld [vmem:[#allocation33_spill] sm:$0xff] }
 0x1ac   : > { %2483 = vmatmul.bf16.gmra.mxu3 %v4857_v39  ;;  %v4863_v39 = vld [vmem:[#allocation37_spill] sm:$0xff] }
 0x1ad   : > { %2572 = vmatmul.bf16.gmra.mxu0 %v4858_v35 }
 0x1ae   : > { %v2079_v28 = vpop.f32.mrf.mxu2 }
 0x1af   : > { %v2080_v53 = vadd.f32 %v2079_v28, %v1991_v11  ;;  %v2168_v55 = vpop.f32.mrf.mxu3 }
 0x1b0   : > { %v1992_v1 = vpop.f32.mrf.mxu1 }
 0x1b1   : > { %v2169_v4 = vadd.f32 %v2168_v55, %v2080_v53  ;;  %v1993_v20 = vadd.f32 %v1992_v1, %v4859_v27 }
 0x1b2   : > { %v2259_v16 = vpop.f32.mrf.mxu0 }
 0x1b3   : > { %v4605_v2 = vadd.f32 %v2257_v42, %v2169_v4  ;;  %v4864_v4 = vld [vmem:[#allocation32_spill] sm:$0xff] }
 0x1b6   : > { %v2081_v32 = vpop.f32.mrf.mxu2 }
 0x1b7   : > { %v2082_v0 = vadd.f32 %v2081_v32, %v1993_v20  ;;  %v2170_v23 = vpop.f32.mrf.mxu3 }
 0x1b8   : > { %v1995_v61 = vpop.f32.mrf.mxu1 }
 0x1b9   : > { %v2171_v9 = vadd.f32 %v2170_v23, %v2082_v0  ;;  %v1996_v40 = vadd.f32 %v1995_v61, %v4860_v58 }
 0x1ba   : > { %v2262_v43 = vpop.f32.mrf.mxu0 }
 0x1bb   : > { %2310 = vmatmul.bf16.gmra.mxu1 %v4858_v35  ;;  %2399 = vmatmul.bf16.gmra.mxu2 %v4861_v51  ;;  %v4610_v11 = vadd.f32 %v2259_v16, %v2171_v9  ;;  %v4866_v9 = vld [vmem:[#allocation35_spill] sm:$0xff] }
 0x1bc   : > { %2488 = vmatmul.bf16.gmra.mxu3 %v4862_v7  ;;  %v4867_v7 = vld [vmem:[#allocation5_spill] sm:$0xff] }
 0x1bd   : > { %2577 = vmatmul.bf16.gmra.mxu0 %v4863_v39 }
 0x1be   : > { %v2084_v42 = vpop.f32.mrf.mxu2 }
 0x1bf   : > { %v2085_v28 = vadd.f32 %v2084_v42, %v1996_v40  ;;  %v2173_v53 = vpop.f32.mrf.mxu3  ;;  %v4869_v42 = vld [vmem:[#allocation39_spill] sm:$0xff] }
 0x1c0   : > { %v1997_v55 = vpop.f32.mrf.mxu1 }
 0x1c1   : > { %v2174_v1 = vadd.f32 %v2173_v53, %v2085_v28  ;;  %v1998_v27 = vadd.f32 %v1997_v55, %v4864_v4  ;;  %v4870_v28 = vld [vmem:[#allocation43_spill] sm:$0xff] }
 0x1c2   : > { %v2264_v20 = vpop.f32.mrf.mxu0 }
 0x1c3   : > { %v4615_v32 = vadd.f32 %v2262_v43, %v2174_v1 }
 0x1c5   : > { %4865 = vst [vmem:[#allocation14_spill] sm:$0xff] %v4615_v32  ;;  %v4873_v32 = vld [vmem:[#allocation7_spill] sm:$0xff] }
 0x1c6   : > { %v2086_v0 = vpop.f32.mrf.mxu2 }
 0x1c7   : > { %v2087_v35 = vadd.f32 %v2086_v0, %v1998_v27  ;;  %v2175_v23 = vpop.f32.mrf.mxu3  ;;  %v4871_v27 = vld [vmem:[#allocation38_spill] sm:$0xff] }
 0x1c8   : > { %v2000_v61 = vpop.f32.mrf.mxu1 }
 0x1c9   : > { %v2176_v16 = vadd.f32 %v2175_v23, %v2087_v35  ;;  %v2001_v58 = vadd.f32 %v2000_v61, %v4866_v9 }
 0x1ca   : > { %v2267_v51 = vpop.f32.mrf.mxu0 }
 0x1cb   : > { %2315 = vmatmul.bf16.gmra.mxu1 %v4863_v39  ;;  %2404 = vmatmul.bf16.gmra.mxu2 %v4867_v7  ;;  %v4620_v40 = vadd.f32 %v2264_v20, %v2176_v16  ;;  %v4872_v16 = vld [vmem:[#allocation41_spill] sm:$0xff] }
 0x1cc   : > { %2493 = vmatmul.bf16.gmra.mxu3 %v4869_v42 }
 0x1cd   : > { %4868 = vst [vmem:[#allocation2_spill] sm:$0xff] %v4620_v40  ;;  %2582 = vmatmul.bf16.gmra.mxu0 %v4870_v28 }
 0x1ce   : > { %v2089_v43 = vpop.f32.mrf.mxu2 }
 0x1cf   : > { %v2090_v53 = vadd.f32 %v2089_v43, %v2001_v58  ;;  %v2178_v55 = vpop.f32.mrf.mxu3 }
 0x1d0   : > { %v2002_v1 = vpop.f32.mrf.mxu1 }
 0x1d1   : > { %v2179_v4 = vadd.f32 %v2178_v55, %v2090_v53  ;;  %v2003_v0 = vadd.f32 %v2002_v1, %v4871_v27 }
 0x1d2   : > { %v2269_v35 = vpop.f32.mrf.mxu0 }
 0x1d3   : > { %v4625_v23 = vadd.f32 %v2267_v51, %v2179_v4  ;;  %v4874_v4 = vld [vmem:[#allocation44_spill] sm:$0xff] }
 0x1d6   : > { %v2091_v61 = vpop.f32.mrf.mxu2 }
 0x1d7   : > { %v2092_v39 = vadd.f32 %v2091_v61, %v2003_v0  ;;  %v2180_v9 = vpop.f32.mrf.mxu3 }
 0x1d8   : > { %v2005_v7 = vpop.f32.mrf.mxu1 }
 0x1d9   : > { %v2181_v20 = vadd.f32 %v2180_v9, %v2092_v39  ;;  %v2006_v40 = vadd.f32 %v2005_v7, %v4872_v16 }
 0x1da   : > { %v2272_v42 = vpop.f32.mrf.mxu0 }
 0x1db   : > { %2320 = vmatmul.bf16.gmra.mxu1 %v4870_v28  ;;  %2409 = vmatmul.bf16.gmra.mxu2 %v4873_v32  ;;  %v4630_v58 = vadd.f32 %v2269_v35, %v2181_v20 }
 0x1dc   : > { %2498 = vmatmul.bf16.gmra.mxu3 %v4280_v25  ;;  %v4875_v25 = vld [vmem:[#allocation12_spill] sm:$0xff] }
 0x1dd   : > { %2587 = vmatmul.bf16.gmra.mxu0 %v4321_v33 }
 0x1de   : > { %v2094_v51 = vpop.f32.mrf.mxu2 }
 0x1df   : > { %v2095_v43 = vadd.f32 %v2094_v51, %v2006_v40  ;;  %v2183_v53 = vpop.f32.mrf.mxu3  ;;  %v4876_v40 = vld [vmem:[#allocation45_spill] sm:$0xff] }
 0x1e0   : > { %v2007_v55 = vpop.f32.mrf.mxu1 }
 0x1e1   : > { %v2184_v1 = vadd.f32 %v2183_v53, %v2095_v43  ;;  %v2008_v27 = vadd.f32 %v2007_v55, %v4874_v4  ;;  %v4877_v4 = vld [vmem:[#allocation46_spill] sm:$0xff] }
 0x1e2   : > { %v2274_v0 = vpop.f32.mrf.mxu0 }
 0x1e3   : > { %v4635_v61 = vadd.f32 %v2272_v42, %v2184_v1 }
 0x1e6   : > { %v2096_v39 = vpop.f32.mrf.mxu2 }
 0x1e7   : > { %v2097_v28 = vadd.f32 %v2096_v39, %v2008_v27  ;;  %v2185_v9 = vpop.f32.mrf.mxu3 }
 0x1e8   : > { %v2286_v32 = vpop.f32.mrf.mxu1 }
 0x1e9   : > { %v2186_v35 = vadd.f32 %v2185_v9, %v2097_v28  ;;  %v2287_v16 = vadd.f32 %v2286_v32, %v4876_v40 }
 0x1ea   : > { %v2553_v7 = vpop.f32.mrf.mxu0 }
 0x1eb   : > { %2325 = vmatmul.bf16.gmra.mxu1 %v4321_v33  ;;  %2414 = vmatmul.bf16.gmra.mxu2 %v4875_v25  ;;  %v4639_v20 = vadd.f32 %v2274_v0, %v2186_v35 }
 0x1ec   : > { %2503 = vmatmul.bf16.gmra.mxu3 %v4324_v49 }
 0x1ed   : > { %2592 = vmatmul.bf16.gmra.mxu0 %v4354_v37 }
 0x1ee   : > { %v2375_v42 = vpop.f32.mrf.mxu2 }
 0x1ef   : > { %v2464_v51 = vpop.f32.mrf.mxu3  ;;  %v2376_v43 = vadd.f32 %v2375_v42, %v2287_v16 }
 0x1f0   : > { %v2288_v53 = vpop.f32.mrf.mxu1 }
 0x1f1   : > { %v2465_v1 = vadd.f32 %v2464_v51, %v2376_v43  ;;  %v2289_v27 = vadd.f32 %v2288_v53, %v4877_v4 }
 0x1f2   : > { %v2555_v55 = vpop.f32.mrf.mxu0 }
 0x1f3   : > { %v2554_v0 = vadd.f32 %v2553_v7, %v2465_v1 }
 0x1f5   : > { %v2734_v32 = vmul.f32 %v2554_v0, %v2554_v0 }
 0x1f6   : > { %v2377_v33 = vpop.f32.mrf.mxu2 }
 0x1f7   : > { %v2378_v39 = vadd.f32 %v2377_v33, %v2289_v27  ;;  %v2466_v28 = vpop.f32.mrf.mxu3 }
 0x1f8   : > { %v2291_v9 = vpop.f32.mrf.mxu1 }
 0x1f9   : > { %v2467_v35 = vadd.f32 %v2466_v28, %v2378_v39  ;;  %v2292_v42 = vadd.f32 %v2291_v9, %v4345_v62 }
 0x1fa   : > { %v2558_v49 = vpop.f32.mrf.mxu0 }
 0x1fb   : > { %v2556_v25 = vadd.f32 %v2555_v55, %v2467_v35  ;;  %2330 = vmatmul.bf16.gmra.mxu1 %v4354_v37  ;;  %2419 = vmatmul.bf16.gmra.mxu2 %v3922_v5 }
 0x1fc   : > { %2508 = vmatmul.bf16.gmra.mxu3 %v4357_v22 }
 0x1fd   : > { %2597 = vmatmul.bf16.gmra.mxu0 %v4400_v21  ;;  %v3299_v7 = vpack.c.bf16 %v2556_v25, %v2554_v0  ;;  %v2697_v40 = vadd.f32 %v2556_v25, %v2554_v0  ;;  %v2735_v16 = vmul.f32 %v2556_v25, %v2556_v25 }
 0x1fe   : > { %v2380_v51 = vpop.f32.mrf.mxu2 }
 0x1ff   : > { %3300 = vst [vmem:[%s4651_s12] sm:$0xff] %v3299_v7   ;;  %v2766_v37 = vadd.f32 %v2735_v16, %v2734_v32  ;;  %v2381_v5 = vadd.f32 %v2380_v51, %v2292_v42  ;;  %v2469_v43 = vpop.f32.mrf.mxu3 }
 0x200   : > { %v2293_v53 = vpop.f32.mrf.mxu1 }
 0x201   : > { %v2470_v55 = vadd.f32 %v2469_v43, %v2381_v5  ;;  %v2294_v22 = vadd.f32 %v2293_v53, %v4366_v29 }
 0x202   : > { %v2560_v1 = vpop.f32.mrf.mxu0 }
 0x203   : > { %v2559_v4 = vadd.f32 %v2558_v49, %v2470_v55 }
 0x205   : > { %v2698_v27 = vadd.f32 %v2697_v40, %v2559_v4  ;;  %v2736_v33 = vmul.f32 %v2559_v4, %v2559_v4 }
 0x206   : > { %v2382_v39 = vpop.f32.mrf.mxu2 }
 0x207   : > { %v2767_v28 = vadd.f32 %v2766_v37, %v2736_v33  ;;  %v2383_v0 = vadd.f32 %v2382_v39, %v2294_v22  ;;  %v2471_v35 = vpop.f32.mrf.mxu3 }
 0x208   : > { %v2296_v25 = vpop.f32.mrf.mxu1 }
 0x209   : > { %v2472_v62 = vadd.f32 %v2471_v35, %v2383_v0  ;;  %v2297_v40 = vadd.f32 %v2296_v25, %v4390_v48 }
 0x20a   : > { %v2563_v9 = vpop.f32.mrf.mxu0 }
 0x20b   : > { %v2561_v7 = vadd.f32 %v2560_v1, %v2472_v62  ;;  %2335 = vmatmul.bf16.gmra.mxu1 %v4400_v21  ;;  %2424 = vmatmul.bf16.gmra.mxu2 %v3614_v30 }
 0x20c   : > { %2513 = vmatmul.bf16.gmra.mxu3 %v4402_v52 }
 0x20d   : > { %2602 = vmatmul.bf16.gmra.mxu0 %v4431_v8  ;;  %v3304_v49 = vpack.c.bf16 %v2561_v7, %v2559_v4  ;;  %v2699_v32 = vadd.f32 %v2698_v27, %v2561_v7  ;;  %v2737_v29 = vmul.f32 %v2561_v7, %v2561_v7 }
 0x20e   : > { %v2385_v16 = vpop.f32.mrf.mxu2 }
 0x20f   : > { %3384 = vst [vmem:[%s4651_s12 + $0x8] sm:$0xff] %v3304_v49   ;;  %v2768_v42 = vadd.f32 %v2767_v28, %v2737_v29  ;;  %v2386_v51 = vadd.f32 %v2385_v16, %v2297_v40  ;;  %v2474_v37 = vpop.f32.mrf.mxu3 }
 0x210   : > { %v2298_v5 = vpop.f32.mrf.mxu1 }
 0x211   : > { %v2475_v43 = vadd.f32 %v2474_v37, %v2386_v51  ;;  %v2299_v52 = vadd.f32 %v2298_v5, %v4411_v15 }
 0x212   : > { %v2565_v53 = vpop.f32.mrf.mxu0 }
 0x213   : > { %v2564_v21 = vadd.f32 %v2563_v9, %v2475_v43 }
 0x215   : > { %v2700_v55 = vadd.f32 %v2699_v32, %v2564_v21  ;;  %v2738_v30 = vmul.f32 %v2564_v21, %v2564_v21 }
 0x216   : > { %v2387_v1 = vpop.f32.mrf.mxu2 }
 0x217   : > { %v2769_v33 = vadd.f32 %v2768_v42, %v2738_v30  ;;  %v2388_v4 = vadd.f32 %v2387_v1, %v2299_v52  ;;  %v2476_v27 = vpop.f32.mrf.mxu3  ;;  %v4878_v42 = vld [vmem:[#allocation10_spill] sm:$0xff]  ;;  %v4879_v30 = vld [vmem:[#allocation13_spill] sm:$0xff] }
 0x218   : > { %v2301_v22 = vpop.f32.mrf.mxu1 }
 0x219   : > { %v2477_v48 = vadd.f32 %v2476_v27, %v2388_v4  ;;  %v2302_v25 = vadd.f32 %v2301_v22, %v4423_v36  ;;  %v4880_v4 = vld [vmem:[#allocation9_spill] sm:$0xff] }
 0x21a   : > { %v2568_v39 = vpop.f32.mrf.mxu0 }
 0x21b   : > { %v2566_v0 = vadd.f32 %v2565_v53, %v2477_v48  ;;  %2340 = vmatmul.bf16.gmra.mxu1 %v4431_v8  ;;  %2429 = vmatmul.bf16.gmra.mxu2 %v4833_v44 }
 0x21c   : > { %2518 = vmatmul.bf16.gmra.mxu3 %v4434_v57 }
 0x21d   : > { %2607 = vmatmul.bf16.gmra.mxu0 %v4475_v54  ;;  %v3309_v28 = vpack.c.bf16 %v2566_v0, %v2564_v21  ;;  %v2701_v35 = vadd.f32 %v2700_v55, %v2566_v0  ;;  %v2739_v15 = vmul.f32 %v2566_v0, %v2566_v0 }
 0x21e   : > { %v2390_v62 = vpop.f32.mrf.mxu2 }
 0x21f   : > { %3385 = vst [vmem:[%s4651_s12 + $0x10] sm:$0xff] %v3309_v28   ;;  %v2770_v9 = vadd.f32 %v2769_v33, %v2739_v15  ;;  %v2391_v7 = vadd.f32 %v2390_v62, %v2302_v25  ;;  %v2479_v49 = vpop.f32.mrf.mxu3 }
 0x220   : > { %v2303_v32 = vpop.f32.mrf.mxu1 }
 0x221   : > { %v2480_v29 = vadd.f32 %v2479_v49, %v2391_v7  ;;  %v2304_v57 = vadd.f32 %v2303_v32, %v4878_v42 }
 0x222   : > { %v2570_v40 = vpop.f32.mrf.mxu0 }
 0x223   : > { %v2569_v8 = vadd.f32 %v2568_v39, %v2480_v29 }
 0x225   : > { %v2702_v16 = vadd.f32 %v2701_v35, %v2569_v8  ;;  %v2740_v44 = vmul.f32 %v2569_v8, %v2569_v8 }
 0x226   : > { %v2392_v51 = vpop.f32.mrf.mxu2 }
 0x227   : > { %v2771_v37 = vadd.f32 %v2770_v9, %v2740_v44  ;;  %v2393_v5 = vadd.f32 %v2392_v51, %v2304_v57  ;;  %v2481_v43 = vpop.f32.mrf.mxu3  ;;  %v4881_v9 = vld [vmem:[#allocation8_spill] sm:$0xff]  ;;  %v946_v44 = vrot.slane %v4511_v45, 2 }
 0x228   : > { %v2306_v53 = vpop.f32.mrf.mxu1 }
 0x229   : > { %v2482_v36 = vadd.f32 %v2481_v43, %v2393_v5  ;;  %v2307_v27 = vadd.f32 %v2306_v53, %v4880_v4 }
 0x22a   : > { %v2573_v21 = vpop.f32.mrf.mxu0 }
 0x22b   : > { %v2571_v55 = vadd.f32 %v2570_v40, %v2482_v36  ;;  %2345 = vmatmul.bf16.gmra.mxu1 %v4475_v54  ;;  %2434 = vmatmul.bf16.gmra.mxu2 %v4879_v30  ;;  %v943_v40 = vrot.slane %v4507_v14, 2 }
 0x22c   : > { %2523 = vmatmul.bf16.gmra.mxu3 %v4477_v31 }
 0x22d   : > { %2612 = vmatmul.bf16.gmra.mxu0 %v4514_v6  ;;  %v3314_v52 = vpack.c.bf16 %v2571_v55, %v2569_v8  ;;  %v2703_v1 = vadd.f32 %v2702_v16, %v2571_v55  ;;  %v2741_v33 = vmul.f32 %v2571_v55, %v2571_v55  ;;  %v944_v16 = vrot.slane %v4503_v34, 2 }
 0x22e   : > { %v2395_v22 = vpop.f32.mrf.mxu2 }
 0x22f   : > { %3386 = vst [vmem:[%s4651_s12 + $0x18] sm:$0xff] %v3314_v52   ;;  %v2772_v48 = vadd.f32 %v2771_v37, %v2741_v33  ;;  %v2396_v39 = vadd.f32 %v2395_v22, %v2307_v27  ;;  %v2484_v0 = vpop.f32.mrf.mxu3  ;;  %v945_v37 = vsel %vm789_vm3, %v943_v40, %v944_v16  ;;  %v947_v14 = vsel %vm789_vm3, %v944_v16, %v946_v44 }
 0x230   : > { %v2308_v28 = vpop.f32.mrf.mxu1  ;;  %v951_v30 = vpack.c.bf16 %v947_v14, %v947_v14 }
 0x231   : > { %v2485_v35 = vadd.f32 %v2484_v0, %v2396_v39  ;;  %v2309_v31 = vadd.f32 %v2308_v28, %v4881_v9 }
 0x232   : > { %v2575_v15 = vpop.f32.mrf.mxu0  ;;  %v1249_v4 = vunpack.c.l.b16 %v951_v30 }
 0x233   : > { %v2574_v54 = vadd.f32 %v2573_v21, %v2485_v35 }
 0x235   : > { %v2704_v25 = vadd.f32 %v2703_v1, %v2574_v54  ;;  %v2742_v62 = vmul.f32 %v2574_v54, %v2574_v54 }
 0x236   : > { %v2397_v7 = vpop.f32.mrf.mxu2 }
 0x237   : > { %v2773_v49 = vadd.f32 %v2772_v48, %v2742_v62  ;;  %v2398_v32 = vadd.f32 %v2397_v7, %v2309_v31  ;;  %v2486_v29 = vpop.f32.mrf.mxu3  ;;  %v4882_v48 = vld [vmem:[#allocation15_spill] sm:$0xff] }
 0x238   : > { %v2311_v8 = vpop.f32.mrf.mxu1 }
 0x239   : > { %v2487_v42 = vadd.f32 %v2486_v29, %v2398_v32  ;;  %v2312_v45 = vadd.f32 %v2311_v8, %v4501_v3 }
 0x23a   : > { %v2578_v57 = vpop.f32.mrf.mxu0 }
 0x23b   : > { %v2576_v51 = vadd.f32 %v2575_v15, %v2487_v42  ;;  %2350 = vmatmul.bf16.gmra.mxu1 %v4514_v6  ;;  %2439 = vmatmul.bf16.gmra.mxu2 %v4841_v46  ;;  %v950_v46 = vpack.c.bf16 %v945_v37, %v945_v37 }
 0x23c   : > { %2528 = vmatmul.bf16.gmra.mxu3 %v4516_v26 }
 0x23d   : > { %2617 = vmatmul.bf16.gmra.mxu0 %v4541_v63  ;;  %v3319_v5 = vpack.c.bf16 %v2576_v51, %v2574_v54  ;;  %v2705_v34 = vadd.f32 %v2704_v25, %v2576_v51  ;;  %v2743_v43 = vmul.f32 %v2576_v51, %v2576_v51  ;;  %v1248_v33 = vunpack.c.l.b16 %v950_v46 }
 0x23e   : > { %v2400_v53 = vpop.f32.mrf.mxu2 }
 0x23f   : > { %3387 = vst [vmem:[%s4651_s12 + $0x20] sm:$0xff] %v3319_v5   ;;  %v2774_v36 = vadd.f32 %v2773_v49, %v2743_v43  ;;  %v2401_v21 = vadd.f32 %v2400_v53, %v2312_v45  ;;  %v2489_v6 = vpop.f32.mrf.mxu3  ;;  %v1250_v54 = vpack.c.b16 %v1249_v4, %v1248_v33 }
 0x240   : > { %v2313_v55 = vpop.f32.mrf.mxu1 }
 0x241   : > { %v2490_v26 = vadd.f32 %v2489_v6, %v2401_v21  ;;  %v2314_v39 = vadd.f32 %v2313_v55, %v4882_v48  ;;  %v4884_v21 = vld [vmem:[#allocation18_spill] sm:$0xff]  ;;  %v4885_v6 = vld [vmem:[#allocation19_spill] sm:$0xff] }
 0x242   : > { %v2580_v52 = vpop.f32.mrf.mxu0 }
 0x243   : > { %v2579_v1 = vadd.f32 %v2578_v57, %v2490_v26 }
 0x245   : > { %v2706_v27 = vadd.f32 %v2705_v34, %v2579_v1  ;;  %v2744_v22 = vmul.f32 %v2579_v1, %v2579_v1 }
 0x246   : > { %v2402_v0 = vpop.f32.mrf.mxu2 }
 0x247   : > { %v2775_v28 = vadd.f32 %v2774_v36, %v2744_v22  ;;  %v2403_v3 = vadd.f32 %v2402_v0, %v2314_v39  ;;  %v2491_v35 = vpop.f32.mrf.mxu3  ;;  %v4883_v36 = vld [vmem:[#allocation3_spill] sm:$0xff] }
 0x248   : > { %v2316_v15 = vpop.f32.mrf.mxu1 }
 0x249   : > { %v2492_v25 = vadd.f32 %v2491_v35, %v2403_v3  ;;  %v2317_v32 = vadd.f32 %v2316_v15, %v4539_v38 }
 0x24a   : > { %v2583_v62 = vpop.f32.mrf.mxu0 }
 0x24b   : > { %v2581_v9 = vadd.f32 %v2580_v52, %v2492_v25  ;;  %2355 = vmatmul.bf16.gmra.mxu1 %v4541_v63  ;;  %2444 = vmatmul.bf16.gmra.mxu2 %v4543_v18 }
 0x24c   : > { %2533 = vmatmul.bf16.gmra.mxu3 %v4545_v60 }
 0x24d   : > { %2622 = vmatmul.bf16.gmra.mxu0 %v1250_v54  ;;  %v3324_v31 = vpack.c.bf16 %v2581_v9, %v2579_v1  ;;  %v2707_v7 = vadd.f32 %v2706_v27, %v2581_v9  ;;  %v2745_v49 = vmul.f32 %v2581_v9, %v2581_v9 }
 0x24e   : > { %v2405_v29 = vpop.f32.mrf.mxu2 }
 0x24f   : > { %3388 = vst [vmem:[%s4651_s12 + $0x28] sm:$0xff] %v3324_v31   ;;  %v2776_v40 = vadd.f32 %v2775_v28, %v2745_v49  ;;  %v2406_v8 = vadd.f32 %v2405_v29, %v2317_v32  ;;  %v2494_v16 = vpop.f32.mrf.mxu3 }
 0x250   : > { %v2318_v44 = vpop.f32.mrf.mxu1 }
 0x251   : > { %v2495_v42 = vadd.f32 %v2494_v16, %v2406_v8  ;;  %v2319_v18 = vadd.f32 %v2318_v44, %v4550_v13 }
 0x252   : > { %v2585_v57 = vpop.f32.mrf.mxu0 }
 0x253   : > { %v2584_v51 = vadd.f32 %v2583_v62, %v2495_v42 }
 0x255   : > { %v2708_v63 = vadd.f32 %v2707_v7, %v2584_v51  ;;  %v2746_v37 = vmul.f32 %v2584_v51, %v2584_v51 }
 0x256   : > { %v2407_v60 = vpop.f32.mrf.mxu2 }
 0x257   : > { %v2777_v14 = vadd.f32 %v2776_v40, %v2746_v37  ;;  %v2408_v5 = vadd.f32 %v2407_v60, %v2319_v18  ;;  %v2496_v34 = vpop.f32.mrf.mxu3 }
 0x258   : > { %v2321_v43 = vpop.f32.mrf.mxu1 }
 0x259   : > { %v2497_v38 = vadd.f32 %v2496_v34, %v2408_v5  ;;  %v2322_v13 = vadd.f32 %v2321_v43, %v4555_v41 }
 0x25a   : > { %v2588_v45 = vpop.f32.mrf.mxu0 }
 0x25b   : > { %v2586_v53 = vadd.f32 %v2585_v57, %v2497_v38  ;;  %2360 = vmatmul.bf16.gmra.mxu1 %v1250_v54  ;;  %2449 = vmatmul.bf16.gmra.mxu2 %v4883_v36 }
 0x25c   : > { %2538 = vmatmul.bf16.gmra.mxu3 %v4884_v21 }
 0x25d   : > { %2627 = vmatmul.bf16.gmra.mxu0 %v4885_v6  ;;  %v3329_v55 = vpack.c.bf16 %v2586_v53, %v2584_v51  ;;  %v2709_v46 = vadd.f32 %v2708_v63, %v2586_v53  ;;  %v2747_v30 = vmul.f32 %v2586_v53, %v2586_v53 }
 0x25e   : > { %v2410_v26 = vpop.f32.mrf.mxu2 }
 0x25f   : > { %3389 = vst [vmem:[%s4651_s12 + $0x30] sm:$0xff] %v3329_v55   ;;  %v2778_v52 = vadd.f32 %v2777_v14, %v2747_v30  ;;  %v2411_v1 = vadd.f32 %v2410_v26, %v2322_v13  ;;  %v2499_v33 = vpop.f32.mrf.mxu3 }
 0x260   : > { %v2323_v4 = vpop.f32.mrf.mxu1 }
 0x261   : > { %v2500_v27 = vadd.f32 %v2499_v33, %v2411_v1  ;;  %v2324_v28 = vadd.f32 %v2323_v4, %v4560_v17 }
 0x262   : > { %v2590_v22 = vpop.f32.mrf.mxu0 }
 0x263   : > { %v2589_v48 = vadd.f32 %v2588_v45, %v2500_v27 }
 0x265   : > { %v2710_v39 = vadd.f32 %v2709_v46, %v2589_v48  ;;  %v2748_v0 = vmul.f32 %v2589_v48, %v2589_v48 }
 0x266   : > { %v2412_v3 = vpop.f32.mrf.mxu2 }
 0x267   : > { %v2779_v35 = vadd.f32 %v2778_v52, %v2748_v0  ;;  %v2413_v15 = vadd.f32 %v2412_v3, %v2324_v28  ;;  %v2501_v54 = vpop.f32.mrf.mxu3 }
 0x268   : > { %v2326_v25 = vpop.f32.mrf.mxu1 }
 0x269   : > { %v2502_v41 = vadd.f32 %v2501_v54, %v2413_v15  ;;  %v2327_v32 = vadd.f32 %v2326_v25, %v4565_v12 }
 0x26a   : > { %v2593_v62 = vpop.f32.mrf.mxu0 }
 0x26b   : > { %v2591_v9 = vadd.f32 %v2590_v22, %v2502_v41 }
 0x26d   : > { %v3334_v31 = vpack.c.bf16 %v2591_v9, %v2589_v48  ;;  %v2711_v7 = vadd.f32 %v2710_v39, %v2591_v9  ;;  %v2749_v49 = vmul.f32 %v2591_v9, %v2591_v9 }
 0x26e   : > { %v2415_v29 = vpop.f32.mrf.mxu2 }
 0x26f   : > { %3390 = vst [vmem:[%s4651_s12 + $0x38] sm:$0xff] %v3334_v31   ;;  %v2780_v40 = vadd.f32 %v2779_v35, %v2749_v49  ;;  %v2416_v8 = vadd.f32 %v2415_v29, %v2327_v32  ;;  %v2504_v16 = vpop.f32.mrf.mxu3 }
 0x270   : > { %v2328_v44 = vpop.f32.mrf.mxu1 }
 0x271   : > { %v2505_v17 = vadd.f32 %v2504_v16, %v2416_v8  ;;  %v2329_v37 = vadd.f32 %v2328_v44, %v4570_v19 }
 0x272   : > { %v2595_v42 = vpop.f32.mrf.mxu0 }
 0x273   : > { %v2594_v57 = vadd.f32 %v2593_v62, %v2505_v17 }
 0x275   : > { %v2712_v51 = vadd.f32 %v2711_v7, %v2594_v57  ;;  %v2750_v63 = vmul.f32 %v2594_v57, %v2594_v57 }
 0x276   : > { %v2417_v18 = vpop.f32.mrf.mxu2 }
 0x277   : > { %v2781_v60 = vadd.f32 %v2780_v40, %v2750_v63  ;;  %v2418_v14 = vadd.f32 %v2417_v18, %v2329_v37  ;;  %v2506_v5 = vpop.f32.mrf.mxu3 }
 0x278   : > { %v2331_v34 = vpop.f32.mrf.mxu1 }
 0x279   : > { %v2507_v12 = vadd.f32 %v2506_v5, %v2418_v14  ;;  %v2332_v21 = vadd.f32 %v2331_v34, %v4575_v10 }
 0x27a   : > { %v2598_v43 = vpop.f32.mrf.mxu0 }
 0x27b   : > { %v2596_v38 = vadd.f32 %v2595_v42, %v2507_v12 }
 0x27d   : > { %v3339_v45 = vpack.c.bf16 %v2596_v38, %v2594_v57  ;;  %v2713_v53 = vadd.f32 %v2712_v51, %v2596_v38  ;;  %v2751_v36 = vmul.f32 %v2596_v38, %v2596_v38 }
 0x27e   : > { %v2420_v6 = vpop.f32.mrf.mxu2 }
 0x27f   : > { %3391 = vst [vmem:[%s4651_s12 + $0x40] sm:$0xff] %v3339_v45   ;;  %v2782_v55 = vadd.f32 %v2781_v60, %v2751_v36  ;;  %v2421_v46 = vadd.f32 %v2420_v6, %v2332_v21  ;;  %v2509_v30 = vpop.f32.mrf.mxu3 }
 0x280   : > { %v2333_v13 = vpop.f32.mrf.mxu1 }
 0x281   : > { %v2510_v19 = vadd.f32 %v2509_v30, %v2421_v46  ;;  %v2334_v4 = vadd.f32 %v2333_v13, %v4580_v24 }
 0x282   : > { %v2600_v26 = vpop.f32.mrf.mxu0 }
 0x283   : > { %v2599_v52 = vadd.f32 %v2598_v43, %v2510_v19 }
 0x285   : > { %v2714_v1 = vadd.f32 %v2713_v53, %v2599_v52  ;;  %v2752_v33 = vmul.f32 %v2599_v52, %v2599_v52 }
 0x286   : > { %v2422_v27 = vpop.f32.mrf.mxu2 }
 0x287   : > { %v2783_v22 = vadd.f32 %v2782_v55, %v2752_v33  ;;  %v2423_v48 = vadd.f32 %v2422_v27, %v2334_v4  ;;  %v2511_v39 = vpop.f32.mrf.mxu3 }
 0x288   : > { %v2336_v0 = vpop.f32.mrf.mxu1 }
 0x289   : > { %v2512_v10 = vadd.f32 %v2511_v39, %v2423_v48  ;;  %v2337_v25 = vadd.f32 %v2336_v0, %v4585_v59 }
 0x28a   : > { %v2603_v28 = vpop.f32.mrf.mxu0 }
 0x28b   : > { %v2601_v3 = vadd.f32 %v2600_v26, %v2512_v10 }
 0x28d   : > { %v3344_v35 = vpack.c.bf16 %v2601_v3, %v2599_v52  ;;  %v2715_v15 = vadd.f32 %v2714_v1, %v2601_v3  ;;  %v2753_v54 = vmul.f32 %v2601_v3, %v2601_v3 }
 0x28e   : > { %v2425_v41 = vpop.f32.mrf.mxu2 }
 0x28f   : > { %3392 = vst [vmem:[%s4651_s12 + $0x48] sm:$0xff] %v3344_v35   ;;  %v2784_v62 = vadd.f32 %v2783_v22, %v2753_v54  ;;  %v2426_v9 = vadd.f32 %v2425_v41, %v2337_v25  ;;  %v2514_v31 = vpop.f32.mrf.mxu3 }
 0x290   : > { %v2338_v7 = vpop.f32.mrf.mxu1 }
 0x291   : > { %v2515_v24 = vadd.f32 %v2514_v31, %v2426_v9  ;;  %v2339_v8 = vadd.f32 %v2338_v7, %v4590_v47 }
 0x292   : > { %v2605_v49 = vpop.f32.mrf.mxu0 }
 0x293   : > { %v2604_v32 = vadd.f32 %v2603_v28, %v2515_v24 }
 0x295   : > { %v2716_v29 = vadd.f32 %v2715_v15, %v2604_v32  ;;  %v2754_v40 = vmul.f32 %v2604_v32, %v2604_v32 }
 0x296   : > { %v2427_v16 = vpop.f32.mrf.mxu2 }
 0x297   : > { %v2785_v44 = vadd.f32 %v2784_v62, %v2754_v40  ;;  %v2428_v17 = vadd.f32 %v2427_v16, %v2339_v8  ;;  %v2516_v42 = vpop.f32.mrf.mxu3  ;;  %v4886_v40 = vld [vmem:[#allocation14_spill] sm:$0xff] }
 0x298   : > { %v2341_v57 = vpop.f32.mrf.mxu1 }
 0x299   : > { %v2517_v59 = vadd.f32 %v2516_v42, %v2428_v17  ;;  %v2342_v14 = vadd.f32 %v2341_v57, %v4595_v56 }
 0x29a   : > { %v2608_v51 = vpop.f32.mrf.mxu0 }
 0x29b   : > { %v2606_v63 = vadd.f32 %v2605_v49, %v2517_v59 }
 0x29d   : > { %v3349_v37 = vpack.c.bf16 %v2606_v63, %v2604_v32  ;;  %v2717_v18 = vadd.f32 %v2716_v29, %v2606_v63  ;;  %v2755_v60 = vmul.f32 %v2606_v63, %v2606_v63 }
 0x29e   : > { %v2430_v5 = vpop.f32.mrf.mxu2 }
 0x29f   : > { %3393 = vst [vmem:[%s4651_s12 + $0x50] sm:$0xff] %v3349_v37   ;;  %v2786_v34 = vadd.f32 %v2785_v44, %v2755_v60  ;;  %v2431_v12 = vadd.f32 %v2430_v5, %v2342_v14  ;;  %v2519_v43 = vpop.f32.mrf.mxu3 }
 0x2a0   : > { %v2343_v38 = vpop.f32.mrf.mxu1 }
 0x2a1   : > { %v2520_v47 = vadd.f32 %v2519_v43, %v2431_v12  ;;  %v2344_v6 = vadd.f32 %v2343_v38, %v4600_v50 }
 0x2a2   : > { %v2610_v45 = vpop.f32.mrf.mxu0 }
 0x2a3   : > { %v2609_v53 = vadd.f32 %v2608_v51, %v2520_v47 }
 0x2a5   : > { %v2718_v36 = vadd.f32 %v2717_v18, %v2609_v53  ;;  %v2756_v21 = vmul.f32 %v2609_v53, %v2609_v53  ;;  %v4887_v18 = vld [vmem:[#allocation2_spill] sm:$0xff] }
 0x2a6   : > { %v2432_v55 = vpop.f32.mrf.mxu2 }
 0x2a7   : > { %v2787_v46 = vadd.f32 %v2786_v34, %v2756_v21  ;;  %v2433_v30 = vadd.f32 %v2432_v55, %v2344_v6  ;;  %v2521_v13 = vpop.f32.mrf.mxu3 }
 0x2a8   : > { %v2346_v19 = vpop.f32.mrf.mxu1 }
 0x2a9   : > { %v2522_v56 = vadd.f32 %v2521_v13, %v2433_v30  ;;  %v2347_v27 = vadd.f32 %v2346_v19, %v4605_v2 }
 0x2aa   : > { %v2613_v26 = vpop.f32.mrf.mxu0 }
 0x2ab   : > { %v2611_v52 = vadd.f32 %v2610_v45, %v2522_v56 }
 0x2ad   : > { %v3354_v1 = vpack.c.bf16 %v2611_v52, %v2609_v53  ;;  %v2719_v33 = vadd.f32 %v2718_v36, %v2611_v52  ;;  %v2757_v4 = vmul.f32 %v2611_v52, %v2611_v52 }
 0x2ae   : > { %v2435_v22 = vpop.f32.mrf.mxu2 }
 0x2af   : > { %3394 = vst [vmem:[%s4651_s12 + $0x58] sm:$0xff] %v3354_v1   ;;  %v2788_v48 = vadd.f32 %v2787_v46, %v2757_v4  ;;  %v2436_v39 = vadd.f32 %v2435_v22, %v2347_v27  ;;  %v2524_v0 = vpop.f32.mrf.mxu3 }
 0x2b0   : > { %v2348_v10 = vpop.f32.mrf.mxu1 }
 0x2b1   : > { %v2525_v50 = vadd.f32 %v2524_v0, %v2436_v39  ;;  %v2349_v54 = vadd.f32 %v2348_v10, %v4610_v11 }
 0x2b2   : > { %v2615_v28 = vpop.f32.mrf.mxu0 }
 0x2b3   : > { %v2614_v3 = vadd.f32 %v2613_v26, %v2525_v50 }
 0x2b5   : > { %v2720_v35 = vadd.f32 %v2719_v33, %v2614_v3  ;;  %v2758_v15 = vmul.f32 %v2614_v3, %v2614_v3 }
 0x2b6   : > { %v2437_v25 = vpop.f32.mrf.mxu2 }
 0x2b7   : > { %v2789_v41 = vadd.f32 %v2788_v48, %v2758_v15  ;;  %v2438_v62 = vadd.f32 %v2437_v25, %v2349_v54  ;;  %v2526_v9 = vpop.f32.mrf.mxu3 }
 0x2b8   : > { %v2351_v31 = vpop.f32.mrf.mxu1 }
 0x2b9   : > { %v2527_v2 = vadd.f32 %v2526_v9, %v2438_v62  ;;  %v2352_v8 = vadd.f32 %v2351_v31, %v4886_v40 }
 0x2ba   : > { %v2618_v7 = vpop.f32.mrf.mxu0 }
 0x2bb   : > { %v2616_v24 = vadd.f32 %v2615_v28, %v2527_v2 }
 0x2bd   : > { %v3359_v49 = vpack.c.bf16 %v2616_v24, %v2614_v3  ;;  %v2721_v32 = vadd.f32 %v2720_v35, %v2616_v24  ;;  %v2759_v29 = vmul.f32 %v2616_v24, %v2616_v24 }
 0x2be   : > { %v2440_v16 = vpop.f32.mrf.mxu2 }
 0x2bf   : > { %3395 = vst [vmem:[%s4651_s12 + $0x60] sm:$0xff] %v3359_v49   ;;  %v2790_v44 = vadd.f32 %v2789_v41, %v2759_v29  ;;  %v2441_v17 = vadd.f32 %v2440_v16, %v2352_v8  ;;  %v2529_v42 = vpop.f32.mrf.mxu3 }
 0x2c0   : > { %v2353_v57 = vpop.f32.mrf.mxu1 }
 0x2c1   : > { %v2530_v11 = vadd.f32 %v2529_v42, %v2441_v17  ;;  %v2354_v60 = vadd.f32 %v2353_v57, %v4887_v18 }
 0x2c2   : > { %v2620_v59 = vpop.f32.mrf.mxu0 }
 0x2c3   : > { %v2619_v51 = vadd.f32 %v2618_v7, %v2530_v11 }
 0x2c5   : > { %v2722_v63 = vadd.f32 %v2721_v32, %v2619_v51  ;;  %v2760_v37 = vmul.f32 %v2619_v51, %v2619_v51 }
 0x2c6   : > { %v2442_v14 = vpop.f32.mrf.mxu2 }
 0x2c7   : > { %v2791_v5 = vadd.f32 %v2790_v44, %v2760_v37  ;;  %v2443_v34 = vadd.f32 %v2442_v14, %v2354_v60  ;;  %v2531_v12 = vpop.f32.mrf.mxu3 }
 0x2c8   : > { %v2356_v43 = vpop.f32.mrf.mxu1 }
 0x2c9   : > { %v2532_v38 = vadd.f32 %v2531_v12, %v2443_v34  ;;  %v2357_v6 = vadd.f32 %v2356_v43, %v4625_v23 }
 0x2ca   : > { %v2623_v45 = vpop.f32.mrf.mxu0 }
 0x2cb   : > { %v2621_v47 = vadd.f32 %v2620_v59, %v2532_v38 }
 0x2cd   : > { %v3364_v53 = vpack.c.bf16 %v2621_v47, %v2619_v51  ;;  %v2723_v36 = vadd.f32 %v2722_v63, %v2621_v47  ;;  %v2761_v21 = vmul.f32 %v2621_v47, %v2621_v47 }
 0x2ce   : > { %v2445_v55 = vpop.f32.mrf.mxu2 }
 0x2cf   : > { %3396 = vst [vmem:[%s4651_s12 + $0x68] sm:$0xff] %v3364_v53   ;;  %v2792_v46 = vadd.f32 %v2791_v5, %v2761_v21  ;;  %v2446_v30 = vadd.f32 %v2445_v55, %v2357_v6  ;;  %v2534_v13 = vpop.f32.mrf.mxu3 }
 0x2d0   : > { %v2358_v19 = vpop.f32.mrf.mxu1 }
 0x2d1   : > { %v2535_v56 = vadd.f32 %v2534_v13, %v2446_v30  ;;  %v2359_v33 = vadd.f32 %v2358_v19, %v4630_v58 }
 0x2d2   : > { %v2625_v4 = vpop.f32.mrf.mxu0 }
 0x2d3   : > { %v2624_v26 = vadd.f32 %v2623_v45, %v2535_v56 }
 0x2d5   : > { %v2724_v52 = vadd.f32 %v2723_v36, %v2624_v26  ;;  %v2762_v1 = vmul.f32 %v2624_v26, %v2624_v26 }
 0x2d6   : > { %v2447_v27 = vpop.f32.mrf.mxu2 }
 0x2d7   : > { %v2793_v22 = vadd.f32 %v2792_v46, %v2762_v1  ;;  %v2448_v48 = vadd.f32 %v2447_v27, %v2359_v33  ;;  %v2536_v39 = vpop.f32.mrf.mxu3 }
 0x2d8   : > { %v2361_v0 = vpop.f32.mrf.mxu1 }
 0x2d9   : > { %v2537_v23 = vadd.f32 %v2536_v39, %v2448_v48  ;;  %v2362_v35 = vadd.f32 %v2361_v0, %v4635_v61 }
 0x2da   : > { %v2628_v62 = vpop.f32.mrf.mxu0 }
 0x2db   : > { %v2626_v10 = vadd.f32 %v2625_v4, %v2537_v23 }
 0x2dd   : > { %v3369_v50 = vpack.c.bf16 %v2626_v10, %v2624_v26  ;;  %v2725_v28 = vadd.f32 %v2724_v52, %v2626_v10  ;;  %v2763_v3 = vmul.f32 %v2626_v10, %v2626_v10 }
 0x2de   : > { %v2450_v15 = vpop.f32.mrf.mxu2 }
 0x2df   : > { %3397 = vst [vmem:[%s4651_s12 + $0x70] sm:$0xff] %v3369_v50   ;;  %v2794_v54 = vadd.f32 %v2793_v22, %v2763_v3  ;;  %v2451_v25 = vadd.f32 %v2450_v15, %v2362_v35  ;;  %v2539_v41 = vpop.f32.mrf.mxu3 }
 0x2e0   : > { %v2363_v9 = vpop.f32.mrf.mxu1 }
 0x2e1   : > { %v2540_v58 = vadd.f32 %v2539_v41, %v2451_v25  ;;  %v2364_v24 = vadd.f32 %v2363_v9, %v4639_v20 }
 0x2e2   : > { %v2630_v61 = vpop.f32.mrf.mxu0 }
 0x2e3   : > { %v2629_v31 = vadd.f32 %v2628_v62, %v2540_v58 }
 0x2e5   : > { %v2726_v2 = vadd.f32 %v2725_v28, %v2629_v31  ;;  %v2764_v7 = vmul.f32 %v2629_v31, %v2629_v31 }
 0x2e6   : > { %v2452_v49 = vpop.f32.mrf.mxu2 }
 0x2e7   : > { %v2795_v32 = vadd.f32 %v2794_v54, %v2764_v7  ;;  %v2453_v29 = vadd.f32 %v2452_v49, %v2364_v24  ;;  %v2541_v40 = vpop.f32.mrf.mxu3 }
 0x2e9   : > { %v2542_v8 = vadd.f32 %v2541_v40, %v2453_v29 }
 0x2eb   : > { %v2631_v16 = vadd.f32 %v2630_v61, %v2542_v8 }
 0x2ed   : > { %v3374_v44 = vpack.c.bf16 %v2631_v16, %v2629_v31  ;;  %v2727_v17 = vadd.f32 %v2726_v2, %v2631_v16  ;;  %v2765_v42 = vmul.f32 %v2631_v16, %v2631_v16 }
 0x2ef   : > { %3398 = vst [vmem:[%s4651_s12 + $0x78] sm:$0xff] %v3374_v44   ;;  %v2728_v57 = vrot.slane %v2727_v17, 4  ;;  %v2796_v11 = vadd.f32 %v2795_v32, %v2765_v42 }
 0x2f1   : > { %v2729_v59 = vadd.f32 %v2728_v57, %v2727_v17  ;;  %v2797_v51 = vrot.slane %v2796_v11, 4 }
 0x2f3   : > { %v2730_v63 = vrot.slane %v2729_v59, 2  ;;  %v2798_v37 = vadd.f32 %v2797_v51, %v2796_v11 }
 0x2f5   : > { %v2731_v18 = vadd.f32 %v2730_v63, %v2729_v59  ;;  %v2799_v20 = vrot.slane %v2798_v37, 2 }
 0x2f7   : > { %v2732_v60 = vrot.slane %v2731_v18, 1  ;;  %v2800_v14 = vadd.f32 %v2799_v20, %v2798_v37 }
 0x2f9   : > { %v2801_v5 = vrot.slane %v2800_v14, 1  ;;  %v2733_v34 = vadd.f32 %v2732_v60, %v2731_v18 }
 0x2fb   : > { %v2802_v12 = vadd.f32 %v2801_v5, %v2800_v14 }
 0x2fd   : > { %v2804_v43 = vsel %vm2803_vm4, %v2733_v34, %v2802_v12 }
 0x2fe   : > { %2805 = vst [vmem:[%s262_s16] sm:$0x3] %v2804_v43 }
 0x2ff PF: > { %s17_s21 = sadd.s32 1, %s3445_s21  }
 0x300   : > { %p14_p4 = scmp.ge.s32.totalorder %s17_s21, 4  }
 0x302   :  { %16 = sbr.rel (!%p14_p4) target bundleno = 1 (0x1), region = 82 }

// kernel: double_conv_forward.3
= control target key start
LH: loop header
LB: loop body
LE: loop exit
PB: predicated region body
PF: predicated region fallthrough
CT: control target
= control target key end

     0   :  { %s3163_s15 = smov 0   ;;  %s4147_s0 = inlined_call_operand.vmem [shape: f32[2,18,18,4], index: 0, kind: input, shape index: {}]   ;;  %s4148_s1 = inlined_call_operand.vmem [shape: bf16[9,4,128], index: 1, kind: input, shape index: {}]   ;;  %s4149_s2 = inlined_call_operand.vmem [shape: f32[1,128], index: 2, kind: input, shape index: {}]   ;;  %s4150_s3 = inlined_call_operand.vmem [shape: bf16[2,16,16,128], index: 3, kind: output, shape index: {0}]   ;;  %s4151_s4 = inlined_call_operand.vmem [shape: f32[2,2,128], index: 4, kind: output, shape index: {1}]  }
   0x1 LB: > { %s2858_s16 = sadd.s32 4294967295, %s3136_s15   ;;  %p2862_p0 = scmp.ge.s32.totalorder %s3136_s15, 1  ;;  %s3136_s15 = sphi %s3163_s15, %s15_s15  }
   0x2   : > { %p165_p1 = scmp.lt.s32.totalorder %s3136_s15, 3 }
   0x4   : > { %p166_p2 = pnand %p2862_p0, %p165_p1 }
   0x6   : > { %169 = sbr.rel (%p166_p2) target bundleno = 747 (0x2eb), region = 32 }
   0xb   : > { %v344_v0 = vld [vmem:[%s4148_s1] sm:$0x3]  ;;  %vm394_vm0 = vcmask 1041408   ;;  %p195_p3 = scmp.lt.s32.totalorder %s2858_s16, 1  ;;  %v2900_v2 = vld [vmem:[%s4148_s1 + $0x4] sm:$0x3] }
   0xc   : > { %v396_v1 = vsel %vm394_vm0, %v344_v0, 0  ;;  %v2917_v3 = vld [vmem:[%s4148_s1 + $0x6] sm:$0x3]  ;;  %v1178_v4 = vsel %vm394_vm0, %v2900_v2, 0  ;;  %v2883_v6 = vld [vmem:[%s4148_s1 + $0x2] sm:$0x3] }
   0xd   : > { %3117 = vmatpush.bf16.msra.mxu1 %v396_v1  ;;  %3118 = vmatpush.bf16.msra.mxu2 %v396_v1  ;;  %s4254_s16 = smov (!%p195_p3, %s2858_s16), 1  ;;  %v1372_v5 = vsel %vm394_vm0, %v2917_v3, 0  ;;  %v811_v7 = vsel %vm394_vm0, %v2883_v6, 0  ;;  %v2934_v8 = vld [vmem:[%s4148_s1 + $0x8] sm:$0x3]  ;;  %vm345_vm1 = vcmask 31744  }
   0xe   : > { %3119 = vmatpush.bf16.msra.mxu3 %v396_v1  ;;  %405 = vmatpush.bf16.msra.mxu0 %v396_v1  ;;  %s3120_s27 = smul.u32 432, %s4254_s16  ;;  %v1576_v9 = vsel %vm394_vm0, %v2934_v8, 0  ;;  %v2968_v46 = vld [vmem:[%s4148_s1 + $0xc] sm:$0x3]  ;;  %v2985_v48 = vld [vmem:[%s4148_s1 + $0xe] sm:$0x3] }
   0xf   : > { %v1971_v47 = vsel %vm394_vm0, %v2968_v46, 0  ;;  %v2951_v49 = vld [vmem:[%s4148_s1 + $0xa] sm:$0x3]  ;;  %v2175_v50 = vsel %vm394_vm0, %v2985_v48, 0  ;;  %v3002_v52 = vld [vmem:[%s4148_s1 + $0x10] sm:$0x3] }
  0x10   : > { %s3197_s30 = scalar_lea.vmem %s4147_s0, %s3120_s27  ;;  %v1777_v51 = vsel %vm394_vm0, %v2951_v49, 0  ;;  %v2376_v53 = vsel %vm394_vm0, %v3002_v52, 0  ;;  %vm599_vm2 = vcmask 1046528   ;;  %vm966_vm3 = vcmask 1045504   ;;  %s3021_s17 = sshll.u32 %s4254_s16, 7 }
  0x11   : > { %1187 = vmatpush.bf16.msrb.mxu2 %v1178_v4  ;;  %820 = vmatpush.bf16.msrb.mxu1 %v811_v7  ;;  %v3200_v10 = vld [vmem:[%s3197_s30 + $0x60] sm:$0xff]  ;;  %v3203_v11 = vld [vmem:[%s3197_s30 + $0x68] sm:$0xff]  ;;  %v3245_v22 = vld [vmem:[%s3197_s30 + $0x78] sm:$0xff]  ;;  %s4004_s20 = scalar_lea.vmem %s4150_s3, %s3021_s17  ;;  %s2866_s21 = sshll.u32 %s4254_s16, 1  ;;  %vm2769_vm4 = vcmask 1040384  }
  0x12   : > { %1381 = vmatpush.bf16.msrb.mxu3 %v1372_v5  ;;  %1585 = vmatpush.bf16.msrb.mxu0 %v1576_v9  ;;  %v3206_v12 = vld [vmem:[%s3197_s30 + $0xc0] sm:$0xff]  ;;  %v3210_v13 = vpack.c.bf16 %v3203_v11, %v3200_v10  ;;  %v3213_v14 = vld [vmem:[%s3197_s30 + $0xc8] sm:$0xff]  ;;  %v3251_v24 = vld [vmem:[%s3197_s30 + $0xd8] sm:$0xff]  ;;  %s208_s24 = scalar_lea.vmem %s4151_s4, %s2866_s21 }
  0x13   : > { %v3216_v15 = vld [vmem:[%s3197_s30 + $0x120] sm:$0xff]  ;;  %v3219_v16 = vld [vmem:[%s3197_s30 + $0x128] sm:$0xff]  ;;  %v3223_v17 = vpack.c.bf16 %v3213_v14, %v3206_v12  ;;  %v3257_v26 = vld [vmem:[%s3197_s30 + $0x138] sm:$0xff] }
  0x14   : > { %4175 = vst [vmem:[#allocation3_spill] sm:$0xff] %v3210_v13  ;;  %v3226_v18 = vld [vmem:[%s3197_s30] sm:$0xff]  ;;  %v3229_v19 = vld [vmem:[%s3197_s30 + $0x8] sm:$0xff]  ;;  %2871 = vmatmul.msk.bf16.vlgmr.msra.gmra.mxu1 %vm345_vm1, %v3210_v13  ;;  %v3235_v20 = vpack.c.bf16 %v3219_v16, %v3216_v15  ;;  %v3267_v29 = vld [vmem:[%s3197_s30 + $0x18] sm:$0xff] }
  0x15   : > { %4176 = vst [vmem:[#allocation4_spill] sm:$0xff] %v3223_v17  ;;  %2875 = vmatmul.msk.bf16.vlgmr.msra.gmra.mxu2 %vm345_vm1, %v3223_v17  ;;  %v328_v21 = vpack.c.bf16 %v3229_v19, %v3226_v18  ;;  %v3248_v23 = vld [vmem:[%s3197_s30 + $0x80] sm:$0xff]  ;;  %v3293_v34 = vld [vmem:[%s3197_s30 + $0x90] sm:$0xff]  ;;  %v3296_v35 = vld [vmem:[%s3197_s30 + $0x98] sm:$0xff]  ;;  %1786 = vmatpush.bf16.msra.mxu1 %v1777_v51  ;;  %v600_v3 = vrot.slane %v3226_v18, 1  ;;  %v601_v4 = vrot.slane %v3229_v19, 1 }
  0x16   : > { %2879 = vmatmul.msk.bf16.vlgmr.msra.gmra.mxu3 %vm345_vm1, %v3235_v20  ;;  %v3254_v25 = vld [vmem:[%s3197_s30 + $0xe0] sm:$0xff]  ;;  %v3264_v28 = vpack.c.bf16 %v3248_v23, %v3245_v22  ;;  %v3299_v36 = vld [vmem:[%s3197_s30 + $0xf0] sm:$0xff]  ;;  %v3302_v37 = vld [vmem:[%s3197_s30 + $0xf8] sm:$0xff]  ;;  %v3312_v40 = vpack.c.bf16 %v3296_v35, %v3293_v34  ;;  %1980 = vmatpush.bf16.msra.mxu2 %v1971_v47  ;;  %v967_v7 = vrot.slane %v3226_v18, 2  ;;  %v968_v8 = vrot.slane %v3229_v19, 2 }
  0x17   : > { %2867 = vmatmul.msk.bf16.vlgmr.msra.gmra.mxu0 %vm345_vm1, %v328_v21  ;;  %v3260_v27 = vld [vmem:[%s3197_s30 + $0x140] sm:$0xff]  ;;  %v3274_v31 = vpack.c.bf16 %v3254_v25, %v3251_v24  ;;  %v3305_v38 = vld [vmem:[%s3197_s30 + $0x150] sm:$0xff]  ;;  %v3308_v39 = vld [vmem:[%s3197_s30 + $0x158] sm:$0xff]  ;;  %v3322_v43 = vpack.c.bf16 %v3302_v37, %v3299_v36  ;;  %2184 = vmatpush.bf16.msra.mxu3 %v2175_v50  ;;  %v605_v21 = vrot.slane %v3267_v29, 1  ;;  %v602_v48 = vsel %vm599_vm2, %v600_v3, %v601_v4 }
  0x18   : > { %4177 = vst [vmem:[#allocation5_spill] sm:$0xff] %v3264_v28  ;;  %v3270_v30 = vld [vmem:[%s3197_s30 + $0x20] sm:$0xff]  ;;  %v3278_v32 = vpack.c.bf16 %v3260_v27, %v3257_v26  ;;  %v3315_v41 = vld [vmem:[%s3197_s30 + $0x30] sm:$0xff]  ;;  %v3318_v42 = vld [vmem:[%s3197_s30 + $0x38] sm:$0xff]  ;;  %v3326_v44 = vpack.c.bf16 %v3308_v39, %v3305_v38  ;;  %2385 = vmatpush.bf16.msra.mxu0 %v2376_v53  ;;  %v969_v50 = vsel %vm966_vm3, %v967_v7, %v968_v8 }
  0x19   : > { %4178 = vst [vmem:[#allocation6_spill] sm:$0xff] %v3274_v31  ;;  %v3282_v33 = vpack.c.bf16 %v3270_v30, %v3267_v29  ;;  %v3330_v45 = vpack.c.bf16 %v3318_v42, %v3315_v41  ;;  %v3357_v54 = vld [vmem:[%s3197_s30 + $0xa8] sm:$0xff]  ;;  %v3360_v55 = vld [vmem:[%s3197_s30 + $0xb0] sm:$0xff]  ;;  %v606_v46 = vrot.slane %v3270_v30, 1  ;;  %v218_v3 = vld [vmem:[%s3197_s30 + $0x40] sm:$0x3] }
  0x1a   : > { %4179 = vst [vmem:[#allocation7_spill] sm:$0xff] %v3312_v40  ;;  %v3363_v56 = vld [vmem:[%s3197_s30 + $0x108] sm:$0xff]  ;;  %v3366_v57 = vld [vmem:[%s3197_s30 + $0x110] sm:$0xff]  ;;  %v3376_v60 = vpack.c.bf16 %v3360_v55, %v3357_v54 }
  0x1b   : > { %v3369_v58 = vld [vmem:[%s3197_s30 + $0x168] sm:$0xff]  ;;  %v3372_v59 = vld [vmem:[%s3197_s30 + $0x170] sm:$0xff]  ;;  %v3386_v63 = vpack.c.bf16 %v3366_v57, %v3363_v56  ;;  %v607_v19 = vsel %vm599_vm2, %v605_v21, %v606_v46  ;;  %v613_v21 = vrot.slane %v218_v3, 1 }
  0x1c   : > { %4180 = vst [vmem:[#allocation8_spill] sm:$0xff] %v3376_v60  ;;  %v3379_v61 = vld [vmem:[%s3197_s30 + $0x48] sm:$0xff]  ;;  %v3382_v62 = vld [vmem:[%s3197_s30 + $0x50] sm:$0xff]  ;;  %v3390_v0 = vpack.c.bf16 %v3372_v59, %v3369_v58 }
  0x1d   : > { %v3394_v1 = vpack.c.bf16 %v3382_v62, %v3379_v61  ;;  %v212_v2 = vld [vmem:[%s3197_s30 + $0x10] sm:$0x3]  ;;  %v215_v6 = vld [vmem:[%s3197_s30 + $0x28] sm:$0x3] }
  0x1e   : > { %v603_v5 = vrot.slane %v212_v2, 1  ;;  %v970_v9 = vrot.slane %v212_v2, 2  ;;  %v608_v47 = vrot.slane %v215_v6, 1  ;;  %v975_v7 = vrot.slane %v215_v6, 2  ;;  %v224_v6 = vld [vmem:[%s3197_s30 + $0x70] sm:$0x3] }
  0x20   : > { %v604_v49 = vsel %vm599_vm2, %v601_v4, %v603_v5  ;;  %v971_v51 = vsel %vm966_vm3, %v968_v8, %v970_v9  ;;  %v609_v52 = vsel %vm599_vm2, %v606_v46, %v608_v47  ;;  %v972_v4 = vrot.slane %v3267_v29, 2 }
  0x21   : > { %v744_v18 = vpack.c.bf16 %v604_v49, %v602_v48  ;;  %v1111_v53 = vpack.c.bf16 %v971_v51, %v969_v50  ;;  %v745_v2 = vpack.c.bf16 %v609_v52, %v607_v19  ;;  %v973_v5 = vrot.slane %v3270_v30, 2 }
  0x22   : > { %v610_v8 = vrot.slane %v3315_v41, 1  ;;  %v611_v9 = vrot.slane %v3318_v42, 1  ;;  %v620_v49 = vrot.slane %v3200_v10, 1  ;;  %v621_v29 = vrot.slane %v3203_v11, 1 }
  0x23   : > { %v974_v46 = vsel %vm966_vm3, %v972_v4, %v973_v5  ;;  %v976_v47 = vsel %vm966_vm3, %v973_v5, %v975_v7  ;;  %v623_v51 = vrot.slane %v224_v6, 1  ;;  %v977_v4 = vrot.slane %v3315_v41, 2 }
  0x24   : > { %2872 = vmatmul.msk.bf16.gmra.mxu1 %vm345_vm1, %v3264_v28  ;;  %v614_v48 = vsel %vm599_vm2, %v611_v9, %v613_v21  ;;  %v3434_v30 = vpack.c.bf16 %v976_v47, %v974_v46  ;;  %v980_v5 = vrot.slane %v218_v3, 2  ;;  %v615_v7 = vrot.slane %v3379_v61, 1 }
  0x25   : > { %2876 = vmatmul.msk.bf16.gmra.mxu2 %vm345_vm1, %v3274_v31  ;;  %v624_v19 = vsel %vm599_vm2, %v621_v29, %v623_v51  ;;  %v987_v47 = vrot.slane %v3200_v10, 2  ;;  %v626_v3 = vrot.slane %v3248_v23, 1  ;;  %v227_v51 = vld [vmem:[%s3197_s30 + $0x88] sm:$0x3] }
  0x26   : > { %2880 = vmatmul.msk.bf16.gmra.mxu3 %vm345_vm1, %v3278_v32 }
  0x27   : > { %2868 = vmatmul.msk.bf16.gmra.mxu0 %vm345_vm1, %v3282_v33 }
  0x34   : > { %2873 = vmatmul.msk.bf16.gmra.mxu1 %vm345_vm1, %v3312_v40 }
  0x35   : > { %2877 = vmatmul.msk.bf16.gmra.mxu2 %vm345_vm1, %v3322_v43 }
  0x36   : > { %2881 = vmatmul.msk.bf16.gmra.mxu3 %vm345_vm1, %v3326_v44 }
  0x37   : > { %2869 = vmatmul.msk.bf16.gmra.mxu0 %vm345_vm1, %v3330_v45 }
  0x44   : > { %2874 = vmatmul.msk.bf16.gmra.mxu1 %vm345_vm1, %v3376_v60 }
  0x45   : > { %2878 = vmatmul.msk.bf16.gmra.mxu2 %vm345_vm1, %v3386_v63 }
  0x46   : > { %2882 = vmatmul.msk.bf16.gmra.mxu3 %vm345_vm1, %v3390_v0 }
  0x47   : > { %2870 = vmatmul.msk.bf16.gmra.mxu0 %vm345_vm1, %v3394_v1 }
  0x54   : > { %2884 = vmatmul.msk.bf16.vlgmr.msrb.gmra.mxu1 %vm345_vm1, %v744_v18  ;;  %v622_v18 = vsel %vm599_vm2, %v620_v49, %v621_v29  ;;  %v990_v29 = vrot.slane %v224_v6, 2 }
  0x55   : > { %2901 = vmatmul.msk.bf16.vlgmr.msrb.gmra.mxu2 %vm345_vm1, %v1111_v53  ;;  %v3446_v52 = vpack.c.bf16 %v624_v19, %v622_v18  ;;  %v221_v53 = vld [vmem:[%s3197_s30 + $0x58] sm:$0x3] }
  0x56   : > { %2918 = vmatmul.msk.bf16.vlgmr.msrb.gmra.mxu3 %vm345_vm1, %v3282_v33  ;;  %v612_v33 = vsel %vm599_vm2, %v610_v8, %v611_v9  ;;  %v616_v8 = vrot.slane %v3382_v62, 1  ;;  %v618_v9 = vrot.slane %v221_v53, 1 }
  0x57   : > { %2935 = vmatmul.msk.bf16.vlgmr.msrb.gmra.mxu0 %vm345_vm1, %v745_v2  ;;  %v3437_v50 = vpack.c.bf16 %v614_v48, %v612_v33  ;;  %4181 = vst [vmem:[#allocation9_spill] sm:$0xff] %v3446_v52  ;;  %v988_v33 = vrot.slane %v3203_v11, 2 }
  0x58   : > { %v617_v48 = vsel %vm599_vm2, %v615_v7, %v616_v8  ;;  %v619_v41 = vsel %vm599_vm2, %v616_v8, %v618_v9  ;;  %v982_v7 = vrot.slane %v3379_v61, 2  ;;  %v983_v8 = vrot.slane %v3382_v62, 2 }
  0x59   : > { %v3466_v18 = vpack.c.bf16 %v619_v41, %v617_v48  ;;  %v989_v19 = vsel %vm966_vm3, %v987_v47, %v988_v33  ;;  %v991_v10 = vsel %vm966_vm3, %v988_v33, %v990_v29  ;;  %v985_v9 = vrot.slane %v221_v53, 2  ;;  %v230_v29 = vld [vmem:[%s3197_s30 + $0xa0] sm:$0x3] }
  0x5a   : > { %v3472_v11 = vpack.c.bf16 %v991_v10, %v989_v19  ;;  %v992_v47 = vrot.slane %v3245_v22, 2  ;;  %v993_v33 = vrot.slane %v3248_v23, 2  ;;  %v630_v48 = vrot.slane %v3293_v34, 1 }
  0x5b   : > { %v631_v41 = vrot.slane %v3296_v35, 1  ;;  %v633_v53 = vrot.slane %v230_v29, 1  ;;  %v997_v10 = vrot.slane %v3293_v34, 2 }
  0x5c   : > { %4182 = vst [vmem:[#allocation10_spill] sm:$0xff] %v3472_v11  ;;  %v994_v61 = vsel %vm966_vm3, %v992_v47, %v993_v33 }
  0x5d   : > { %v632_v23 = vsel %vm599_vm2, %v630_v48, %v631_v41  ;;  %v634_v19 = vsel %vm599_vm2, %v631_v41, %v633_v53  ;;  %v1002_v53 = vrot.slane %v3357_v54, 2 }
  0x64   : > { %2885 = vmatmul.msk.bf16.gmra.mxu1 %vm345_vm1, %v745_v2  ;;  %v978_v2 = vrot.slane %v3318_v42, 2  ;;  %v625_v42 = vrot.slane %v3245_v22, 1 }
  0x65   : > { %2902 = vmatmul.msk.bf16.gmra.mxu2 %vm345_vm1, %v3434_v30 }
  0x66   : > { %2919 = vmatmul.msk.bf16.gmra.mxu3 %vm345_vm1, %v3330_v45  ;;  %v979_v21 = vsel %vm966_vm3, %v977_v4, %v978_v2  ;;  %v981_v46 = vsel %vm966_vm3, %v978_v2, %v980_v5  ;;  %v628_v4 = vrot.slane %v227_v51, 1  ;;  %v627_v2 = vsel %vm599_vm2, %v625_v42, %v626_v3 }
  0x67   : > { %2936 = vmatmul.msk.bf16.gmra.mxu0 %vm345_vm1, %v3437_v50  ;;  %v3463_v49 = vpack.c.bf16 %v981_v46, %v979_v21  ;;  %v984_v21 = vsel %vm966_vm3, %v982_v7, %v983_v8  ;;  %v986_v46 = vsel %vm966_vm3, %v983_v8, %v985_v9  ;;  %v1000_v8 = vrot.slane %v230_v29, 2  ;;  %v233_v9 = vld [vmem:[%s3197_s30 + $0xb8] sm:$0x3] }
  0x68   : > { %v629_v6 = vsel %vm599_vm2, %v626_v3, %v628_v4  ;;  %v3492_v42 = vpack.c.bf16 %v986_v46, %v984_v21  ;;  %v995_v3 = vrot.slane %v227_v51, 2  ;;  %v3507_v51 = vpack.c.bf16 %v634_v19, %v632_v23 }
  0x69   : > { %v3480_v5 = vpack.c.bf16 %v629_v6, %v627_v2  ;;  %v998_v4 = vrot.slane %v3296_v35, 2  ;;  %v635_v2 = vrot.slane %v3357_v54, 1  ;;  %v636_v6 = vrot.slane %v3360_v55, 1 }
  0x6a   : > { %4184 = vst [vmem:[#allocation12_spill] sm:$0xff] %v3492_v42  ;;  %v996_v62 = vsel %vm966_vm3, %v993_v33, %v995_v3  ;;  %v638_v47 = vrot.slane %v233_v9, 1  ;;  %v1003_v23 = vrot.slane %v3360_v55, 2 }
  0x6b   : > { %4183 = vst [vmem:[#allocation11_spill] sm:$0xff] %v3480_v5  ;;  %v3499_v22 = vpack.c.bf16 %v996_v62, %v994_v61  ;;  %v999_v21 = vsel %vm966_vm3, %v997_v10, %v998_v4  ;;  %v1001_v46 = vsel %vm966_vm3, %v998_v4, %v1000_v8  ;;  %v637_v35 = vsel %vm599_vm2, %v635_v2, %v636_v6 }
  0x6c   : > { %4186 = vst [vmem:[#allocation14_spill] sm:$0xff] %v3507_v51  ;;  %v3524_v34 = vpack.c.bf16 %v1001_v46, %v999_v21  ;;  %v639_v48 = vsel %vm599_vm2, %v636_v6, %v638_v47  ;;  %v640_v10 = vrot.slane %v3206_v12, 1  ;;  %v641_v4 = vrot.slane %v3213_v14, 1  ;;  %v236_v21 = vld [vmem:[%s3197_s30 + $0xd0] sm:$0x3] }
  0x6d   : > { %4185 = vst [vmem:[#allocation13_spill] sm:$0xff] %v3499_v22  ;;  %v3532_v41 = vpack.c.bf16 %v639_v48, %v637_v35  ;;  %v1005_v8 = vrot.slane %v233_v9, 2  ;;  %v1004_v46 = vsel %vm966_vm3, %v1002_v53, %v1003_v23  ;;  %v643_v35 = vrot.slane %v236_v21, 1 }
  0x6e   : > { %4187 = vst [vmem:[#allocation15_spill] sm:$0xff] %v3524_v34  ;;  %v642_v48 = vsel %vm599_vm2, %v640_v10, %v641_v4  ;;  %v1007_v10 = vrot.slane %v3206_v12, 2 }
  0x6f   : > { %4188 = vst [vmem:[#allocation16_spill] sm:$0xff] %v3532_v41  ;;  %v1006_v47 = vsel %vm966_vm3, %v1003_v23, %v1005_v8  ;;  %v644_v9 = vsel %vm599_vm2, %v641_v4, %v643_v35  ;;  %v1008_v4 = vrot.slane %v3213_v14, 2  ;;  %v1010_v35 = vrot.slane %v236_v21, 2 }
  0x70   : > { %v3561_v55 = vpack.c.bf16 %v1006_v47, %v1004_v46  ;;  %v3569_v53 = vpack.c.bf16 %v644_v9, %v642_v48  ;;  %v645_v48 = vrot.slane %v3251_v24, 1  ;;  %v646_v9 = vrot.slane %v3254_v25, 1 }
  0x72   : > { %4191 = vst [vmem:[#allocation19_spill] sm:$0xff] %v3561_v55  ;;  %v647_v21 = vsel %vm599_vm2, %v645_v48, %v646_v9  ;;  %v1012_v48 = vrot.slane %v3251_v24, 2 }
  0x73   : > { %4192 = vst [vmem:[#allocation20_spill] sm:$0xff] %v3569_v53 }
  0x74   : > { %2886 = vmatmul.msk.bf16.gmra.mxu1 %vm345_vm1, %v3437_v50 }
  0x75   : > { %2903 = vmatmul.msk.bf16.gmra.mxu2 %vm345_vm1, %v3463_v49 }
  0x76   : > { %2920 = vmatmul.msk.bf16.gmra.mxu3 %vm345_vm1, %v3394_v1 }
  0x77   : > { %2937 = vmatmul.msk.bf16.gmra.mxu0 %vm345_vm1, %v3466_v18 }
  0x84   : > { %2887 = vmatmul.msk.bf16.gmra.mxu1 %vm345_vm1, %v3466_v18 }
  0x85   : > { %2904 = vmatmul.msk.bf16.gmra.mxu2 %vm345_vm1, %v3492_v42 }
  0x86   : > { %2921 = vmatmul.msk.bf16.gmra.mxu3 %vm345_vm1, %v3210_v13 }
  0x87   : > { %2938 = vmatmul.msk.bf16.gmra.mxu0 %vm345_vm1, %v3446_v52 }
  0x91   : > { %v3515_v7 = vpop.f32.mrf.mxu1 }
  0x94   : > { %v3520_v33 = vpop.f32.mrf.mxu0  ;;  %2888 = vmatmul.msk.bf16.gmra.mxu1 %vm345_vm1, %v3446_v52 }
  0x95   : > { %2905 = vmatmul.msk.bf16.gmra.mxu2 %vm345_vm1, %v3472_v11 }
  0x96   : > { %2922 = vmatmul.msk.bf16.gmra.mxu3 %vm345_vm1, %v3264_v28 }
  0x97   : > { %2939 = vmatmul.msk.bf16.gmra.mxu0 %vm345_vm1, %v3480_v5 }
  0x98   : > { %v3536_v3 = vpop.f32.mrf.mxu2 }
  0x99   : > { %v3538_v29 = vpop.f32.mrf.mxu3  ;;  %v3540_v61 = vpop.f32.mrf.mxu1 }
  0x9a   : > { %4189 = vst [vmem:[#allocation17_spill] sm:$0xff] %v3538_v29 }
  0x9c   : > { %v3542_v62 = vpop.f32.mrf.mxu0 }
  0xa0   : > { %v3546_v19 = vpop.f32.mrf.mxu2 }
  0xa1   : > { %v3550_v2 = vpop.f32.mrf.mxu3  ;;  %v3552_v6 = vpop.f32.mrf.mxu1 }
  0xa2   : > { %4190 = vst [vmem:[#allocation18_spill] sm:$0xff] %v3550_v2 }
  0xa4   : > { %v3557_v54 = vpop.f32.mrf.mxu0  ;;  %2889 = vmatmul.msk.bf16.gmra.mxu1 %vm345_vm1, %v3480_v5  ;;  %v1011_v5 = vsel %vm966_vm3, %v1008_v4, %v1010_v35 }
  0xa5   : > { %2906 = vmatmul.msk.bf16.gmra.mxu2 %vm345_vm1, %v3499_v22  ;;  %v1009_v22 = vsel %vm966_vm3, %v1007_v10, %v1008_v4 }
  0xa6   : > { %2923 = vmatmul.msk.bf16.gmra.mxu3 %vm345_vm1, %v3312_v40  ;;  %v3598_v14 = vpack.c.bf16 %v1011_v5, %v1009_v22 }
  0xa7   : > { %2940 = vmatmul.msk.bf16.gmra.mxu0 %vm345_vm1, %v3507_v51 }
  0xa8   : > { %v3573_v23 = vpop.f32.mrf.mxu2  ;;  %4196 = vst [vmem:[#allocation24_spill] sm:$0xff] %v3598_v14 }
  0xa9   : > { %v3575_v8 = vpop.f32.mrf.mxu3  ;;  %v3577_v46 = vpop.f32.mrf.mxu1 }
  0xaa   : > { %4193 = vst [vmem:[#allocation21_spill] sm:$0xff] %v3575_v8  ;;  %v239_v8 = vld [vmem:[%s3197_s30 + $0xe8] sm:$0x3] }
  0xab   : > { %v648_v28 = vrot.slane %v239_v8, 1 }
  0xac   : > { %v3579_v47 = vpop.f32.mrf.mxu0 }
  0xb0   : > { %v3583_v2 = vpop.f32.mrf.mxu2 }
  0xb1   : > { %4194 = vst [vmem:[#allocation22_spill] sm:$0xff] %v3583_v2  ;;  %v3587_v29 = vpop.f32.mrf.mxu3  ;;  %v3589_v40 = vpop.f32.mrf.mxu1 }
  0xb2   : > { %4195 = vst [vmem:[#allocation23_spill] sm:$0xff] %v3587_v29  ;;  %v649_v29 = vsel %vm599_vm2, %v646_v9, %v648_v28  ;;  %v1013_v28 = vrot.slane %v3254_v25, 2 }
  0xb3   : > { %v3606_v10 = vpack.c.bf16 %v649_v29, %v647_v21  ;;  %v650_v29 = vrot.slane %v3299_v36, 1  ;;  %v651_v21 = vrot.slane %v3302_v37, 1 }
  0xb4   : > { %v3594_v12 = vpop.f32.mrf.mxu0  ;;  %2890 = vmatmul.msk.bf16.gmra.mxu1 %vm345_vm1, %v3507_v51  ;;  %v1015_v51 = vrot.slane %v239_v8, 2  ;;  %v1014_v11 = vsel %vm966_vm3, %v1012_v48, %v1013_v28 }
  0xb5   : > { %2907 = vmatmul.msk.bf16.gmra.mxu2 %vm345_vm1, %v3524_v34 }
  0xb6   : > { %2924 = vmatmul.msk.bf16.gmra.mxu3 %vm345_vm1, %v3376_v60 }
  0xb7   : > { %2941 = vmatmul.msk.bf16.gmra.mxu0 %vm345_vm1, %v3532_v41 }
  0xb8   : > { %v3610_v4 = vpop.f32.mrf.mxu2 }
  0xb9   : > { %4197 = vst [vmem:[#allocation25_spill] sm:$0xff] %v3610_v4  ;;  %v3612_v5 = vpop.f32.mrf.mxu3  ;;  %v3614_v22 = vpop.f32.mrf.mxu1  ;;  %v1016_v4 = vsel %vm966_vm3, %v1013_v28, %v1015_v51 }
  0xba   : > { %4198 = vst [vmem:[#allocation26_spill] sm:$0xff] %v3612_v5  ;;  %v242_v5 = vld [vmem:[%s3197_s30 + $0x100] sm:$0x3]  ;;  %v3635_v25 = vpack.c.bf16 %v1016_v4, %v1014_v11 }
  0xbb   : > { %v653_v52 = vrot.slane %v242_v5, 1 }
  0xbc   : > { %v3616_v35 = vpop.f32.mrf.mxu0 }
  0xbd   : > { %v654_v8 = vsel %vm599_vm2, %v651_v21, %v653_v52  ;;  %v1018_v52 = vrot.slane %v3302_v37, 2 }
  0xc0   : > { %v3620_v9 = vpop.f32.mrf.mxu2 }
  0xc1   : > { %4199 = vst [vmem:[#allocation27_spill] sm:$0xff] %v3620_v9  ;;  %v3624_v60 = vpop.f32.mrf.mxu3  ;;  %v3626_v34 = vpop.f32.mrf.mxu1 }
  0xc2   : > { %4200 = vst [vmem:[#allocation28_spill] sm:$0xff] %v3624_v60  ;;  %v652_v60 = vsel %vm599_vm2, %v650_v29, %v651_v21  ;;  %v1017_v29 = vrot.slane %v3299_v36, 2 }
  0xc3   : > { %v3643_v51 = vpack.c.bf16 %v654_v8, %v652_v60  ;;  %v655_v60 = vrot.slane %v3363_v56, 1  ;;  %v656_v8 = vrot.slane %v3366_v57, 1 }
  0xc4   : > { %v3631_v24 = vpop.f32.mrf.mxu0  ;;  %2891 = vmatmul.msk.bf16.gmra.mxu1 %vm345_vm1, %v3532_v41  ;;  %v1020_v41 = vrot.slane %v242_v5, 2  ;;  %v1019_v9 = vsel %vm966_vm3, %v1017_v29, %v1018_v52 }
  0xc5   : > { %2908 = vmatmul.msk.bf16.gmra.mxu2 %vm345_vm1, %v3561_v55 }
  0xc6   : > { %2925 = vmatmul.msk.bf16.gmra.mxu3 %vm345_vm1, %v3223_v17  ;;  %v1021_v13 = vsel %vm966_vm3, %v1018_v52, %v1020_v41 }
  0xc7   : > { %2942 = vmatmul.msk.bf16.gmra.mxu0 %vm345_vm1, %v3569_v53  ;;  %v3669_v37 = vpack.c.bf16 %v1021_v13, %v1019_v9 }
  0xc8   : > { %v3647_v48 = vpop.f32.mrf.mxu2 }
  0xc9   : > { %4201 = vst [vmem:[#allocation29_spill] sm:$0xff] %v3647_v48  ;;  %v3649_v11 = vpop.f32.mrf.mxu3  ;;  %v3651_v4 = vpop.f32.mrf.mxu1  ;;  %v245_v48 = vld [vmem:[%s3197_s30 + $0x118] sm:$0x3] }
  0xca   : > { %4202 = vst [vmem:[#allocation30_spill] sm:$0xff] %v3649_v11  ;;  %v658_v36 = vrot.slane %v245_v48, 1 }
  0xcc   : > { %v3653_v28 = vpop.f32.mrf.mxu0  ;;  %v659_v5 = vsel %vm599_vm2, %v656_v8, %v658_v36  ;;  %v1023_v36 = vrot.slane %v3366_v57, 2 }
  0xd0   : > { %v3657_v21 = vpop.f32.mrf.mxu2 }
  0xd1   : > { %4203 = vst [vmem:[#allocation31_spill] sm:$0xff] %v3657_v21  ;;  %v3661_v17 = vpop.f32.mrf.mxu3  ;;  %v822_v55 = vpop.f32.mrf.mxu1  ;;  %v1025_v21 = vrot.slane %v245_v48, 2 }
  0xd2   : > { %4204 = vst [vmem:[#allocation32_spill] sm:$0xff] %v3661_v17  ;;  %v902_v11 = vadd.f32 %v822_v55, %v3520_v33  ;;  %v657_v17 = vsel %vm599_vm2, %v655_v60, %v656_v8  ;;  %v1022_v8 = vrot.slane %v3363_v56, 2 }
  0xd3   : > { %v3677_v33 = vpack.c.bf16 %v659_v5, %v657_v17  ;;  %v660_v5 = vrot.slane %v3216_v15, 1 }
  0xd4   : > { %v1587_v2 = vpop.f32.mrf.mxu0  ;;  %2892 = vmatmul.msk.bf16.gmra.mxu1 %vm345_vm1, %v3569_v53 }
  0xd5   : > { %2909 = vmatmul.msk.bf16.gmra.mxu2 %vm345_vm1, %v3598_v14 }
  0xd6   : > { %2926 = vmatmul.msk.bf16.gmra.mxu3 %vm345_vm1, %v3274_v31  ;;  %v661_v31 = vrot.slane %v3219_v16, 1 }
  0xd7   : > { %2943 = vmatmul.msk.bf16.gmra.mxu0 %vm345_vm1, %v3606_v10 }
  0xd8   : > { %v1189_v41 = vpop.f32.mrf.mxu2  ;;  %v662_v48 = vsel %vm599_vm2, %v660_v5, %v661_v31 }
  0xd9   : > { %v1269_v55 = vadd.f32 %v1189_v41, %v902_v11  ;;  %v1383_v29 = vpop.f32.mrf.mxu3  ;;  %v824_v13 = vpop.f32.mrf.mxu1 }
  0xda   : > { %v903_v9 = vadd.f32 %v824_v13, %v3542_v62  ;;  %v248_v62 = vld [vmem:[%s3197_s30 + $0x130] sm:$0x3] }
  0xdb   : > { %v1463_v52 = vadd.f32 %v1383_v29, %v1269_v55  ;;  %v1026_v29 = vsel %vm966_vm3, %v1023_v36, %v1025_v21  ;;  %v663_v56 = vrot.slane %v248_v62, 1 }
  0xdc   : > { %v1589_v14 = vpop.f32.mrf.mxu0 }
  0xdd   : > { %v3682_v60 = vadd.f32 %v1587_v2, %v1463_v52  ;;  %v1024_v2 = vsel %vm966_vm3, %v1022_v8, %v1023_v36 }
  0xde   : > { %v3694_v57 = vpack.c.bf16 %v1026_v29, %v1024_v2  ;;  %v665_v2 = vrot.slane %v3257_v26, 1  ;;  %v666_v29 = vrot.slane %v3260_v27, 1 }
  0xe0   : > { %v1191_v17 = vpop.f32.mrf.mxu2 }
  0xe1   : > { %v1270_v53 = vadd.f32 %v1191_v17, %v903_v9  ;;  %v1385_v11 = vpop.f32.mrf.mxu3  ;;  %v827_v41 = vpop.f32.mrf.mxu1 }
  0xe2   : > { %v904_v42 = vadd.f32 %v827_v41, %v3557_v54  ;;  %v664_v54 = vsel %vm599_vm2, %v661_v31, %v663_v56  ;;  %v1028_v41 = vrot.slane %v3219_v16, 2 }
  0xe3   : > { %v1464_v55 = vadd.f32 %v1385_v11, %v1270_v53  ;;  %v3704_v53 = vpack.c.bf16 %v664_v54, %v662_v48  ;;  %v1030_v54 = vrot.slane %v248_v62, 2  ;;  %v667_v62 = vsel %vm599_vm2, %v665_v2, %v666_v29 }
  0xe4   : > { %v1592_v13 = vpop.f32.mrf.mxu0  ;;  %2893 = vmatmul.msk.bf16.gmra.mxu1 %vm345_vm1, %v3606_v10 }
  0xe5   : > { %2910 = vmatmul.msk.bf16.gmra.mxu2 %vm345_vm1, %v3635_v25  ;;  %v3700_v9 = vadd.f32 %v1589_v14, %v1464_v55  ;;  %v1027_v14 = vrot.slane %v3216_v15, 2 }
  0xe6   : > { %2927 = vmatmul.msk.bf16.gmra.mxu3 %vm345_vm1, %v3322_v43 }
  0xe7   : > { %2944 = vmatmul.msk.bf16.gmra.mxu0 %vm345_vm1, %v3643_v51 }
  0xe8   : > { %v1194_v21 = vpop.f32.mrf.mxu2 }
  0xe9   : > { %v1271_v52 = vadd.f32 %v1194_v21, %v904_v42  ;;  %v1388_v8 = vpop.f32.mrf.mxu3  ;;  %v829_v36 = vpop.f32.mrf.mxu1 }
  0xea   : > { %v905_v17 = vadd.f32 %v829_v36, %v3579_v47  ;;  %v251_v47 = vld [vmem:[%s3197_s30 + $0x148] sm:$0x3] }
  0xeb   : > { %v1465_v5 = vadd.f32 %v1388_v8, %v1271_v52  ;;  %v1031_v8 = vsel %vm966_vm3, %v1028_v41, %v1030_v54  ;;  %v668_v15 = vrot.slane %v251_v47, 1  ;;  %v1033_v54 = vrot.slane %v3260_v27, 2 }
  0xec   : > { %v1594_v11 = vpop.f32.mrf.mxu0 }
  0xed   : > { %v3709_v31 = vadd.f32 %v1592_v13, %v1465_v5  ;;  %v1029_v13 = vsel %vm966_vm3, %v1027_v14, %v1028_v41 }
  0xee   : > { %v3721_v16 = vpack.c.bf16 %v1031_v8, %v1029_v13  ;;  %v670_v13 = vrot.slane %v3305_v38, 1  ;;  %v671_v8 = vrot.slane %v3308_v39, 1 }
  0xf0   : > { %v1196_v55 = vpop.f32.mrf.mxu2 }
  0xf1   : > { %v1272_v56 = vadd.f32 %v1196_v55, %v905_v17  ;;  %v1390_v42 = vpop.f32.mrf.mxu3  ;;  %v832_v48 = vpop.f32.mrf.mxu1 }
  0xf2   : > { %v906_v21 = vadd.f32 %v832_v48, %v3594_v12  ;;  %v669_v12 = vsel %vm599_vm2, %v666_v29, %v668_v15 }
  0xf3   : > { %v1466_v52 = vadd.f32 %v1390_v42, %v1272_v56  ;;  %v3731_v5 = vpack.c.bf16 %v669_v12, %v667_v62  ;;  %v1035_v12 = vrot.slane %v251_v47, 2  ;;  %v672_v47 = vsel %vm599_vm2, %v670_v13, %v671_v8 }
  0xf4   : > { %v1597_v36 = vpop.f32.mrf.mxu0  ;;  %2894 = vmatmul.msk.bf16.gmra.mxu1 %vm345_vm1, %v3643_v51 }
  0xf5   : > { %2911 = vmatmul.msk.bf16.gmra.mxu2 %vm345_vm1, %v3669_v37  ;;  %v3727_v17 = vadd.f32 %v1594_v11, %v1466_v52  ;;  %v1032_v11 = vrot.slane %v3257_v26, 2 }
  0xf6   : > { %2928 = vmatmul.msk.bf16.gmra.mxu3 %vm345_vm1, %v3386_v63 }
  0xf7   : > { %2945 = vmatmul.msk.bf16.gmra.mxu0 %vm345_vm1, %v3677_v33 }
  0xf8   : > { %v1199_v14 = vpop.f32.mrf.mxu2 }
  0xf9   : > { %v1273_v41 = vadd.f32 %v1199_v14, %v906_v21  ;;  %v1393_v55 = vpop.f32.mrf.mxu3  ;;  %v834_v56 = vpop.f32.mrf.mxu1 }
  0xfa   : > { %v907_v42 = vadd.f32 %v834_v56, %v3616_v35  ;;  %v254_v35 = vld [vmem:[%s3197_s30 + $0x160] sm:$0x3] }
  0xfb   : > { %v1467_v2 = vadd.f32 %v1393_v55, %v1273_v41  ;;  %v1036_v55 = vsel %vm966_vm3, %v1033_v54, %v1035_v12  ;;  %v673_v26 = vrot.slane %v254_v35, 1  ;;  %v1038_v12 = vrot.slane %v3308_v39, 2 }
  0xfc   : > { %v1599_v48 = vpop.f32.mrf.mxu0 }
  0xfd   : > { %v3736_v29 = vadd.f32 %v1597_v36, %v1467_v2  ;;  %v1034_v36 = vsel %vm966_vm3, %v1032_v11, %v1033_v54 }
  0xfe   : > { %v3748_v27 = vpack.c.bf16 %v1036_v55, %v1034_v36  ;;  %v675_v36 = vrot.slane %v3369_v58, 1  ;;  %v676_v55 = vrot.slane %v3372_v59, 1 }
 0x100   : > { %v1201_v52 = vpop.f32.mrf.mxu2  ;;  %v677_v39 = vsel %vm599_vm2, %v675_v36, %v676_v55 }
 0x101   : > { %v1274_v15 = vadd.f32 %v1201_v52, %v907_v42  ;;  %v1395_v21 = vpop.f32.mrf.mxu3  ;;  %v837_v62 = vpop.f32.mrf.mxu1 }
 0x102   : > { %v908_v14 = vadd.f32 %v837_v62, %v3631_v24  ;;  %v674_v24 = vsel %vm599_vm2, %v671_v8, %v673_v26 }
 0x103   : > { %v1468_v41 = vadd.f32 %v1395_v21, %v1274_v15  ;;  %v3758_v2 = vpack.c.bf16 %v674_v24, %v672_v47  ;;  %v1040_v24 = vrot.slane %v254_v35, 2 }
 0x104   : > { %v1602_v56 = vpop.f32.mrf.mxu0  ;;  %2895 = vmatmul.msk.bf16.gmra.mxu1 %vm345_vm1, %v3677_v33 }
 0x105   : > { %2912 = vmatmul.msk.bf16.gmra.mxu2 %vm345_vm1, %v3694_v57  ;;  %v3754_v42 = vadd.f32 %v1599_v48, %v1468_v41  ;;  %v1037_v48 = vrot.slane %v3305_v38, 2 }
 0x106   : > { %2929 = vmatmul.msk.bf16.gmra.mxu3 %vm345_vm1, %v3235_v20 }
 0x107   : > { %4205 = vst [vmem:[#allocation33_spill] sm:$0xff] %v3754_v42  ;;  %2946 = vmatmul.msk.bf16.gmra.mxu0 %vm345_vm1, %v3704_v53 }
 0x108   : > { %v1204_v11 = vpop.f32.mrf.mxu2 }
 0x109   : > { %v1275_v54 = vadd.f32 %v1204_v11, %v908_v14  ;;  %v1398_v52 = vpop.f32.mrf.mxu3  ;;  %v839_v15 = vpop.f32.mrf.mxu1  ;;  %v257_v11 = vld [vmem:[%s3197_s30 + $0x178] sm:$0x3] }
 0x10a   : > { %v909_v21 = vadd.f32 %v839_v15, %v3653_v28  ;;  %v1039_v28 = vsel %vm966_vm3, %v1037_v48, %v1038_v12 }
 0x10b   : > { %v1469_v13 = vadd.f32 %v1398_v52, %v1275_v54  ;;  %v678_v54 = vrot.slane %v257_v11, 1 }
 0x10c   : > { %v1604_v62 = vpop.f32.mrf.mxu0 }
 0x10d   : > { %v3763_v8 = vadd.f32 %v1602_v56, %v1469_v13  ;;  %v1041_v56 = vsel %vm966_vm3, %v1038_v12, %v1040_v24  ;;  %v679_v35 = vsel %vm599_vm2, %v676_v55, %v678_v54  ;;  %v1045_v54 = vrot.slane %v257_v11, 2 }
 0x10e   : > { %v3774_v38 = vpack.c.bf16 %v1041_v56, %v1039_v28 }
 0x110   : > { %v1206_v41 = vpop.f32.mrf.mxu2 }
 0x111   : > { %v1276_v26 = vadd.f32 %v1206_v41, %v909_v21  ;;  %v1400_v14 = vpop.f32.mrf.mxu3  ;;  %v842_v47 = vpop.f32.mrf.mxu1  ;;  %v3784_v21 = vpack.c.bf16 %v679_v35, %v677_v39 }
 0x112   : > { %v910_v13 = vadd.f32 %v842_v47, %v3515_v7 }
 0x113   : > { %v1470_v42 = vadd.f32 %v1400_v14, %v1276_v26 }
 0x114   : > { %v1607_v52 = vpop.f32.mrf.mxu0  ;;  %2896 = vmatmul.msk.bf16.gmra.mxu1 %vm345_vm1, %v3704_v53 }
 0x115   : > { %2913 = vmatmul.msk.bf16.gmra.mxu2 %vm345_vm1, %v3721_v16  ;;  %v3780_v15 = vadd.f32 %v1604_v62, %v1470_v42  ;;  %v1042_v42 = vrot.slane %v3369_v58, 2  ;;  %v1043_v62 = vrot.slane %v3372_v59, 2 }
 0x116   : > { %2930 = vmatmul.msk.bf16.gmra.mxu3 %vm345_vm1, %v3278_v32 }
 0x117   : > { %2947 = vmatmul.msk.bf16.gmra.mxu0 %vm345_vm1, %v3731_v5  ;;  %v1044_v35 = vsel %vm966_vm3, %v1042_v42, %v1043_v62 }
 0x118   : > { %v1209_v48 = vpop.f32.mrf.mxu2 }
 0x119   : > { %v1277_v12 = vadd.f32 %v1209_v48, %v910_v13  ;;  %v1403_v41 = vpop.f32.mrf.mxu3  ;;  %v844_v26 = vpop.f32.mrf.mxu1  ;;  %v1046_v13 = vsel %vm966_vm3, %v1043_v62, %v1045_v54 }
 0x11a   : > { %v911_v55 = vadd.f32 %v844_v26, %v3540_v61 }
 0x11b   : > { %v1471_v14 = vadd.f32 %v1403_v41, %v1277_v12 }
 0x11c   : > { %v1609_v36 = vpop.f32.mrf.mxu0 }
 0x11d   : > { %v3789_v24 = vadd.f32 %v1607_v52, %v1471_v14  ;;  %v3798_v52 = vpack.c.bf16 %v1046_v13, %v1044_v35 }
 0x120   : > { %v1211_v28 = vpop.f32.mrf.mxu2 }
 0x121   : > { %v1278_v56 = vadd.f32 %v1211_v28, %v911_v55  ;;  %v1405_v7 = vpop.f32.mrf.mxu3  ;;  %v847_v47 = vpop.f32.mrf.mxu1 }
 0x122   : > { %v912_v59 = vadd.f32 %v847_v47, %v3552_v6 }
 0x123   : > { %v1472_v39 = vadd.f32 %v1405_v7, %v1278_v56 }
 0x124   : > { %v1612_v48 = vpop.f32.mrf.mxu0  ;;  %2897 = vmatmul.msk.bf16.gmra.mxu1 %vm345_vm1, %v3731_v5 }
 0x125   : > { %2914 = vmatmul.msk.bf16.gmra.mxu2 %vm345_vm1, %v3748_v27  ;;  %v3802_v58 = vadd.f32 %v1609_v36, %v1472_v39 }
 0x126   : > { %2931 = vmatmul.msk.bf16.gmra.mxu3 %vm345_vm1, %v3326_v44 }
 0x127   : > { %2948 = vmatmul.msk.bf16.gmra.mxu0 %vm345_vm1, %v3758_v2 }
 0x128   : > { %v1214_v61 = vpop.f32.mrf.mxu2 }
 0x129   : > { %v1279_v11 = vadd.f32 %v1214_v61, %v912_v59  ;;  %v1408_v12 = vpop.f32.mrf.mxu3  ;;  %v849_v41 = vpop.f32.mrf.mxu1  ;;  %v3827_v59 = vld [vmem:[%s3197_s30 + $0x188] sm:$0xff]  ;;  %v3830_v61 = vld [vmem:[%s3197_s30 + $0x190] sm:$0x3] }
 0x12a   : > { %v913_v62 = vadd.f32 %v849_v41, %v3577_v46 }
 0x12b   : > { %v1473_v26 = vadd.f32 %v1408_v12, %v1279_v11 }
 0x12c   : > { %v1614_v14 = vpop.f32.mrf.mxu0 }
 0x12d   : > { %v3809_v42 = vadd.f32 %v1612_v48, %v1473_v26  ;;  %v3824_v48 = vld [vmem:[%s3197_s30 + $0x180] sm:$0xff]  ;;  %v1531_v26 = vrot.slane %v3827_v59, 1 }
 0x12e   : > { %v1530_v41 = vrot.slane %v3824_v48, 1 }
 0x130   : > { %v1216_v36 = vpop.f32.mrf.mxu2 }
 0x131   : > { %v1280_v55 = vadd.f32 %v1216_v36, %v913_v62  ;;  %v1410_v28 = vpop.f32.mrf.mxu3  ;;  %v852_v6 = vpop.f32.mrf.mxu1 }
 0x132   : > { %v914_v46 = vadd.f32 %v852_v6, %v3589_v40  ;;  %v1533_v40 = vrot.slane %v3830_v61, 1 }
 0x133   : > { %v1474_v56 = vadd.f32 %v1410_v28, %v1280_v55  ;;  %v1532_v55 = vsel %vm599_vm2, %v1530_v41, %v1531_v26 }
 0x134   : > { %v1617_v7 = vpop.f32.mrf.mxu0  ;;  %2898 = vmatmul.msk.bf16.gmra.mxu1 %vm345_vm1, %v3758_v2  ;;  %v1534_v28 = vsel %vm599_vm2, %v1531_v26, %v1533_v40 }
 0x135   : > { %2915 = vmatmul.msk.bf16.gmra.mxu2 %vm345_vm1, %v3774_v38  ;;  %v3816_v47 = vadd.f32 %v1614_v14, %v1474_v56 }
 0x136   : > { %2932 = vmatmul.msk.bf16.gmra.mxu3 %vm345_vm1, %v3390_v0 }
 0x137   : > { %4206 = vst [vmem:[#allocation34_spill] sm:$0xff] %v3816_v47  ;;  %2949 = vmatmul.msk.bf16.gmra.mxu0 %vm345_vm1, %v3784_v21 }
 0x138   : > { %v1219_v54 = vpop.f32.mrf.mxu2 }
 0x139   : > { %v1281_v39 = vadd.f32 %v1219_v54, %v914_v46  ;;  %v1413_v35 = vpop.f32.mrf.mxu3  ;;  %v854_v13 = vpop.f32.mrf.mxu1  ;;  %v3842_v54 = vpack.c.bf16 %v3827_v59, %v3824_v48 }
 0x13a   : > { %v915_v62 = vadd.f32 %v854_v13, %v3614_v22 }
 0x13b   : > { %v1475_v11 = vadd.f32 %v1413_v35, %v1281_v39  ;;  %v3844_v35 = vpack.c.bf16 %v1534_v28, %v1532_v55 }
 0x13c   : > { %v1619_v12 = vpop.f32.mrf.mxu0 }
 0x13d   : > { %v3835_v14 = vadd.f32 %v1617_v7, %v1475_v11 }
 0x140   : > { %v1221_v36 = vpop.f32.mrf.mxu2 }
 0x141   : > { %v1282_v6 = vadd.f32 %v1221_v36, %v915_v62  ;;  %v1415_v56 = vpop.f32.mrf.mxu3  ;;  %v857_v46 = vpop.f32.mrf.mxu1 }
 0x142   : > { %v916_v7 = vadd.f32 %v857_v46, %v3626_v34 }
 0x143   : > { %v1476_v39 = vadd.f32 %v1415_v56, %v1282_v6 }
 0x144   : > { %v1622_v47 = vpop.f32.mrf.mxu0  ;;  %2899 = vmatmul.msk.bf16.gmra.mxu1 %vm345_vm1, %v3784_v21 }
 0x145   : > { %2916 = vmatmul.msk.bf16.gmra.mxu2 %vm345_vm1, %v3798_v52  ;;  %v3850_v22 = vadd.f32 %v1619_v12, %v1476_v39 }
 0x146   : > { %2933 = vmatmul.msk.bf16.gmra.mxu3 %vm345_vm1, %v3842_v54 }
 0x147   : > { %4207 = vst [vmem:[#allocation35_spill] sm:$0xff] %v3850_v22  ;;  %2950 = vmatmul.msk.bf16.gmra.mxu0 %vm345_vm1, %v3844_v35 }
 0x148   : > { %v1224_v13 = vpop.f32.mrf.mxu2 }
 0x149   : > { %v1283_v11 = vadd.f32 %v1224_v13, %v916_v7  ;;  %v1418_v41 = vpop.f32.mrf.mxu3  ;;  %v859_v26 = vpop.f32.mrf.mxu1 }
 0x14a   : > { %v917_v55 = vadd.f32 %v859_v26, %v3651_v4 }
 0x14b   : > { %v1477_v40 = vadd.f32 %v1418_v41, %v1283_v11 }
 0x14c   : > { %v1624_v62 = vpop.f32.mrf.mxu0 }
 0x14d   : > { %v3857_v36 = vadd.f32 %v1622_v47, %v1477_v40 }
 0x150   : > { %v1226_v12 = vpop.f32.mrf.mxu2 }
 0x151   : > { %v1284_v28 = vadd.f32 %v1226_v12, %v917_v55  ;;  %v1420_v6 = vpop.f32.mrf.mxu3  ;;  %v862_v56 = vpop.f32.mrf.mxu1 }
 0x152   : > { %v918_v47 = vadd.f32 %v862_v56, %v3536_v3 }
 0x153   : > { %v1478_v39 = vadd.f32 %v1420_v6, %v1284_v28 }
 0x154   : > { %v1627_v22 = vpop.f32.mrf.mxu0  ;;  %2952 = vmatmul.msk.bf16.vlgmr.msra.gmra.mxu1 %vm345_vm1, %v3434_v30 }
 0x155   : > { %2969 = vmatmul.msk.bf16.vlgmr.msra.gmra.mxu2 %vm345_vm1, %v3330_v45  ;;  %v3864_v34 = vadd.f32 %v1624_v62, %v1478_v39 }
 0x156   : > { %2986 = vmatmul.msk.bf16.vlgmr.msra.gmra.mxu3 %vm345_vm1, %v3437_v50 }
 0x157   : > { %3003 = vmatmul.msk.bf16.vlgmr.msra.gmra.mxu0 %vm345_vm1, %v3463_v49 }
 0x158   : > { %v1229_v4 = vpop.f32.mrf.mxu2 }
 0x159   : > { %v1285_v46 = vadd.f32 %v1229_v4, %v918_v47  ;;  %v1423_v7 = vpop.f32.mrf.mxu3  ;;  %v864_v13 = vpop.f32.mrf.mxu1 }
 0x15a   : > { %v919_v45 = vadd.f32 %v864_v13, %v3546_v19  ;;  %v4208_v19 = vld [vmem:[#allocation12_spill] sm:$0xff] }
 0x15b   : > { %v1479_v11 = vadd.f32 %v1423_v7, %v1285_v46  ;;  %v4209_v46 = vld [vmem:[#allocation22_spill] sm:$0xff] }
 0x15c   : > { %v1629_v41 = vpop.f32.mrf.mxu0 }
 0x15d   : > { %v3871_v30 = vadd.f32 %v1627_v22, %v1479_v11 }
 0x160   : > { %v1231_v26 = vpop.f32.mrf.mxu2 }
 0x161   : > { %v1286_v40 = vadd.f32 %v1231_v26, %v919_v45  ;;  %v1425_v62 = vpop.f32.mrf.mxu3  ;;  %v867_v55 = vpop.f32.mrf.mxu1 }
 0x162   : > { %v920_v22 = vadd.f32 %v867_v55, %v3573_v23  ;;  %v4210_v23 = vld [vmem:[#allocation3_spill] sm:$0xff] }
 0x163   : > { %v1480_v50 = vadd.f32 %v1425_v62, %v1286_v40  ;;  %v4211_v40 = vld [vmem:[#allocation9_spill] sm:$0xff] }
 0x164   : > { %v1632_v12 = vpop.f32.mrf.mxu0  ;;  %2953 = vmatmul.msk.bf16.gmra.mxu1 %vm345_vm1, %v3463_v49  ;;  %v4212_v62 = vld [vmem:[#allocation25_spill] sm:$0xff] }
 0x165   : > { %2970 = vmatmul.msk.bf16.gmra.mxu2 %vm345_vm1, %v3394_v1  ;;  %v3878_v3 = vadd.f32 %v1629_v41, %v1480_v50  ;;  %v4213_v50 = vld [vmem:[#allocation10_spill] sm:$0xff] }
 0x166   : > { %2987 = vmatmul.msk.bf16.gmra.mxu3 %vm345_vm1, %v3466_v18 }
 0x167   : > { %3004 = vmatmul.msk.bf16.gmra.mxu0 %vm345_vm1, %v4208_v19 }
 0x168   : > { %v1234_v28 = vpop.f32.mrf.mxu2 }
 0x169   : > { %v1287_v6 = vadd.f32 %v1234_v28, %v920_v22  ;;  %v1428_v56 = vpop.f32.mrf.mxu3  ;;  %v869_v39 = vpop.f32.mrf.mxu1 }
 0x16a   : > { %v921_v1 = vadd.f32 %v869_v39, %v4209_v46 }
 0x16b   : > { %v1481_v47 = vadd.f32 %v1428_v56, %v1287_v6 }
 0x16c   : > { %v1634_v4 = vpop.f32.mrf.mxu0 }
 0x16d   : > { %v3885_v49 = vadd.f32 %v1632_v12, %v1481_v47  ;;  %v4214_v47 = vld [vmem:[#allocation27_spill] sm:$0xff] }
 0x170   : > { %v1236_v7 = vpop.f32.mrf.mxu2 }
 0x171   : > { %v1288_v13 = vadd.f32 %v1236_v7, %v921_v1  ;;  %v1430_v11 = vpop.f32.mrf.mxu3  ;;  %v872_v41 = vpop.f32.mrf.mxu1 }
 0x172   : > { %v922_v55 = vadd.f32 %v872_v41, %v4212_v62  ;;  %v4215_v41 = vld [vmem:[#allocation5_spill] sm:$0xff] }
 0x173   : > { %v1482_v18 = vadd.f32 %v1430_v11, %v1288_v13 }
 0x174   : > { %v1637_v45 = vpop.f32.mrf.mxu0  ;;  %2954 = vmatmul.msk.bf16.gmra.mxu1 %vm345_vm1, %v4208_v19 }
 0x175   : > { %2971 = vmatmul.msk.bf16.gmra.mxu2 %vm345_vm1, %v4210_v23  ;;  %v3892_v26 = vadd.f32 %v1634_v4, %v1482_v18 }
 0x176   : > { %2988 = vmatmul.msk.bf16.gmra.mxu3 %vm345_vm1, %v4211_v40  ;;  %v4216_v40 = vld [vmem:[#allocation11_spill] sm:$0xff] }
 0x177   : > { %3005 = vmatmul.msk.bf16.gmra.mxu0 %vm345_vm1, %v4213_v50 }
 0x178   : > { %v1239_v12 = vpop.f32.mrf.mxu2 }
 0x179   : > { %v1289_v22 = vadd.f32 %v1239_v12, %v922_v55  ;;  %v1433_v28 = vpop.f32.mrf.mxu3  ;;  %v874_v6 = vpop.f32.mrf.mxu1  ;;  %v4218_v55 = vld [vmem:[#allocation13_spill] sm:$0xff] }
 0x17a   : > { %v923_v46 = vadd.f32 %v874_v6, %v4214_v47 }
 0x17b   : > { %v1483_v56 = vadd.f32 %v1433_v28, %v1289_v22 }
 0x17c   : > { %v1639_v39 = vpop.f32.mrf.mxu0 }
 0x17d   : > { %v3899_v19 = vadd.f32 %v1637_v45, %v1483_v56  ;;  %v4217_v45 = vld [vmem:[#allocation29_spill] sm:$0xff] }
 0x180   : > { %v1241_v4 = vpop.f32.mrf.mxu2 }
 0x181   : > { %v1290_v1 = vadd.f32 %v1241_v4, %v923_v46  ;;  %v1435_v7 = vpop.f32.mrf.mxu3  ;;  %v877_v13 = vpop.f32.mrf.mxu1  ;;  %v4220_v46 = vld [vmem:[#allocation31_spill] sm:$0xff] }
 0x182   : > { %v924_v62 = vadd.f32 %v877_v13, %v4217_v45  ;;  %v4221_v13 = vld [vmem:[#allocation7_spill] sm:$0xff] }
 0x183   : > { %v1484_v11 = vadd.f32 %v1435_v7, %v1290_v1 }
 0x184   : > { %v1642_v18 = vpop.f32.mrf.mxu0  ;;  %2955 = vmatmul.msk.bf16.gmra.mxu1 %vm345_vm1, %v4213_v50 }
 0x185   : > { %2972 = vmatmul.msk.bf16.gmra.mxu2 %vm345_vm1, %v4215_v41  ;;  %v3906_v23 = vadd.f32 %v1639_v39, %v1484_v11 }
 0x186   : > { %2989 = vmatmul.msk.bf16.gmra.mxu3 %vm345_vm1, %v4216_v40 }
 0x187   : > { %3006 = vmatmul.msk.bf16.gmra.mxu0 %vm345_vm1, %v4218_v55 }
 0x188   : > { %v1244_v12 = vpop.f32.mrf.mxu2 }
 0x189   : > { %v1291_v22 = vadd.f32 %v1244_v12, %v924_v62  ;;  %v1438_v28 = vpop.f32.mrf.mxu3  ;;  %v879_v6 = vpop.f32.mrf.mxu1  ;;  %v4223_v62 = vld [vmem:[#allocation14_spill] sm:$0xff] }
 0x18a   : > { %v925_v4 = vadd.f32 %v879_v6, %v4220_v46 }
 0x18b   : > { %v1485_v56 = vadd.f32 %v1438_v28, %v1291_v22  ;;  %v4225_v22 = vld [vmem:[#allocation15_spill] sm:$0xff] }
 0x18c   : > { %v1644_v47 = vpop.f32.mrf.mxu0 }
 0x18d   : > { %v3913_v50 = vadd.f32 %v1642_v18, %v1485_v56  ;;  %v4224_v18 = vld [vmem:[#allocation17_spill] sm:$0xff] }
 0x18f   : > { %4219 = vst [vmem:[#allocation12_spill] sm:$0xff] %v3913_v50 }
 0x190   : > { %v1246_v39 = vpop.f32.mrf.mxu2 }
 0x191   : > { %v1292_v1 = vadd.f32 %v1246_v39, %v925_v4  ;;  %v1440_v7 = vpop.f32.mrf.mxu3  ;;  %v882_v11 = vpop.f32.mrf.mxu1 }
 0x192   : > { %v926_v12 = vadd.f32 %v882_v11, %v4224_v18  ;;  %v4228_v11 = vld [vmem:[#allocation8_spill] sm:$0xff] }
 0x193   : > { %v1486_v41 = vadd.f32 %v1440_v7, %v1292_v1  ;;  %v4227_v1 = vld [vmem:[#allocation18_spill] sm:$0xff] }
 0x194   : > { %v1647_v40 = vpop.f32.mrf.mxu0  ;;  %2956 = vmatmul.msk.bf16.gmra.mxu1 %vm345_vm1, %v4218_v55 }
 0x195   : > { %2973 = vmatmul.msk.bf16.gmra.mxu2 %vm345_vm1, %v4221_v13  ;;  %v3920_v45 = vadd.f32 %v1644_v47, %v1486_v41 }
 0x196   : > { %2990 = vmatmul.msk.bf16.gmra.mxu3 %vm345_vm1, %v4223_v62 }
 0x197   : > { %4222 = vst [vmem:[#allocation22_spill] sm:$0xff] %v3920_v45  ;;  %3007 = vmatmul.msk.bf16.gmra.mxu0 %vm345_vm1, %v4225_v22 }
 0x198   : > { %v1249_v28 = vpop.f32.mrf.mxu2 }
 0x199   : > { %v1293_v6 = vadd.f32 %v1249_v28, %v926_v12  ;;  %v1443_v56 = vpop.f32.mrf.mxu3  ;;  %v884_v46 = vpop.f32.mrf.mxu1  ;;  %v4230_v12 = vld [vmem:[#allocation16_spill] sm:$0xff] }
 0x19a   : > { %v927_v7 = vadd.f32 %v884_v46, %v4227_v1 }
 0x19b   : > { %v1487_v4 = vadd.f32 %v1443_v56, %v1293_v6  ;;  %v4232_v6 = vld [vmem:[#allocation19_spill] sm:$0xff] }
 0x19c   : > { %v1649_v39 = vpop.f32.mrf.mxu0 }
 0x19d   : > { %v3927_v55 = vadd.f32 %v1647_v40, %v1487_v4  ;;  %v4231_v40 = vld [vmem:[#allocation21_spill] sm:$0xff] }
 0x19f   : > { %4226 = vst [vmem:[#allocation3_spill] sm:$0xff] %v3927_v55 }
 0x1a0   : > { %v1251_v47 = vpop.f32.mrf.mxu2 }
 0x1a1   : > { %v1294_v41 = vadd.f32 %v1251_v47, %v927_v7  ;;  %v1445_v13 = vpop.f32.mrf.mxu3  ;;  %v887_v45 = vpop.f32.mrf.mxu1 }
 0x1a2   : > { %v928_v28 = vadd.f32 %v887_v45, %v4231_v40  ;;  %v4235_v45 = vld [vmem:[#allocation4_spill] sm:$0xff] }
 0x1a3   : > { %v1488_v62 = vadd.f32 %v1445_v13, %v1294_v41  ;;  %v4234_v41 = vld [vmem:[#allocation23_spill] sm:$0xff] }
 0x1a4   : > { %v1652_v50 = vpop.f32.mrf.mxu0  ;;  %2957 = vmatmul.msk.bf16.gmra.mxu1 %vm345_vm1, %v4225_v22 }
 0x1a5   : > { %2974 = vmatmul.msk.bf16.gmra.mxu2 %vm345_vm1, %v4228_v11  ;;  %v3934_v18 = vadd.f32 %v1649_v39, %v1488_v62 }
 0x1a6   : > { %2991 = vmatmul.msk.bf16.gmra.mxu3 %vm345_vm1, %v4230_v12 }
 0x1a7   : > { %4229 = vst [vmem:[#allocation9_spill] sm:$0xff] %v3934_v18  ;;  %3008 = vmatmul.msk.bf16.gmra.mxu0 %vm345_vm1, %v4232_v6 }
 0x1a8   : > { %v1254_v56 = vpop.f32.mrf.mxu2 }
 0x1a9   : > { %v1295_v46 = vadd.f32 %v1254_v56, %v928_v28  ;;  %v1448_v4 = vpop.f32.mrf.mxu3  ;;  %v889_v1 = vpop.f32.mrf.mxu1  ;;  %v4237_v28 = vld [vmem:[#allocation20_spill] sm:$0xff] }
 0x1aa   : > { %v929_v13 = vadd.f32 %v889_v1, %v4234_v41 }
 0x1ab   : > { %v1489_v7 = vadd.f32 %v1448_v4, %v1295_v46  ;;  %v4239_v46 = vld [vmem:[#allocation24_spill] sm:$0xff] }
 0x1ac   : > { %v1654_v47 = vpop.f32.mrf.mxu0 }
 0x1ad   : > { %v3941_v22 = vadd.f32 %v1652_v50, %v1489_v7  ;;  %v4238_v50 = vld [vmem:[#allocation26_spill] sm:$0xff] }
 0x1af   : > { %4233 = vst [vmem:[#allocation25_spill] sm:$0xff] %v3941_v22 }
 0x1b0   : > { %v1256_v39 = vpop.f32.mrf.mxu2 }
 0x1b1   : > { %v1296_v62 = vadd.f32 %v1256_v39, %v929_v13  ;;  %v1450_v11 = vpop.f32.mrf.mxu3  ;;  %v892_v18 = vpop.f32.mrf.mxu1 }
 0x1b2   : > { %v930_v56 = vadd.f32 %v892_v18, %v4238_v50  ;;  %v4241_v18 = vld [vmem:[#allocation6_spill] sm:$0xff] }
 0x1b3   : > { %v1490_v12 = vadd.f32 %v1450_v11, %v1296_v62  ;;  %v4240_v62 = vld [vmem:[#allocation28_spill] sm:$0xff] }
 0x1b4   : > { %v1657_v55 = vpop.f32.mrf.mxu0  ;;  %2958 = vmatmul.msk.bf16.gmra.mxu1 %vm345_vm1, %v4232_v6 }
 0x1b5   : > { %2975 = vmatmul.msk.bf16.gmra.mxu2 %vm345_vm1, %v4235_v45  ;;  %v3948_v40 = vadd.f32 %v1654_v47, %v1490_v12 }
 0x1b6   : > { %2992 = vmatmul.msk.bf16.gmra.mxu3 %vm345_vm1, %v4237_v28 }
 0x1b7   : > { %4236 = vst [vmem:[#allocation10_spill] sm:$0xff] %v3948_v40  ;;  %3009 = vmatmul.msk.bf16.gmra.mxu0 %vm345_vm1, %v4239_v46 }
 0x1b8   : > { %v1259_v4 = vpop.f32.mrf.mxu2 }
 0x1b9   : > { %v1297_v1 = vadd.f32 %v1259_v4, %v930_v56  ;;  %v1453_v7 = vpop.f32.mrf.mxu3  ;;  %v894_v41 = vpop.f32.mrf.mxu1 }
 0x1ba   : > { %v931_v11 = vadd.f32 %v894_v41, %v4240_v62 }
 0x1bb   : > { %v1491_v13 = vadd.f32 %v1453_v7, %v1297_v1 }
 0x1bc   : > { %v1659_v39 = vpop.f32.mrf.mxu0 }
 0x1bd   : > { %v3955_v6 = vadd.f32 %v1657_v55, %v1491_v13  ;;  %v4242_v55 = vld [vmem:[#allocation30_spill] sm:$0xff] }
 0x1c0   : > { %v1261_v47 = vpop.f32.mrf.mxu2 }
 0x1c1   : > { %v1298_v12 = vadd.f32 %v1261_v47, %v931_v11  ;;  %v1455_v45 = vpop.f32.mrf.mxu3  ;;  %v897_v40 = vpop.f32.mrf.mxu1  ;;  %v4243_v11 = vld [vmem:[#allocation32_spill] sm:$0xff] }
 0x1c2   : > { %v932_v56 = vadd.f32 %v897_v40, %v4242_v55 }
 0x1c3   : > { %v1492_v28 = vadd.f32 %v1455_v45, %v1298_v12 }
 0x1c4   : > { %v1662_v22 = vpop.f32.mrf.mxu0  ;;  %2959 = vmatmul.msk.bf16.gmra.mxu1 %vm345_vm1, %v4239_v46 }
 0x1c5   : > { %2976 = vmatmul.msk.bf16.gmra.mxu2 %vm345_vm1, %v4241_v18  ;;  %v3962_v50 = vadd.f32 %v1659_v39, %v1492_v28 }
 0x1c6   : > { %2993 = vmatmul.msk.bf16.gmra.mxu3 %vm345_vm1, %v3606_v10 }
 0x1c7   : > { %3010 = vmatmul.msk.bf16.gmra.mxu0 %vm345_vm1, %v3635_v25 }
 0x1c8   : > { %v1264_v4 = vpop.f32.mrf.mxu2 }
 0x1c9   : > { %v1299_v1 = vadd.f32 %v1264_v4, %v932_v56  ;;  %v1458_v7 = vpop.f32.mrf.mxu3  ;;  %v899_v41 = vpop.f32.mrf.mxu1 }
 0x1ca   : > { %v933_v47 = vadd.f32 %v899_v41, %v4243_v11 }
 0x1cb   : > { %v1493_v13 = vadd.f32 %v1458_v7, %v1299_v1 }
 0x1cc   : > { %v1664_v62 = vpop.f32.mrf.mxu0 }
 0x1cd   : > { %v3969_v46 = vadd.f32 %v1662_v22, %v1493_v13  ;;  %v3987_v13 = vld [vmem:[%s4149_s2] ss:$0 sm:$0xff] }
 0x1d0   : > { %v1266_v39 = vpop.f32.mrf.mxu2 }
 0x1d1   : > { %v1300_v12 = vadd.f32 %v1266_v39, %v933_v47  ;;  %v1460_v45 = vpop.f32.mrf.mxu3  ;;  %v1788_v28 = vpop.f32.mrf.mxu1 }
 0x1d2   : > { %v1868_v22 = vadd.f32 %v1788_v28, %v3682_v60 }
 0x1d3   : > { %v1494_v10 = vadd.f32 %v1460_v45, %v1300_v12 }
 0x1d4   : > { %v2387_v18 = vpop.f32.mrf.mxu0  ;;  %2960 = vmatmul.msk.bf16.gmra.mxu1 %vm345_vm1, %v3635_v25 }
 0x1d5   : > { %2977 = vmatmul.msk.bf16.gmra.mxu2 %vm345_vm1, %v3322_v43  ;;  %v3976_v40 = vadd.f32 %v1664_v62, %v1494_v10 }
 0x1d6   : > { %2994 = vmatmul.msk.bf16.gmra.mxu3 %vm345_vm1, %v3643_v51 }
 0x1d7   : > { %3011 = vmatmul.msk.bf16.gmra.mxu0 %vm345_vm1, %v3669_v37 }
 0x1d8   : > { %v1982_v55 = vpop.f32.mrf.mxu2 }
 0x1d9   : > { %v2062_v56 = vadd.f32 %v1982_v55, %v1868_v22  ;;  %v2186_v4 = vpop.f32.mrf.mxu3  ;;  %v1790_v1 = vpop.f32.mrf.mxu1 }
 0x1da   : > { %v1869_v41 = vadd.f32 %v1790_v1, %v3700_v9 }
 0x1db   : > { %v2266_v7 = vadd.f32 %v2186_v4, %v2062_v56 }
 0x1dc   : > { %v2389_v25 = vpop.f32.mrf.mxu0 }
 0x1dd   : > { %v2467_v43 = vadd.f32 %v2387_v18, %v2266_v7 }
 0x1df   : > { %v2567_v39 = vadd.f32 %v3987_v13, %v2467_v43 }
 0x1e0   : > { %v1984_v51 = vpop.f32.mrf.mxu2 }
 0x1e1   : > { %v2063_v60 = vadd.f32 %v1984_v51, %v1869_v41  ;;  %v2188_v62 = vpop.f32.mrf.mxu3  ;;  %v1793_v11 = vpop.f32.mrf.mxu1  ;;  %v2700_v10 = vmul.f32 %v2567_v39, %v2567_v39 }
 0x1e2   : > { %v1870_v28 = vadd.f32 %v1793_v11, %v3709_v31 }
 0x1e3   : > { %v2267_v47 = vadd.f32 %v2188_v62, %v2063_v60 }
 0x1e4   : > { %v2392_v12 = vpop.f32.mrf.mxu0  ;;  %2961 = vmatmul.msk.bf16.gmra.mxu1 %vm345_vm1, %v3669_v37 }
 0x1e5   : > { %v2468_v45 = vadd.f32 %v2389_v25, %v2267_v47  ;;  %2978 = vmatmul.msk.bf16.gmra.mxu2 %vm345_vm1, %v3386_v63 }
 0x1e6   : > { %2995 = vmatmul.msk.bf16.gmra.mxu3 %vm345_vm1, %v3677_v33 }
 0x1e7   : > { %v2568_v9 = vadd.f32 %v3987_v13, %v2468_v45  ;;  %3012 = vmatmul.msk.bf16.gmra.mxu0 %vm345_vm1, %v3694_v57 }
 0x1e8   : > { %v1987_v37 = vpop.f32.mrf.mxu2 }
 0x1e9   : > { %v3025_v18 = vpack.c.bf16 %v2568_v9, %v2567_v39  ;;  %v2663_v63 = vadd.f32 %v2568_v9, %v2567_v39  ;;  %v2701_v22 = vmul.f32 %v2568_v9, %v2568_v9  ;;  %v2064_v55 = vadd.f32 %v1987_v37, %v1870_v28  ;;  %v2191_v33 = vpop.f32.mrf.mxu3  ;;  %v1795_v56 = vpop.f32.mrf.mxu1 }
 0x1ea   : > { %v1871_v41 = vadd.f32 %v1795_v56, %v3727_v17 }
 0x1eb   : > { %3026 = vst [vmem:[%s4004_s20] sm:$0xff] %v3025_v18   ;;  %v2732_v4 = vadd.f32 %v2701_v22, %v2700_v10  ;;  %v2268_v31 = vadd.f32 %v2191_v33, %v2064_v55 }
 0x1ec   : > { %v2394_v1 = vpop.f32.mrf.mxu0 }
 0x1ed   : > { %v2469_v7 = vadd.f32 %v2392_v12, %v2268_v31  ;;  %v4244_v31 = vld [vmem:[#allocation33_spill] sm:$0xff] }
 0x1ef   : > { %v2569_v25 = vadd.f32 %v3987_v13, %v2469_v7 }
 0x1f0   : > { %v1989_v43 = vpop.f32.mrf.mxu2 }
 0x1f1   : > { %v2664_v51 = vadd.f32 %v2663_v63, %v2569_v25  ;;  %v2702_v60 = vmul.f32 %v2569_v25, %v2569_v25  ;;  %v2065_v62 = vadd.f32 %v1989_v43, %v1871_v41  ;;  %v2193_v11 = vpop.f32.mrf.mxu3  ;;  %v1798_v47 = vpop.f32.mrf.mxu1 }
 0x1f2   : > { %v1872_v12 = vadd.f32 %v1798_v47, %v3736_v29 }
 0x1f3   : > { %v2733_v39 = vadd.f32 %v2732_v4, %v2702_v60  ;;  %v2269_v45 = vadd.f32 %v2193_v11, %v2065_v62 }
 0x1f4   : > { %v2397_v9 = vpop.f32.mrf.mxu0  ;;  %2962 = vmatmul.msk.bf16.gmra.mxu1 %vm345_vm1, %v3694_v57 }
 0x1f5   : > { %v2470_v28 = vadd.f32 %v2394_v1, %v2269_v45  ;;  %2979 = vmatmul.msk.bf16.gmra.mxu2 %vm345_vm1, %v3235_v20 }
 0x1f6   : > { %2996 = vmatmul.msk.bf16.gmra.mxu3 %vm345_vm1, %v3704_v53 }
 0x1f7   : > { %v2570_v17 = vadd.f32 %v3987_v13, %v2470_v28  ;;  %3013 = vmatmul.msk.bf16.gmra.mxu0 %vm345_vm1, %v3721_v16 }
 0x1f8   : > { %v1992_v10 = vpop.f32.mrf.mxu2 }
 0x1f9   : > { %v3030_v37 = vpack.c.bf16 %v2570_v17, %v2569_v25  ;;  %v2665_v18 = vadd.f32 %v2664_v51, %v2570_v17  ;;  %v2703_v63 = vmul.f32 %v2570_v17, %v2570_v17  ;;  %v2066_v22 = vadd.f32 %v1992_v10, %v1872_v12  ;;  %v2196_v57 = vpop.f32.mrf.mxu3  ;;  %v1800_v55 = vpop.f32.mrf.mxu1 }
 0x1fa   : > { %v1873_v1 = vadd.f32 %v1800_v55, %v4244_v31 }
 0x1fb   : > { %3102 = vst [vmem:[%s4004_s20 + $0x8] sm:$0xff] %v3030_v37   ;;  %v2734_v33 = vadd.f32 %v2733_v39, %v2703_v63  ;;  %v2270_v20 = vadd.f32 %v2196_v57, %v2066_v22 }
 0x1fc   : > { %v2399_v56 = vpop.f32.mrf.mxu0 }
 0x1fd   : > { %v2471_v4 = vadd.f32 %v2397_v9, %v2270_v20 }
 0x1ff   : > { %v2571_v53 = vadd.f32 %v3987_v13, %v2471_v4 }
 0x200   : > { %v1994_v29 = vpop.f32.mrf.mxu2 }
 0x201   : > { %v2666_v7 = vadd.f32 %v2665_v18, %v2571_v53  ;;  %v2704_v41 = vmul.f32 %v2571_v53, %v2571_v53  ;;  %v2067_v43 = vadd.f32 %v1994_v29, %v1873_v1  ;;  %v2198_v60 = vpop.f32.mrf.mxu3  ;;  %v1803_v25 = vpop.f32.mrf.mxu1 }
 0x202   : > { %v1874_v45 = vadd.f32 %v1803_v25, %v3763_v8  ;;  %v1731_v8 = vrot.slane %v3824_v48, 2 }
 0x203   : > { %v2735_v51 = vadd.f32 %v2734_v33, %v2704_v41  ;;  %v2271_v62 = vadd.f32 %v2198_v60, %v2067_v43  ;;  %v1732_v33 = vrot.slane %v3827_v59, 2 }
 0x204   : > { %v2402_v11 = vpop.f32.mrf.mxu0  ;;  %2963 = vmatmul.msk.bf16.gmra.mxu1 %vm345_vm1, %v3721_v16 }
 0x205   : > { %v2472_v47 = vadd.f32 %v2399_v56, %v2271_v62  ;;  %2980 = vmatmul.msk.bf16.gmra.mxu2 %vm345_vm1, %v3278_v32 }
 0x206   : > { %2997 = vmatmul.msk.bf16.gmra.mxu3 %vm345_vm1, %v3731_v5 }
 0x207   : > { %v2572_v39 = vadd.f32 %v3987_v13, %v2472_v47  ;;  %3014 = vmatmul.msk.bf16.gmra.mxu0 %vm345_vm1, %v3748_v27 }
 0x208   : > { %v1997_v9 = vpop.f32.mrf.mxu2 }
 0x209   : > { %v3035_v28 = vpack.c.bf16 %v2572_v39, %v2571_v53  ;;  %v2667_v17 = vadd.f32 %v2666_v7, %v2572_v39  ;;  %v2705_v12 = vmul.f32 %v2572_v39, %v2572_v39  ;;  %v2068_v10 = vadd.f32 %v1997_v9, %v1874_v45  ;;  %v2201_v16 = vpop.f32.mrf.mxu3  ;;  %v1805_v37 = vpop.f32.mrf.mxu1 }
 0x20a   : > { %v1875_v57 = vadd.f32 %v1805_v37, %v3780_v15  ;;  %v1734_v7 = vrot.slane %v3830_v61, 2  ;;  %v1733_v15 = vsel %vm966_vm3, %v1731_v8, %v1732_v33 }
 0x20b   : > { %3103 = vst [vmem:[%s4004_s20 + $0x10] sm:$0xff] %v3035_v28   ;;  %v2736_v18 = vadd.f32 %v2735_v51, %v2705_v12  ;;  %v2272_v32 = vadd.f32 %v2201_v16, %v2068_v10 }
 0x20c   : > { %v2404_v63 = vpop.f32.mrf.mxu0  ;;  %v1735_v48 = vsel %vm966_vm3, %v1732_v33, %v1734_v7 }
 0x20d   : > { %v2473_v22 = vadd.f32 %v2402_v11, %v2272_v32  ;;  %v4046_v59 = vpack.c.bf16 %v1735_v48, %v1733_v15 }
 0x20f   : > { %v2573_v5 = vadd.f32 %v3987_v13, %v2473_v22 }
 0x210   : > { %v1999_v55 = vpop.f32.mrf.mxu2 }
 0x211   : > { %v2668_v20 = vadd.f32 %v2667_v17, %v2573_v5  ;;  %v2706_v56 = vmul.f32 %v2573_v5, %v2573_v5  ;;  %v2069_v4 = vadd.f32 %v1999_v55, %v1875_v57  ;;  %v2203_v53 = vpop.f32.mrf.mxu3  ;;  %v1808_v31 = vpop.f32.mrf.mxu1 }
 0x212   : > { %v1876_v60 = vadd.f32 %v1808_v31, %v3789_v24 }
 0x213   : > { %v2737_v1 = vadd.f32 %v2736_v18, %v2706_v56  ;;  %v2273_v29 = vadd.f32 %v2203_v53, %v2069_v4 }
 0x214   : > { %v2407_v41 = vpop.f32.mrf.mxu0  ;;  %2964 = vmatmul.msk.bf16.gmra.mxu1 %vm345_vm1, %v3748_v27 }
 0x215   : > { %v2474_v43 = vadd.f32 %v2404_v63, %v2273_v29  ;;  %2981 = vmatmul.msk.bf16.gmra.mxu2 %vm345_vm1, %v3326_v44  ;;  %v4245_v29 = vld [vmem:[#allocation34_spill] sm:$0xff] }
 0x216   : > { %2998 = vmatmul.msk.bf16.gmra.mxu3 %vm345_vm1, %v3758_v2 }
 0x217   : > { %v2574_v61 = vadd.f32 %v3987_v13, %v2474_v43  ;;  %3015 = vmatmul.msk.bf16.gmra.mxu0 %vm345_vm1, %v3774_v38 }
 0x218   : > { %v2002_v27 = vpop.f32.mrf.mxu2 }
 0x219   : > { %v3040_v25 = vpack.c.bf16 %v2574_v61, %v2573_v5  ;;  %v2669_v51 = vadd.f32 %v2668_v20, %v2574_v61  ;;  %v2707_v44 = vmul.f32 %v2574_v61, %v2574_v61  ;;  %v2070_v62 = vadd.f32 %v2002_v27, %v1876_v60  ;;  %v2206_v11 = vpop.f32.mrf.mxu3  ;;  %v1810_v47 = vpop.f32.mrf.mxu1 }
 0x21a   : > { %v1877_v17 = vadd.f32 %v1810_v47, %v3802_v58 }
 0x21b   : > { %3104 = vst [vmem:[%s4004_s20 + $0x18] sm:$0xff] %v3040_v25   ;;  %v2738_v39 = vadd.f32 %v2737_v1, %v2707_v44  ;;  %v2274_v45 = vadd.f32 %v2206_v11, %v2070_v62  ;;  %v261_v11 = vld [vmem:[%s3197_s30 + $0x198] sm:$0xff] }
 0x21c   : > { %v2409_v2 = vpop.f32.mrf.mxu0 }
 0x21d   : > { %v2475_v9 = vadd.f32 %v2407_v41, %v2274_v45  ;;  %v263_v45 = vld [vmem:[%s3197_s30 + $0x1a8] sm:$0x3] }
 0x21f   : > { %v2575_v28 = vadd.f32 %v3987_v13, %v2475_v9 }
 0x220   : > { %v2004_v24 = vpop.f32.mrf.mxu2 }
 0x221   : > { %v2670_v12 = vadd.f32 %v2669_v51, %v2575_v28  ;;  %v2708_v10 = vmul.f32 %v2575_v28, %v2575_v28  ;;  %v2071_v16 = vadd.f32 %v2004_v24, %v1877_v17  ;;  %v2208_v37 = vpop.f32.mrf.mxu3  ;;  %v1813_v18 = vpop.f32.mrf.mxu1  ;;  %v2129_v24 = vrot.slane %v261_v11, 1 }
 0x222   : > { %v1878_v57 = vadd.f32 %v1813_v18, %v3809_v42 }
 0x223   : > { %v2739_v32 = vadd.f32 %v2738_v39, %v2708_v10  ;;  %v2275_v63 = vadd.f32 %v2208_v37, %v2071_v16  ;;  %v262_v39 = vld [vmem:[%s3197_s30 + $0x1a0] sm:$0xff]  ;;  %v2132_v16 = vrot.slane %v263_v45, 1  ;;  %v2330_v37 = vrot.slane %v261_v11, 2 }
 0x224   : > { %v2412_v22 = vpop.f32.mrf.mxu0  ;;  %2965 = vmatmul.msk.bf16.gmra.mxu1 %vm345_vm1, %v3774_v38  ;;  %v2130_v10 = vrot.slane %v262_v39, 1  ;;  %v2331_v18 = vrot.slane %v262_v39, 2 }
 0x225   : > { %v2476_v5 = vadd.f32 %v2409_v2, %v2275_v63  ;;  %2982 = vmatmul.msk.bf16.gmra.mxu2 %vm345_vm1, %v3390_v0 }
 0x226   : > { %2999 = vmatmul.msk.bf16.gmra.mxu3 %vm345_vm1, %v3784_v21 }
 0x227   : > { %v2576_v58 = vadd.f32 %v3987_v13, %v2476_v5  ;;  %3016 = vmatmul.msk.bf16.gmra.mxu0 %vm345_vm1, %v3798_v52  ;;  %v4246_v5 = vld [vmem:[#allocation35_spill] sm:$0xff] }
 0x228   : > { %v2007_v8 = vpop.f32.mrf.mxu2 }
 0x229   : > { %v3045_v55 = vpack.c.bf16 %v2576_v58, %v2575_v28  ;;  %v2671_v33 = vadd.f32 %v2670_v12, %v2576_v58  ;;  %v2709_v20 = vmul.f32 %v2576_v58, %v2576_v58  ;;  %v2072_v56 = vadd.f32 %v2007_v8, %v1878_v57  ;;  %v2211_v38 = vpop.f32.mrf.mxu3  ;;  %v1815_v4 = vpop.f32.mrf.mxu1 }
 0x22a   : > { %v1879_v7 = vadd.f32 %v1815_v4, %v4245_v29  ;;  %v2131_v57 = vsel %vm599_vm2, %v2129_v24, %v2130_v10  ;;  %v2133_v8 = vsel %vm599_vm2, %v2130_v10, %v2132_v16 }
 0x22b   : > { %3105 = vst [vmem:[%s4004_s20 + $0x20] sm:$0xff] %v3045_v55   ;;  %v2740_v53 = vadd.f32 %v2739_v32, %v2709_v20  ;;  %v2276_v0 = vadd.f32 %v2211_v38, %v2072_v56  ;;  %v2333_v32 = vrot.slane %v263_v45, 2 }
 0x22c   : > { %v2414_v31 = vpop.f32.mrf.mxu0 }
 0x22d   : > { %v2477_v1 = vadd.f32 %v2412_v22, %v2276_v0  ;;  %v2334_v20 = vsel %vm966_vm3, %v2331_v18, %v2333_v32 }
 0x22f   : > { %v2577_v21 = vadd.f32 %v3987_v13, %v2477_v1  ;;  %v2168_v1 = vpack.c.bf16 %v2133_v8, %v2131_v57 }
 0x230   : > { %v2009_v42 = vpop.f32.mrf.mxu2 }
 0x231   : > { %v2672_v41 = vadd.f32 %v2671_v33, %v2577_v21  ;;  %v2710_v43 = vmul.f32 %v2577_v21, %v2577_v21  ;;  %v2073_v15 = vadd.f32 %v2009_v42, %v1879_v7  ;;  %v2213_v48 = vpop.f32.mrf.mxu3  ;;  %v1818_v61 = vpop.f32.mrf.mxu1  ;;  %v2332_v33 = vsel %vm966_vm3, %v2330_v37, %v2331_v18 }
 0x232   : > { %v1880_v62 = vadd.f32 %v1818_v61, %v3835_v14  ;;  %v2369_v7 = vpack.c.bf16 %v2334_v20, %v2332_v33 }
 0x233   : > { %v2741_v60 = vadd.f32 %v2740_v53, %v2710_v43  ;;  %v2277_v27 = vadd.f32 %v2213_v48, %v2073_v15 }
 0x234   : > { %v2417_v25 = vpop.f32.mrf.mxu0  ;;  %2966 = vmatmul.msk.bf16.gmra.mxu1 %vm345_vm1, %v3798_v52 }
 0x235   : > { %v2478_v51 = vadd.f32 %v2414_v31, %v2277_v27  ;;  %2983 = vmatmul.msk.bf16.gmra.mxu2 %vm345_vm1, %v3842_v54  ;;  %v1964_v31 = vpack.c.bf16 %v262_v39, %v261_v11 }
 0x236   : > { %3000 = vmatmul.msk.bf16.gmra.mxu3 %vm345_vm1, %v3844_v35 }
 0x237   : > { %v2578_v44 = vadd.f32 %v3987_v13, %v2478_v51  ;;  %3017 = vmatmul.msk.bf16.gmra.mxu0 %vm345_vm1, %v4046_v59 }
 0x238   : > { %v2012_v47 = vpop.f32.mrf.mxu2 }
 0x239   : > { %v3050_v52 = vpack.c.bf16 %v2578_v44, %v2577_v21  ;;  %v2673_v2 = vadd.f32 %v2672_v41, %v2578_v44  ;;  %v2711_v9 = vmul.f32 %v2578_v44, %v2578_v44  ;;  %v2074_v28 = vadd.f32 %v2012_v47, %v1880_v62  ;;  %v2216_v54 = vpop.f32.mrf.mxu3  ;;  %v1820_v17 = vpop.f32.mrf.mxu1 }
 0x23a   : > { %v1881_v58 = vadd.f32 %v1820_v17, %v4246_v5 }
 0x23b   : > { %3106 = vst [vmem:[%s4004_s20 + $0x28] sm:$0xff] %v3050_v52   ;;  %v2742_v35 = vadd.f32 %v2741_v60, %v2711_v9  ;;  %v2278_v12 = vadd.f32 %v2216_v54, %v2074_v28 }
 0x23c   : > { %v2419_v14 = vpop.f32.mrf.mxu0 }
 0x23d   : > { %v2479_v63 = vadd.f32 %v2417_v25, %v2278_v12 }
 0x23f   : > { %v2579_v22 = vadd.f32 %v3987_v13, %v2479_v63 }
 0x240   : > { %v2014_v55 = vpop.f32.mrf.mxu2 }
 0x241   : > { %v2674_v56 = vadd.f32 %v2673_v2, %v2579_v22  ;;  %v2712_v38 = vmul.f32 %v2579_v22, %v2579_v22  ;;  %v2075_v4 = vadd.f32 %v2014_v55, %v1881_v58  ;;  %v2218_v53 = vpop.f32.mrf.mxu3  ;;  %v1823_v0 = vpop.f32.mrf.mxu1 }
 0x242   : > { %v1882_v15 = vadd.f32 %v1823_v0, %v3857_v36 }
 0x243   : > { %v2743_v21 = vadd.f32 %v2742_v35, %v2712_v38  ;;  %v2279_v29 = vadd.f32 %v2218_v53, %v2075_v4 }
 0x244   : > { %v2422_v42 = vpop.f32.mrf.mxu0  ;;  %2967 = vmatmul.msk.bf16.gmra.mxu1 %vm345_vm1, %v4046_v59 }
 0x245   : > { %v2480_v41 = vadd.f32 %v2419_v14, %v2279_v29  ;;  %2984 = vmatmul.msk.bf16.gmra.mxu2 %vm345_vm1, %v1964_v31 }
 0x246   : > { %3001 = vmatmul.msk.bf16.gmra.mxu3 %vm345_vm1, %v2168_v1 }
 0x247   : > { %v2580_v43 = vadd.f32 %v3987_v13, %v2480_v41  ;;  %3018 = vmatmul.msk.bf16.gmra.mxu0 %vm345_vm1, %v2369_v7 }
 0x248   : > { %v2017_v48 = vpop.f32.mrf.mxu2 }
 0x249   : > { %v3055_v61 = vpack.c.bf16 %v2580_v43, %v2579_v22  ;;  %v2675_v60 = vadd.f32 %v2674_v56, %v2580_v43  ;;  %v2713_v27 = vmul.f32 %v2580_v43, %v2580_v43  ;;  %v2076_v25 = vadd.f32 %v2017_v48, %v1882_v15  ;;  %v2221_v51 = vpop.f32.mrf.mxu3  ;;  %v1825_v44 = vpop.f32.mrf.mxu1 }
 0x24a   : > { %v1883_v45 = vadd.f32 %v1825_v44, %v3864_v34 }
 0x24b   : > { %3107 = vst [vmem:[%s4004_s20 + $0x30] sm:$0xff] %v3055_v61   ;;  %v2744_v59 = vadd.f32 %v2743_v21, %v2713_v27  ;;  %v2280_v62 = vadd.f32 %v2221_v51, %v2076_v25 }
 0x24c   : > { %v2424_v11 = vpop.f32.mrf.mxu0 }
 0x24d   : > { %v2481_v47 = vadd.f32 %v2422_v42, %v2280_v62 }
 0x24f   : > { %v2581_v39 = vadd.f32 %v3987_v13, %v2481_v47 }
 0x250   : > { %v2019_v52 = vpop.f32.mrf.mxu2 }
 0x251   : > { %v2676_v36 = vadd.f32 %v2675_v60, %v2581_v39  ;;  %v2714_v2 = vmul.f32 %v2581_v39, %v2581_v39  ;;  %v2077_v9 = vadd.f32 %v2019_v52, %v1883_v45  ;;  %v2223_v28 = vpop.f32.mrf.mxu3  ;;  %v1828_v54 = vpop.f32.mrf.mxu1 }
 0x252   : > { %v1884_v16 = vadd.f32 %v1828_v54, %v3871_v30 }
 0x253   : > { %v2745_v17 = vadd.f32 %v2744_v59, %v2714_v2  ;;  %v2281_v24 = vadd.f32 %v2223_v28, %v2077_v9 }
 0x254   : > { %v2427_v35 = vpop.f32.mrf.mxu0 }
 0x255   : > { %v2482_v12 = vadd.f32 %v2424_v11, %v2281_v24 }
 0x257   : > { %v2582_v10 = vadd.f32 %v3987_v13, %v2482_v12 }
 0x258   : > { %v2022_v14 = vpop.f32.mrf.mxu2 }
 0x259   : > { %v3060_v37 = vpack.c.bf16 %v2582_v10, %v2581_v39  ;;  %v2677_v18 = vadd.f32 %v2676_v36, %v2582_v10  ;;  %v2715_v32 = vmul.f32 %v2582_v10, %v2582_v10  ;;  %v2078_v34 = vadd.f32 %v2022_v14, %v1884_v16  ;;  %v2226_v63 = vpop.f32.mrf.mxu3  ;;  %v1830_v22 = vpop.f32.mrf.mxu1 }
 0x25a   : > { %v1885_v33 = vadd.f32 %v1830_v22, %v3878_v3 }
 0x25b   : > { %3108 = vst [vmem:[%s4004_s20 + $0x38] sm:$0xff] %v3060_v37   ;;  %v2746_v5 = vadd.f32 %v2745_v17, %v2715_v32  ;;  %v2282_v58 = vadd.f32 %v2226_v63, %v2078_v34 }
 0x25c   : > { %v2429_v57 = vpop.f32.mrf.mxu0 }
 0x25d   : > { %v2483_v8 = vadd.f32 %v2427_v35, %v2282_v58 }
 0x25f   : > { %v2583_v55 = vadd.f32 %v3987_v13, %v2483_v8 }
 0x260   : > { %v2024_v20 = vpop.f32.mrf.mxu2 }
 0x261   : > { %v2678_v56 = vadd.f32 %v2677_v18, %v2583_v55  ;;  %v2716_v38 = vmul.f32 %v2583_v55, %v2583_v55  ;;  %v2079_v30 = vadd.f32 %v2024_v20, %v1885_v33  ;;  %v2228_v4 = vpop.f32.mrf.mxu3  ;;  %v1833_v53 = vpop.f32.mrf.mxu1 }
 0x262   : > { %v1886_v7 = vadd.f32 %v1833_v53, %v3885_v49 }
 0x263   : > { %v2747_v0 = vadd.f32 %v2746_v5, %v2716_v38  ;;  %v2283_v31 = vadd.f32 %v2228_v4, %v2079_v30  ;;  %v4247_v30 = vld [vmem:[#allocation12_spill] sm:$0xff] }
 0x264   : > { %v2432_v1 = vpop.f32.mrf.mxu0 }
 0x265   : > { %v2484_v21 = vadd.f32 %v2429_v57, %v2283_v31 }
 0x267   : > { %v2584_v29 = vadd.f32 %v3987_v13, %v2484_v21 }
 0x268   : > { %v2027_v42 = vpop.f32.mrf.mxu2 }
 0x269   : > { %v3065_v41 = vpack.c.bf16 %v2584_v29, %v2583_v55  ;;  %v2679_v43 = vadd.f32 %v2678_v56, %v2584_v29  ;;  %v2717_v15 = vmul.f32 %v2584_v29, %v2584_v29  ;;  %v2080_v3 = vadd.f32 %v2027_v42, %v1886_v7  ;;  %v2231_v48 = vpop.f32.mrf.mxu3  ;;  %v1835_v61 = vpop.f32.mrf.mxu1 }
 0x26a   : > { %v1887_v59 = vadd.f32 %v1835_v61, %v3892_v26 }
 0x26b   : > { %3109 = vst [vmem:[%s4004_s20 + $0x40] sm:$0xff] %v3065_v41   ;;  %v2748_v60 = vadd.f32 %v2747_v0, %v2717_v15  ;;  %v2284_v27 = vadd.f32 %v2231_v48, %v2080_v3  ;;  %v4248_v3 = vld [vmem:[#allocation22_spill] sm:$0xff] }
 0x26c   : > { %v2434_v25 = vpop.f32.mrf.mxu0 }
 0x26d   : > { %v2485_v51 = vadd.f32 %v2432_v1, %v2284_v27 }
 0x26f   : > { %v2585_v44 = vadd.f32 %v3987_v13, %v2485_v51 }
 0x270   : > { %v2029_v62 = vpop.f32.mrf.mxu2 }
 0x271   : > { %v2680_v11 = vadd.f32 %v2679_v43, %v2585_v44  ;;  %v2718_v47 = vmul.f32 %v2585_v44, %v2585_v44  ;;  %v2081_v49 = vadd.f32 %v2029_v62, %v1887_v59  ;;  %v2233_v39 = vpop.f32.mrf.mxu3  ;;  %v1838_v45 = vpop.f32.mrf.mxu1 }
 0x272   : > { %v1888_v54 = vadd.f32 %v1838_v45, %v3899_v19 }
 0x273   : > { %v2749_v52 = vadd.f32 %v2748_v60, %v2718_v47  ;;  %v2285_v36 = vadd.f32 %v2233_v39, %v2081_v49  ;;  %v4249_v39 = vld [vmem:[#allocation3_spill] sm:$0xff] }
 0x274   : > { %v2437_v2 = vpop.f32.mrf.mxu0 }
 0x275   : > { %v2486_v9 = vadd.f32 %v2434_v25, %v2285_v36 }
 0x277   : > { %v2586_v28 = vadd.f32 %v3987_v13, %v2486_v9 }
 0x278   : > { %v2032_v17 = vpop.f32.mrf.mxu2 }
 0x279   : > { %v3070_v24 = vpack.c.bf16 %v2586_v28, %v2585_v44  ;;  %v2681_v35 = vadd.f32 %v2680_v11, %v2586_v28  ;;  %v2719_v12 = vmul.f32 %v2586_v28, %v2586_v28  ;;  %v2082_v26 = vadd.f32 %v2032_v17, %v1888_v54  ;;  %v2236_v10 = vpop.f32.mrf.mxu3  ;;  %v1840_v16 = vpop.f32.mrf.mxu1 }
 0x27a   : > { %v1889_v63 = vadd.f32 %v1840_v16, %v3906_v23  ;;  %v4250_v16 = vld [vmem:[#allocation9_spill] sm:$0xff] }
 0x27b   : > { %3110 = vst [vmem:[%s4004_s20 + $0x48] sm:$0xff] %v3070_v24   ;;  %v2750_v14 = vadd.f32 %v2749_v52, %v2719_v12  ;;  %v2286_v37 = vadd.f32 %v2236_v10, %v2082_v26 }
 0x27c   : > { %v2439_v18 = vpop.f32.mrf.mxu0 }
 0x27d   : > { %v2487_v32 = vadd.f32 %v2437_v2, %v2286_v37 }
 0x27f   : > { %v2587_v34 = vadd.f32 %v3987_v13, %v2487_v32 }
 0x280   : > { %v2034_v22 = vpop.f32.mrf.mxu2 }
 0x281   : > { %v2682_v5 = vadd.f32 %v2681_v35, %v2587_v34  ;;  %v2720_v58 = vmul.f32 %v2587_v34, %v2587_v34  ;;  %v2083_v19 = vadd.f32 %v2034_v22, %v1889_v63  ;;  %v2238_v57 = vpop.f32.mrf.mxu3  ;;  %v1843_v8 = vpop.f32.mrf.mxu1 }
 0x282   : > { %v1890_v4 = vadd.f32 %v1843_v8, %v4247_v30 }
 0x283   : > { %v2751_v55 = vadd.f32 %v2750_v14, %v2720_v58  ;;  %v2287_v33 = vadd.f32 %v2238_v57, %v2083_v19 }
 0x284   : > { %v2442_v20 = vpop.f32.mrf.mxu0 }
 0x285   : > { %v2488_v56 = vadd.f32 %v2439_v18, %v2287_v33 }
 0x287   : > { %v2588_v38 = vadd.f32 %v3987_v13, %v2488_v56 }
 0x288   : > { %v2037_v53 = vpop.f32.mrf.mxu2 }
 0x289   : > { %v3075_v0 = vpack.c.bf16 %v2588_v38, %v2587_v34  ;;  %v2683_v31 = vadd.f32 %v2682_v5, %v2588_v38  ;;  %v2721_v1 = vmul.f32 %v2588_v38, %v2588_v38  ;;  %v2084_v23 = vadd.f32 %v2037_v53, %v1890_v4  ;;  %v2241_v21 = vpop.f32.mrf.mxu3  ;;  %v1845_v29 = vpop.f32.mrf.mxu1 }
 0x28a   : > { %v1891_v48 = vadd.f32 %v1845_v29, %v4248_v3 }
 0x28b   : > { %3111 = vst [vmem:[%s4004_s20 + $0x50] sm:$0xff] %v3075_v0   ;;  %v2752_v7 = vadd.f32 %v2751_v55, %v2721_v1  ;;  %v2288_v42 = vadd.f32 %v2241_v21, %v2084_v23  ;;  %v4251_v55 = vld [vmem:[#allocation25_spill] sm:$0xff] }
 0x28c   : > { %v2444_v41 = vpop.f32.mrf.mxu0 }
 0x28d   : > { %v2489_v43 = vadd.f32 %v2442_v20, %v2288_v42 }
 0x28f   : > { %v2589_v15 = vadd.f32 %v3987_v13, %v2489_v43 }
 0x290   : > { %v2039_v61 = vpop.f32.mrf.mxu2 }
 0x291   : > { %v2684_v60 = vadd.f32 %v2683_v31, %v2589_v15  ;;  %v2722_v27 = vmul.f32 %v2589_v15, %v2589_v15  ;;  %v2085_v25 = vadd.f32 %v2039_v61, %v1891_v48  ;;  %v2243_v51 = vpop.f32.mrf.mxu3  ;;  %v1848_v44 = vpop.f32.mrf.mxu1 }
 0x292   : > { %v1892_v45 = vadd.f32 %v1848_v44, %v4249_v39 }
 0x293   : > { %v2753_v59 = vadd.f32 %v2752_v7, %v2722_v27  ;;  %v2289_v62 = vadd.f32 %v2243_v51, %v2085_v25  ;;  %v4252_v7 = vld [vmem:[#allocation10_spill] sm:$0xff] }
 0x294   : > { %v2447_v11 = vpop.f32.mrf.mxu0 }
 0x295   : > { %v2490_v47 = vadd.f32 %v2444_v41, %v2289_v62 }
 0x297   : > { %v2590_v49 = vadd.f32 %v3987_v13, %v2490_v47 }
 0x298   : > { %v2042_v52 = vpop.f32.mrf.mxu2 }
 0x299   : > { %v3080_v36 = vpack.c.bf16 %v2590_v49, %v2589_v15  ;;  %v2685_v2 = vadd.f32 %v2684_v60, %v2590_v49  ;;  %v2723_v9 = vmul.f32 %v2590_v49, %v2590_v49  ;;  %v2086_v28 = vadd.f32 %v2042_v52, %v1892_v45  ;;  %v2246_v54 = vpop.f32.mrf.mxu3  ;;  %v1850_v17 = vpop.f32.mrf.mxu1 }
 0x29a   : > { %v1893_v14 = vadd.f32 %v1850_v17, %v4250_v16 }
 0x29b   : > { %3112 = vst [vmem:[%s4004_s20 + $0x58] sm:$0xff] %v3080_v36   ;;  %v2754_v24 = vadd.f32 %v2753_v59, %v2723_v9  ;;  %v2290_v35 = vadd.f32 %v2246_v54, %v2086_v28 }
 0x29c   : > { %v2449_v12 = vpop.f32.mrf.mxu0 }
 0x29d   : > { %v2491_v26 = vadd.f32 %v2447_v11, %v2290_v35 }
 0x29f   : > { %v2591_v10 = vadd.f32 %v3987_v13, %v2491_v26 }
 0x2a0   : > { %v2044_v37 = vpop.f32.mrf.mxu2 }
 0x2a1   : > { %v2686_v18 = vadd.f32 %v2685_v2, %v2591_v10  ;;  %v2724_v32 = vmul.f32 %v2591_v10, %v2591_v10  ;;  %v2087_v34 = vadd.f32 %v2044_v37, %v1893_v14  ;;  %v2248_v63 = vpop.f32.mrf.mxu3  ;;  %v1853_v22 = vpop.f32.mrf.mxu1 }
 0x2a2   : > { %v1894_v33 = vadd.f32 %v1853_v22, %v4251_v55 }
 0x2a3   : > { %v2755_v5 = vadd.f32 %v2754_v24, %v2724_v32  ;;  %v2291_v58 = vadd.f32 %v2248_v63, %v2087_v34 }
 0x2a4   : > { %v2452_v19 = vpop.f32.mrf.mxu0 }
 0x2a5   : > { %v2492_v57 = vadd.f32 %v2449_v12, %v2291_v58 }
 0x2a7   : > { %v2592_v8 = vadd.f32 %v3987_v13, %v2492_v57 }
 0x2a8   : > { %v2047_v20 = vpop.f32.mrf.mxu2 }
 0x2a9   : > { %v3085_v56 = vpack.c.bf16 %v2592_v8, %v2591_v10  ;;  %v2687_v38 = vadd.f32 %v2686_v18, %v2592_v8  ;;  %v2725_v30 = vmul.f32 %v2592_v8, %v2592_v8  ;;  %v2088_v4 = vadd.f32 %v2047_v20, %v1894_v33  ;;  %v2251_v53 = vpop.f32.mrf.mxu3  ;;  %v1855_v0 = vpop.f32.mrf.mxu1 }
 0x2aa   : > { %v1895_v42 = vadd.f32 %v1855_v0, %v4252_v7 }
 0x2ab   : > { %3113 = vst [vmem:[%s4004_s20 + $0x60] sm:$0xff] %v3085_v56   ;;  %v2756_v31 = vadd.f32 %v2755_v5, %v2725_v30  ;;  %v2292_v1 = vadd.f32 %v2251_v53, %v2088_v4 }
 0x2ac   : > { %v2454_v23 = vpop.f32.mrf.mxu0 }
 0x2ad   : > { %v2493_v21 = vadd.f32 %v2452_v19, %v2292_v1 }
 0x2af   : > { %v2593_v29 = vadd.f32 %v3987_v13, %v2493_v21 }
 0x2b0   : > { %v2049_v41 = vpop.f32.mrf.mxu2 }
 0x2b1   : > { %v2688_v43 = vadd.f32 %v2687_v38, %v2593_v29  ;;  %v2726_v15 = vmul.f32 %v2593_v29, %v2593_v29  ;;  %v2089_v3 = vadd.f32 %v2049_v41, %v1895_v42  ;;  %v2253_v48 = vpop.f32.mrf.mxu3  ;;  %v1858_v61 = vpop.f32.mrf.mxu1 }
 0x2b2   : > { %v1896_v59 = vadd.f32 %v1858_v61, %v3955_v6 }
 0x2b3   : > { %v2757_v60 = vadd.f32 %v2756_v31, %v2726_v15  ;;  %v2293_v27 = vadd.f32 %v2253_v48, %v2089_v3 }
 0x2b4   : > { %v2457_v51 = vpop.f32.mrf.mxu0 }
 0x2b5   : > { %v2494_v25 = vadd.f32 %v2454_v23, %v2293_v27 }
 0x2b7   : > { %v2594_v44 = vadd.f32 %v3987_v13, %v2494_v25 }
 0x2b8   : > { %v2052_v62 = vpop.f32.mrf.mxu2 }
 0x2b9   : > { %v3090_v11 = vpack.c.bf16 %v2594_v44, %v2593_v29  ;;  %v2689_v47 = vadd.f32 %v2688_v43, %v2594_v44  ;;  %v2727_v49 = vmul.f32 %v2594_v44, %v2594_v44  ;;  %v2090_v39 = vadd.f32 %v2052_v62, %v1896_v59  ;;  %v2256_v45 = vpop.f32.mrf.mxu3  ;;  %v1860_v52 = vpop.f32.mrf.mxu1 }
 0x2ba   : > { %v1897_v54 = vadd.f32 %v1860_v52, %v3962_v50 }
 0x2bb   : > { %3114 = vst [vmem:[%s4004_s20 + $0x68] sm:$0xff] %v3090_v11   ;;  %v2758_v36 = vadd.f32 %v2757_v60, %v2727_v49  ;;  %v2294_v2 = vadd.f32 %v2256_v45, %v2090_v39 }
 0x2bc   : > { %v2459_v17 = vpop.f32.mrf.mxu0 }
 0x2bd   : > { %v2495_v9 = vadd.f32 %v2457_v51, %v2294_v2 }
 0x2bf   : > { %v2595_v28 = vadd.f32 %v3987_v13, %v2495_v9 }
 0x2c0   : > { %v2054_v24 = vpop.f32.mrf.mxu2 }
 0x2c1   : > { %v2690_v35 = vadd.f32 %v2689_v47, %v2595_v28  ;;  %v2728_v12 = vmul.f32 %v2595_v28, %v2595_v28  ;;  %v2091_v6 = vadd.f32 %v2054_v24, %v1897_v54  ;;  %v2258_v26 = vpop.f32.mrf.mxu3  ;;  %v1863_v10 = vpop.f32.mrf.mxu1 }
 0x2c2   : > { %v1898_v32 = vadd.f32 %v1863_v10, %v3969_v46 }
 0x2c3   : > { %v2759_v16 = vadd.f32 %v2758_v36, %v2728_v12  ;;  %v2295_v14 = vadd.f32 %v2258_v26, %v2091_v6 }
 0x2c4   : > { %v2462_v19 = vpop.f32.mrf.mxu0 }
 0x2c5   : > { %v2496_v37 = vadd.f32 %v2459_v17, %v2295_v14 }
 0x2c7   : > { %v2596_v18 = vadd.f32 %v3987_v13, %v2496_v37 }
 0x2c8   : > { %v2057_v34 = vpop.f32.mrf.mxu2 }
 0x2c9   : > { %v3095_v63 = vpack.c.bf16 %v2596_v18, %v2595_v28  ;;  %v2691_v22 = vadd.f32 %v2690_v35, %v2596_v18  ;;  %v2729_v5 = vmul.f32 %v2596_v18, %v2596_v18  ;;  %v2092_v50 = vadd.f32 %v2057_v34, %v1898_v32  ;;  %v2261_v58 = vpop.f32.mrf.mxu3  ;;  %v1865_v55 = vpop.f32.mrf.mxu1 }
 0x2ca   : > { %v1899_v56 = vadd.f32 %v1865_v55, %v3976_v40 }
 0x2cb   : > { %3115 = vst [vmem:[%s4004_s20 + $0x70] sm:$0xff] %v3095_v63   ;;  %v2760_v57 = vadd.f32 %v2759_v16, %v2729_v5  ;;  %v2296_v8 = vadd.f32 %v2261_v58, %v2092_v50 }
 0x2cc   : > { %v2464_v1 = vpop.f32.mrf.mxu0 }
 0x2cd   : > { %v2497_v33 = vadd.f32 %v2462_v19, %v2296_v8 }
 0x2cf   : > { %v2597_v20 = vadd.f32 %v3987_v13, %v2497_v33 }
 0x2d0   : > { %v2059_v38 = vpop.f32.mrf.mxu2 }
 0x2d1   : > { %v2692_v30 = vadd.f32 %v2691_v22, %v2597_v20  ;;  %v2730_v46 = vmul.f32 %v2597_v20, %v2597_v20  ;;  %v2093_v4 = vadd.f32 %v2059_v38, %v1899_v56  ;;  %v2263_v53 = vpop.f32.mrf.mxu3 }
 0x2d3   : > { %v2761_v0 = vadd.f32 %v2760_v57, %v2730_v46  ;;  %v2297_v31 = vadd.f32 %v2263_v53, %v2093_v4 }
 0x2d5   : > { %v2498_v23 = vadd.f32 %v2464_v1, %v2297_v31 }
 0x2d7   : > { %v2598_v21 = vadd.f32 %v3987_v13, %v2498_v23 }
 0x2d9   : > { %v3100_v29 = vpack.c.bf16 %v2598_v21, %v2597_v20  ;;  %v2693_v7 = vadd.f32 %v2692_v30, %v2598_v21  ;;  %v2731_v42 = vmul.f32 %v2598_v21, %v2598_v21 }
 0x2db   : > { %3116 = vst [vmem:[%s4004_s20 + $0x78] sm:$0xff] %v3100_v29   ;;  %v2694_v41 = vrot.slane %v2693_v7, 4  ;;  %v2762_v43 = vadd.f32 %v2761_v0, %v2731_v42 }
 0x2dd   : > { %v2695_v15 = vadd.f32 %v2694_v41, %v2693_v7  ;;  %v2763_v40 = vrot.slane %v2762_v43, 4 }
 0x2df   : > { %v2696_v3 = vrot.slane %v2695_v15, 2  ;;  %v2764_v48 = vadd.f32 %v2763_v40, %v2762_v43 }
 0x2e1   : > { %v2697_v61 = vadd.f32 %v2696_v3, %v2695_v15  ;;  %v2765_v60 = vrot.slane %v2764_v48, 2 }
 0x2e3   : > { %v2698_v27 = vrot.slane %v2697_v61, 1  ;;  %v2766_v25 = vadd.f32 %v2765_v60, %v2764_v48 }
 0x2e5   : > { %v2767_v51 = vrot.slane %v2766_v25, 1  ;;  %v2699_v13 = vadd.f32 %v2698_v27, %v2697_v61 }
 0x2e7   : > { %v2768_v44 = vadd.f32 %v2767_v51, %v2766_v25 }
 0x2e9   : > { %v2770_v59 = vsel %vm2769_vm4, %v2699_v13, %v2768_v44 }
 0x2ea   : > { %2771 = vst [vmem:[%s208_s24] sm:$0x3] %v2770_v59 }
 0x2eb PF: > { %s15_s15 = sadd.s32 1, %s3136_s15  }
 0x2ec   : > { %p12_p4 = scmp.ge.s32.totalorder %s15_s15, 4  }
 0x2ee   :  { %14 = sbr.rel (!%p12_p4) target bundleno = 1 (0x1), region = 82 }

</bundles_post_ra>
